<compile_context>
chip_gen: v5e
topology: v5e:2x2
jax: 0.10.0
libtpu: 0.0.40
codegen_flags: <defaults>
</compile_context>

<pallas_src>
import jax
import jax.numpy as jnp
from jax.experimental import pallas as pl
from jax.experimental.pallas import tpu as pltpu

C = 64  # fixed by the module: Conv2d(64, 64, kernel_size=3, padding=1)


def _pad_rows(w):
    # Top padding (in flattened activation rows) of the kw-folded slab, rounded up to
    # a sublane multiple so the wide strip loads start 8-aligned when W % 8 == 0.
    return ((w + 1 + 7) // 8) * 8


def basic_block_kernel(x_ref, w1_ref, b1_ref, w2_ref, b2_ref, out_ref,
                       slab_ref, acc_ref):
    # x_ref:   (B, H, W, C)  f32 activation block (NHWC)
    # w*_ref:  (3, 3*C, C)   per-kh contiguous (192, 64) weight matrices
    # b*_ref:  (1, C)        bias
    # slab_ref:(P+W+B*H*W, 3*C) f32 scratch: kw-folded activation slab
    # acc_ref: (B*H*W, C)    f32 accumulator scratch
    B, H, W, _ = x_ref.shape
    BHW = B * H * W
    P = _pad_rows(W)
    S_rows = slab_ref.shape[0]

    # Per-image (h, w) coordinates of each flattened row (shared by both convs).
    h_ids = jax.lax.broadcasted_iota(jnp.int32, (B, H, W, 1), 1).reshape(BHW, 1)
    w_ids = jax.lax.broadcasted_iota(jnp.int32, (B, H, W, 1), 2).reshape(BHW, 1)
    keep_wm1 = w_ids < (W - 1)   # store-time mask for the dw = -1 lane block
    keep_wp1 = w_ids >= 1        # store-time mask for the dw = +1 lane block
    keep_hm1 = h_ids >= 1        # load-time mask for dh = -1
    keep_hp1 = h_ids < (H - 1)   # load-time mask for dh = +1

    # Only the halo bands that the scatter below never overwrites need to be zero.
    # Zero just those bands once per grid step (the interior is fully rewritten by
    # each conv's stores) instead of blanking a whole padded buffer per conv.
    slab_ref[0:P + 1, :] = jnp.zeros((P + 1, 3 * C), jnp.float32)
    slab_ref[P + BHW - 1:, :] = jnp.zeros((S_rows - (P + BHW - 1), 3 * C),
                                          jnp.float32)

    x2d = x_ref[...].reshape(BHW, C)  # residual kept in f32

    def conv3x3(act, w_ref, b_ref):
        # act: (B*H*W, C) f32, already ReLU'ed.  Slab row j, lane block kw holds
        # act[j - P + (kw - 1)] with w-wraparound sources zeroed, so the three kw
        # taps fold into a single K=192 contraction per kh.
        slab_ref[P + 1:P + 1 + BHW, 0:C] = jnp.where(keep_wm1, act, 0.0)   # dw = -1
        slab_ref[P:P + BHW, C:2 * C] = act                                 # dw =  0
        slab_ref[P - 1:P - 1 + BHW, 2 * C:3 * C] = jnp.where(keep_wp1, act, 0.0)  # +1

        for kh in range(3):
            dh = kh - 1
            lo = P + dh * W
            strip = slab_ref[lo:lo + BHW, :]                  # (B*H*W, 3*C)
            if dh == -1:
                strip = jnp.where(keep_hm1, strip, 0.0)
            elif dh == 1:
                strip = jnp.where(keep_hp1, strip, 0.0)
            part = jnp.dot(strip, w_ref[kh],                   # (192, 64) weight
                           preferred_element_type=jnp.float32)
            if kh == 0:
                acc_ref[...] = part        # first tap initializes (no zeros fill)
            else:
                acc_ref[...] += part       # accumulate in persistent f32 VMEM
        return acc_ref[...] + b_ref[...]

    y = conv3x3(jnp.maximum(x2d, 0.0), w1_ref, b1_ref)   # relu1 -> conv1
    y = conv3x3(jnp.maximum(y, 0.0), w2_ref, b2_ref)      # relu2 -> conv2
    out_ref[...] = (y + x2d).reshape(B, H, W, C).astype(out_ref.dtype)  # + residual


def basic_block(x_nchw, w1, b1, w2, b2, *, images_per_step=1):
    """x_nchw: (N, 64, H, W) float32. w1/w2: HWIO (3,3,64,64). Returns (N, 64, H, W).

    images_per_step = 1 keeps a >=2-way "parallel" grid (both v7x TensorCores busy);
    images_per_step = N merges the batch into one grid step (larger matmul M, best on
    single-TensorCore v5e / v6e).
    """
    x = jnp.transpose(x_nchw, (0, 2, 3, 1))  # NCHW -> NHWC (C on the lane axis)
    N, H, W, Cin = x.shape
    assert Cin == C

    B = images_per_step
    if B <= 0 or N % B != 0:
        B = 1
    grid = (N // B,)

    BHW = B * H * W
    P = _pad_rows(W)
    slab_rows = P + W + BHW

    # Weights HWIO (3,3,C,C) -> (3, 3*C, C): each kh slice is a contiguous (192, 64)
    # matrix matching the kw-folded K=192 contraction (no in-kernel reshuffling).
    w1f = w1.reshape(3, 3 * Cin, Cin)
    w2f = w2.reshape(3, 3 * Cin, Cin)

    # Explicit VMEM budget: in/out blocks (double-buffered), both weights
    # (double-buffered), kw-folded slab, f32 accumulator, plus headroom.
    blk = BHW * Cin * 4
    wts = 2 * 9 * Cin * Cin * 4
    slab = slab_rows * 3 * Cin * 4
    vmem_budget = 2 * 2 * blk + 2 * wts + slab + blk + 4 * blk
    vmem_limit = int(min(64 * 1024 * 1024, max(2 * vmem_budget, 8 * 1024 * 1024)))

    out_nhwc = pl.pallas_call(
        basic_block_kernel,
        out_shape=jax.ShapeDtypeStruct((N, H, W, Cin), x.dtype),
        grid_spec=pltpu.PrefetchScalarGridSpec(
            num_scalar_prefetch=0,
            grid=grid,
            in_specs=[
                pl.BlockSpec((B, H, W, Cin), lambda n: (n, 0, 0, 0)),
                pl.BlockSpec((3, 3 * Cin, Cin), lambda n: (0, 0, 0)),
                pl.BlockSpec((1, Cin), lambda n: (0, 0)),
                pl.BlockSpec((3, 3 * Cin, Cin), lambda n: (0, 0, 0)),
                pl.BlockSpec((1, Cin), lambda n: (0, 0)),
            ],
            out_specs=pl.BlockSpec((B, H, W, Cin), lambda n: (n, 0, 0, 0)),
            scratch_shapes=[
                pltpu.VMEM((slab_rows, 3 * Cin), jnp.float32),  # kw-folded slab
                pltpu.VMEM((BHW, Cin), jnp.float32),            # f32 accumulator
            ],
        ),
        compiler_params=pltpu.CompilerParams(
            dimension_semantics=("parallel",),
            vmem_limit_bytes=vmem_limit,
        ),
    )(x, w1f, b1.reshape(1, Cin), w2f, b2.reshape(1, Cin))

    return jnp.transpose(out_nhwc, (0, 3, 1, 2))  # -> NCHW


def reference(x_nchw, w1, b1, w2, b2):
    # Pure-JAX reference of the PyTorch forward.
    x = jnp.transpose(x_nchw, (0, 2, 3, 1))

    def conv(a, w, b):
        return jax.lax.conv_general_dilated(
            a, w, window_strides=(1, 1), padding="SAME",
            dimension_numbers=("NHWC", "HWIO", "NHWC")) + b

    y = conv(jnp.maximum(x, 0.0), w1, b1)
    y = conv(jnp.maximum(y, 0.0), w2, b2)
    y = y + x
    return jnp.transpose(y, (0, 3, 1, 2))


if __name__ == "__main__":
    key = jax.random.PRNGKey(0)
    kx, k1, k2, k3, k4 = jax.random.split(key, 5)

    N, H, W = 2, 16, 16
    x = jax.random.normal(kx, (N, C, H, W), jnp.float32)  # NCHW, like PyTorch

    # Deterministic parameter init (PyTorch-style uniform(-1/sqrt(fan_in), +)).
    fan_in = C * 3 * 3
    bound = 1.0 / jnp.sqrt(jnp.float32(fan_in))
    w1 = jax.random.uniform(k1, (3, 3, C, C), jnp.float32, -bound, bound)  # HWIO
    b1 = jax.random.uniform(k2, (C,), jnp.float32, -bound, bound)
    w2 = jax.random.uniform(k3, (3, 3, C, C), jnp.float32, -bound, bound)
    b2 = jax.random.uniform(k4, (C,), jnp.float32, -bound, bound)

    out = basic_block(x, w1, b1, w2, b2)
    out = jax.block_until_ready(out)

    ref = jax.block_until_ready(reference(x, w1, b1, w2, b2))
    assert out.shape == (N, C, H, W)
    assert jnp.allclose(out, ref, atol=1e-3, rtol=1e-3), "mismatch vs JAX reference"

    print("KERNEL_OK")
</pallas_src>

<mosaic_0001>
module attributes {stable_mosaic.version = 11 : i64} {
  func.func @basic_block_kernel(%arg0: i32, %arg1: memref<1x16x16x64xf32, #tpu.memory_space<vmem>>, %arg2: memref<3x192x64xf32, #tpu.memory_space<vmem>>, %arg3: memref<1x64xf32, #tpu.memory_space<vmem>>, %arg4: memref<3x192x64xf32, #tpu.memory_space<vmem>>, %arg5: memref<1x64xf32, #tpu.memory_space<vmem>>, %arg6: memref<1x16x16x64xf32, #tpu.memory_space<vmem>>, %arg7: memref<296x192xf32, #tpu.memory_space<vmem>>, %arg8: memref<256x64xf32, #tpu.memory_space<vmem>>) attributes {dimension_semantics = [#tpu.dimension_semantics<parallel>], iteration_bounds = array<i64: 2>, scalar_prefetch = 0 : i64, scratch_operands = 2 : i64, tpu.core_type = #tpu.core_type<tc>, window_params = [{transform_indices = @transform_0, window_bounds = array<i64: 1, 16, 16, 64>}, {pipeline_mode = #tpu.pipeline_mode<synchronous>, transform_indices = @transform_1, window_bounds = array<i64: 3, 192, 64>}, {pipeline_mode = #tpu.pipeline_mode<synchronous>, transform_indices = @transform_2, window_bounds = array<i64: 1, 64>}, {pipeline_mode = #tpu.pipeline_mode<synchronous>, transform_indices = @transform_3, window_bounds = array<i64: 3, 192, 64>}, {pipeline_mode = #tpu.pipeline_mode<synchronous>, transform_indices = @transform_4, window_bounds = array<i64: 1, 64>}, {transform_indices = @transform_5, window_bounds = array<i64: 1, 16, 16, 64>}]} {
    %0 = tpu.iota {dimensions = array<i32: 1>} : vector<1x16x16x1xi32>
    %1 = vector.shape_cast %0 : vector<1x16x16x1xi32> to vector<256x1xi32>
    %2 = tpu.iota {dimensions = array<i32: 2>} : vector<1x16x16x1xi32>
    %3 = vector.shape_cast %2 : vector<1x16x16x1xi32> to vector<256x1xi32>
    %c15_i32 = arith.constant 15 : i32
    %4 = vector.broadcast %c15_i32 : i32 to vector<256x1xi32>
    %5 = arith.cmpi slt, %3, %4 : vector<256x1xi32>
    %c1_i32 = arith.constant 1 : i32
    %6 = vector.broadcast %c1_i32 : i32 to vector<256x1xi32>
    %7 = arith.cmpi sge, %3, %6 : vector<256x1xi32>
    %c1_i32_0 = arith.constant 1 : i32
    %8 = vector.broadcast %c1_i32_0 : i32 to vector<256x1xi32>
    %9 = arith.cmpi sge, %1, %8 : vector<256x1xi32>
    %c15_i32_1 = arith.constant 15 : i32
    %10 = vector.broadcast %c15_i32_1 : i32 to vector<256x1xi32>
    %11 = arith.cmpi slt, %1, %10 : vector<256x1xi32>
    %cst = arith.constant 0.000000e+00 : f32
    %12 = vector.broadcast %cst : f32 to vector<25x192xf32>
    %c0 = arith.constant 0 : index
    %c0_2 = arith.constant 0 : index
    %13 = vector.load %arg7[%c0, %c0_2] : memref<296x192xf32, #tpu.memory_space<vmem>>, vector<25x192xf32>
    tpu.vector_store %arg7[%c0, %c0_2], %12 {strides = array<i32>} : memref<296x192xf32, #tpu.memory_space<vmem>>, vector<25x192xf32>,
    %cst_3 = arith.constant 0.000000e+00 : f32
    %14 = vector.broadcast %cst_3 : f32 to vector<17x192xf32>
    %c279 = arith.constant 279 : index
    %c0_4 = arith.constant 0 : index
    %15 = vector.load %arg7[%c279, %c0_4] : memref<296x192xf32, #tpu.memory_space<vmem>>, vector<17x192xf32>
    tpu.vector_store %arg7[%c279, %c0_4], %14 {strides = array<i32>} : memref<296x192xf32, #tpu.memory_space<vmem>>, vector<17x192xf32>,
    %c0_5 = arith.constant 0 : index
    %c0_6 = arith.constant 0 : index
    %c0_7 = arith.constant 0 : index
    %c0_8 = arith.constant 0 : index
    %16 = vector.load %arg1[%c0_5, %c0_6, %c0_7, %c0_8] : memref<1x16x16x64xf32, #tpu.memory_space<vmem>>, vector<1x16x16x64xf32>
    %17 = vector.shape_cast %16 : vector<1x16x16x64xf32> to vector<256x64xf32>
    %cst_9 = arith.constant 0.000000e+00 : f32
    %18 = vector.broadcast %cst_9 : f32 to vector<256x64xf32>
    %19 = arith.maximumf %17, %18 : vector<256x64xf32>
    %cst_10 = arith.constant 0.000000e+00 : f32
    %20 = vector.shape_cast %5 : vector<256x1xi1> to vector<256x1xi1>
    %21 = vector.broadcast %20 : vector<256x1xi1> to vector<256x64xi1>
    %22 = vector.broadcast %cst_10 : f32 to vector<256x64xf32>
    %23 = arith.select %21, %19, %22 : vector<256x64xi1>, vector<256x64xf32>
    %c25 = arith.constant 25 : index
    %c0_11 = arith.constant 0 : index
    %24 = vector.load %arg7[%c25, %c0_11] : memref<296x192xf32, #tpu.memory_space<vmem>>, vector<256x64xf32>
    tpu.vector_store %arg7[%c25, %c0_11], %23 {strides = array<i32>} : memref<296x192xf32, #tpu.memory_space<vmem>>, vector<256x64xf32>,
    %c24 = arith.constant 24 : index
    %c64 = arith.constant 64 : index
    %25 = vector.load %arg7[%c24, %c64] : memref<296x192xf32, #tpu.memory_space<vmem>>, vector<256x64xf32>
    tpu.vector_store %arg7[%c24, %c64], %19 {strides = array<i32>} : memref<296x192xf32, #tpu.memory_space<vmem>>, vector<256x64xf32>,
    %cst_12 = arith.constant 0.000000e+00 : f32
    %26 = vector.shape_cast %7 : vector<256x1xi1> to vector<256x1xi1>
    %27 = vector.broadcast %26 : vector<256x1xi1> to vector<256x64xi1>
    %28 = vector.broadcast %cst_12 : f32 to vector<256x64xf32>
    %29 = arith.select %27, %19, %28 : vector<256x64xi1>, vector<256x64xf32>
    %c23 = arith.constant 23 : index
    %c128 = arith.constant 128 : index
    %30 = vector.load %arg7[%c23, %c128] : memref<296x192xf32, #tpu.memory_space<vmem>>, vector<256x64xf32>
    tpu.vector_store %arg7[%c23, %c128], %29 {strides = array<i32>} : memref<296x192xf32, #tpu.memory_space<vmem>>, vector<256x64xf32>,
    %c8 = arith.constant 8 : index
    %c0_13 = arith.constant 0 : index
    %31 = vector.load %arg7[%c8, %c0_13] : memref<296x192xf32, #tpu.memory_space<vmem>>, vector<256x192xf32>
    %cst_14 = arith.constant 0.000000e+00 : f32
    %32 = vector.shape_cast %9 : vector<256x1xi1> to vector<256x1xi1>
    %33 = vector.broadcast %32 : vector<256x1xi1> to vector<256x192xi1>
    %34 = vector.broadcast %cst_14 : f32 to vector<256x192xf32>
    %35 = arith.select %33, %31, %34 : vector<256x192xi1>, vector<256x192xf32>
    %c0_15 = arith.constant 0 : index
    %c0_16 = arith.constant 0 : index
    %c0_17 = arith.constant 0 : index
    %36 = vector.load %arg2[%c0_15, %c0_16, %c0_17] : memref<3x192x64xf32, #tpu.memory_space<vmem>>, vector<1x192x64xf32>
    %37 = vector.shape_cast %36 : vector<1x192x64xf32> to vector<192x64xf32>
    %cst_18 = arith.constant dense<0.000000e+00> : vector<256x64xf32>
    %38 = tpu.matmul %35, %37, %cst_18 {dimension_numbers = #tpu.dot_dimension_numbers<[1], [0], [0], [1], [0, 0, 1, 1], [], []>} : vector<256x192xf32>, vector<192x64xf32>, vector<256x64xf32> -> vector<256x64xf32>
    %c0_19 = arith.constant 0 : index
    %c0_20 = arith.constant 0 : index
    %39 = vector.load %arg8[%c0_19, %c0_20] : memref<256x64xf32, #tpu.memory_space<vmem>>, vector<256x64xf32>
    tpu.vector_store %arg8[%c0_19, %c0_20], %38 {strides = array<i32>} : memref<256x64xf32, #tpu.memory_space<vmem>>, vector<256x64xf32>,
    %c24_21 = arith.constant 24 : index
    %c0_22 = arith.constant 0 : index
    %40 = vector.load %arg7[%c24_21, %c0_22] : memref<296x192xf32, #tpu.memory_space<vmem>>, vector<256x192xf32>
    %c1 = arith.constant 1 : index
    %c0_23 = arith.constant 0 : index
    %c0_24 = arith.constant 0 : index
    %41 = vector.load %arg2[%c1, %c0_23, %c0_24] : memref<3x192x64xf32, #tpu.memory_space<vmem>>, vector<1x192x64xf32>
    %42 = vector.shape_cast %41 : vector<1x192x64xf32> to vector<192x64xf32>
    %cst_25 = arith.constant dense<0.000000e+00> : vector<256x64xf32>
    %43 = tpu.matmul %40, %42, %cst_25 {dimension_numbers = #tpu.dot_dimension_numbers<[1], [0], [0], [1], [0, 0, 1, 1], [], []>} : vector<256x192xf32>, vector<192x64xf32>, vector<256x64xf32> -> vector<256x64xf32>
    %c0_26 = arith.constant 0 : index
    %c0_27 = arith.constant 0 : index
    %44 = vector.load %arg8[%c0_26, %c0_27] : memref<256x64xf32, #tpu.memory_space<vmem>>, vector<256x64xf32>
    %45 = arith.addf %44, %43 : vector<256x64xf32>
    %c0_28 = arith.constant 0 : index
    %c0_29 = arith.constant 0 : index
    %46 = vector.load %arg8[%c0_28, %c0_29] : memref<256x64xf32, #tpu.memory_space<vmem>>, vector<256x64xf32>
    tpu.vector_store %arg8[%c0_28, %c0_29], %45 {strides = array<i32>} : memref<256x64xf32, #tpu.memory_space<vmem>>, vector<256x64xf32>,
    %c40 = arith.constant 40 : index
    %c0_30 = arith.constant 0 : index
    %47 = vector.load %arg7[%c40, %c0_30] : memref<296x192xf32, #tpu.memory_space<vmem>>, vector<256x192xf32>
    %cst_31 = arith.constant 0.000000e+00 : f32
    %48 = vector.shape_cast %11 : vector<256x1xi1> to vector<256x1xi1>
    %49 = vector.broadcast %48 : vector<256x1xi1> to vector<256x192xi1>
    %50 = vector.broadcast %cst_31 : f32 to vector<256x192xf32>
    %51 = arith.select %49, %47, %50 : vector<256x192xi1>, vector<256x192xf32>
    %c2 = arith.constant 2 : index
    %c0_32 = arith.constant 0 : index
    %c0_33 = arith.constant 0 : index
    %52 = vector.load %arg2[%c2, %c0_32, %c0_33] : memref<3x192x64xf32, #tpu.memory_space<vmem>>, vector<1x192x64xf32>
    %53 = vector.shape_cast %52 : vector<1x192x64xf32> to vector<192x64xf32>
    %cst_34 = arith.constant dense<0.000000e+00> : vector<256x64xf32>
    %54 = tpu.matmul %51, %53, %cst_34 {dimension_numbers = #tpu.dot_dimension_numbers<[1], [0], [0], [1], [0, 0, 1, 1], [], []>} : vector<256x192xf32>, vector<192x64xf32>, vector<256x64xf32> -> vector<256x64xf32>
    %c0_35 = arith.constant 0 : index
    %c0_36 = arith.constant 0 : index
    %55 = vector.load %arg8[%c0_35, %c0_36] : memref<256x64xf32, #tpu.memory_space<vmem>>, vector<256x64xf32>
    %56 = arith.addf %55, %54 : vector<256x64xf32>
    %c0_37 = arith.constant 0 : index
    %c0_38 = arith.constant 0 : index
    %57 = vector.load %arg8[%c0_37, %c0_38] : memref<256x64xf32, #tpu.memory_space<vmem>>, vector<256x64xf32>
    tpu.vector_store %arg8[%c0_37, %c0_38], %56 {strides = array<i32>} : memref<256x64xf32, #tpu.memory_space<vmem>>, vector<256x64xf32>,
    %c0_39 = arith.constant 0 : index
    %c0_40 = arith.constant 0 : index
    %58 = vector.load %arg8[%c0_39, %c0_40] : memref<256x64xf32, #tpu.memory_space<vmem>>, vector<256x64xf32>
    %c0_41 = arith.constant 0 : index
    %c0_42 = arith.constant 0 : index
    %59 = vector.load %arg3[%c0_41, %c0_42] : memref<1x64xf32, #tpu.memory_space<vmem>>, vector<1x64xf32>
    %60 = vector.broadcast %59 : vector<1x64xf32> to vector<256x64xf32>
    %61 = arith.addf %58, %60 : vector<256x64xf32>
    %cst_43 = arith.constant 0.000000e+00 : f32
    %62 = vector.broadcast %cst_43 : f32 to vector<256x64xf32>
    %63 = arith.maximumf %61, %62 : vector<256x64xf32>
    %cst_44 = arith.constant 0.000000e+00 : f32
    %64 = vector.shape_cast %5 : vector<256x1xi1> to vector<256x1xi1>
    %65 = vector.broadcast %64 : vector<256x1xi1> to vector<256x64xi1>
    %66 = vector.broadcast %cst_44 : f32 to vector<256x64xf32>
    %67 = arith.select %65, %63, %66 : vector<256x64xi1>, vector<256x64xf32>
    %c25_45 = arith.constant 25 : index
    %c0_46 = arith.constant 0 : index
    %68 = vector.load %arg7[%c25_45, %c0_46] : memref<296x192xf32, #tpu.memory_space<vmem>>, vector<256x64xf32>
    tpu.vector_store %arg7[%c25_45, %c0_46], %67 {strides = array<i32>} : memref<296x192xf32, #tpu.memory_space<vmem>>, vector<256x64xf32>,
    %c24_47 = arith.constant 24 : index
    %c64_48 = arith.constant 64 : index
    %69 = vector.load %arg7[%c24_47, %c64_48] : memref<296x192xf32, #tpu.memory_space<vmem>>, vector<256x64xf32>
    tpu.vector_store %arg7[%c24_47, %c64_48], %63 {strides = array<i32>} : memref<296x192xf32, #tpu.memory_space<vmem>>, vector<256x64xf32>,
    %cst_49 = arith.constant 0.000000e+00 : f32
    %70 = vector.shape_cast %7 : vector<256x1xi1> to vector<256x1xi1>
    %71 = vector.broadcast %70 : vector<256x1xi1> to vector<256x64xi1>
    %72 = vector.broadcast %cst_49 : f32 to vector<256x64xf32>
    %73 = arith.select %71, %63, %72 : vector<256x64xi1>, vector<256x64xf32>
    %c23_50 = arith.constant 23 : index
    %c128_51 = arith.constant 128 : index
    %74 = vector.load %arg7[%c23_50, %c128_51] : memref<296x192xf32, #tpu.memory_space<vmem>>, vector<256x64xf32>
    tpu.vector_store %arg7[%c23_50, %c128_51], %73 {strides = array<i32>} : memref<296x192xf32, #tpu.memory_space<vmem>>, vector<256x64xf32>,
    %c8_52 = arith.constant 8 : index
    %c0_53 = arith.constant 0 : index
    %75 = vector.load %arg7[%c8_52, %c0_53] : memref<296x192xf32, #tpu.memory_space<vmem>>, vector<256x192xf32>
    %cst_54 = arith.constant 0.000000e+00 : f32
    %76 = vector.shape_cast %9 : vector<256x1xi1> to vector<256x1xi1>
    %77 = vector.broadcast %76 : vector<256x1xi1> to vector<256x192xi1>
    %78 = vector.broadcast %cst_54 : f32 to vector<256x192xf32>
    %79 = arith.select %77, %75, %78 : vector<256x192xi1>, vector<256x192xf32>
    %c0_55 = arith.constant 0 : index
    %c0_56 = arith.constant 0 : index
    %c0_57 = arith.constant 0 : index
    %80 = vector.load %arg4[%c0_55, %c0_56, %c0_57] : memref<3x192x64xf32, #tpu.memory_space<vmem>>, vector<1x192x64xf32>
    %81 = vector.shape_cast %80 : vector<1x192x64xf32> to vector<192x64xf32>
    %cst_58 = arith.constant dense<0.000000e+00> : vector<256x64xf32>
    %82 = tpu.matmul %79, %81, %cst_58 {dimension_numbers = #tpu.dot_dimension_numbers<[1], [0], [0], [1], [0, 0, 1, 1], [], []>} : vector<256x192xf32>, vector<192x64xf32>, vector<256x64xf32> -> vector<256x64xf32>
    %c0_59 = arith.constant 0 : index
    %c0_60 = arith.constant 0 : index
    %83 = vector.load %arg8[%c0_59, %c0_60] : memref<256x64xf32, #tpu.memory_space<vmem>>, vector<256x64xf32>
    tpu.vector_store %arg8[%c0_59, %c0_60], %82 {strides = array<i32>} : memref<256x64xf32, #tpu.memory_space<vmem>>, vector<256x64xf32>,
    %c24_61 = arith.constant 24 : index
    %c0_62 = arith.constant 0 : index
    %84 = vector.load %arg7[%c24_61, %c0_62] : memref<296x192xf32, #tpu.memory_space<vmem>>, vector<256x192xf32>
    %c1_63 = arith.constant 1 : index
    %c0_64 = arith.constant 0 : index
    %c0_65 = arith.constant 0 : index
    %85 = vector.load %arg4[%c1_63, %c0_64, %c0_65] : memref<3x192x64xf32, #tpu.memory_space<vmem>>, vector<1x192x64xf32>
    %86 = vector.shape_cast %85 : vector<1x192x64xf32> to vector<192x64xf32>
    %cst_66 = arith.constant dense<0.000000e+00> : vector<256x64xf32>
    %87 = tpu.matmul %84, %86, %cst_66 {dimension_numbers = #tpu.dot_dimension_numbers<[1], [0], [0], [1], [0, 0, 1, 1], [], []>} : vector<256x192xf32>, vector<192x64xf32>, vector<256x64xf32> -> vector<256x64xf32>
    %c0_67 = arith.constant 0 : index
    %c0_68 = arith.constant 0 : index
    %88 = vector.load %arg8[%c0_67, %c0_68] : memref<256x64xf32, #tpu.memory_space<vmem>>, vector<256x64xf32>
    %89 = arith.addf %88, %87 : vector<256x64xf32>
    %c0_69 = arith.constant 0 : index
    %c0_70 = arith.constant 0 : index
    %90 = vector.load %arg8[%c0_69, %c0_70] : memref<256x64xf32, #tpu.memory_space<vmem>>, vector<256x64xf32>
    tpu.vector_store %arg8[%c0_69, %c0_70], %89 {strides = array<i32>} : memref<256x64xf32, #tpu.memory_space<vmem>>, vector<256x64xf32>,
    %c40_71 = arith.constant 40 : index
    %c0_72 = arith.constant 0 : index
    %91 = vector.load %arg7[%c40_71, %c0_72] : memref<296x192xf32, #tpu.memory_space<vmem>>, vector<256x192xf32>
    %cst_73 = arith.constant 0.000000e+00 : f32
    %92 = vector.shape_cast %11 : vector<256x1xi1> to vector<256x1xi1>
    %93 = vector.broadcast %92 : vector<256x1xi1> to vector<256x192xi1>
    %94 = vector.broadcast %cst_73 : f32 to vector<256x192xf32>
    %95 = arith.select %93, %91, %94 : vector<256x192xi1>, vector<256x192xf32>
    %c2_74 = arith.constant 2 : index
    %c0_75 = arith.constant 0 : index
    %c0_76 = arith.constant 0 : index
    %96 = vector.load %arg4[%c2_74, %c0_75, %c0_76] : memref<3x192x64xf32, #tpu.memory_space<vmem>>, vector<1x192x64xf32>
    %97 = vector.shape_cast %96 : vector<1x192x64xf32> to vector<192x64xf32>
    %cst_77 = arith.constant dense<0.000000e+00> : vector<256x64xf32>
    %98 = tpu.matmul %95, %97, %cst_77 {dimension_numbers = #tpu.dot_dimension_numbers<[1], [0], [0], [1], [0, 0, 1, 1], [], []>} : vector<256x192xf32>, vector<192x64xf32>, vector<256x64xf32> -> vector<256x64xf32>
    %c0_78 = arith.constant 0 : index
    %c0_79 = arith.constant 0 : index
    %99 = vector.load %arg8[%c0_78, %c0_79] : memref<256x64xf32, #tpu.memory_space<vmem>>, vector<256x64xf32>
    %100 = arith.addf %99, %98 : vector<256x64xf32>
    %c0_80 = arith.constant 0 : index
    %c0_81 = arith.constant 0 : index
    %101 = vector.load %arg8[%c0_80, %c0_81] : memref<256x64xf32, #tpu.memory_space<vmem>>, vector<256x64xf32>
    tpu.vector_store %arg8[%c0_80, %c0_81], %100 {strides = array<i32>} : memref<256x64xf32, #tpu.memory_space<vmem>>, vector<256x64xf32>,
    %c0_82 = arith.constant 0 : index
    %c0_83 = arith.constant 0 : index
    %102 = vector.load %arg8[%c0_82, %c0_83] : memref<256x64xf32, #tpu.memory_space<vmem>>, vector<256x64xf32>
    %c0_84 = arith.constant 0 : index
    %c0_85 = arith.constant 0 : index
    %103 = vector.load %arg5[%c0_84, %c0_85] : memref<1x64xf32, #tpu.memory_space<vmem>>, vector<1x64xf32>
    %104 = vector.broadcast %103 : vector<1x64xf32> to vector<256x64xf32>
    %105 = arith.addf %102, %104 : vector<256x64xf32>
    %106 = arith.addf %105, %17 : vector<256x64xf32>
    %107 = vector.shape_cast %106 : vector<256x64xf32> to vector<1x16x16x64xf32>
    %c0_86 = arith.constant 0 : index
    %c0_87 = arith.constant 0 : index
    %c0_88 = arith.constant 0 : index
    %c0_89 = arith.constant 0 : index
    %108 = vector.load %arg6[%c0_86, %c0_87, %c0_88, %c0_89] : memref<1x16x16x64xf32, #tpu.memory_space<vmem>>, vector<1x16x16x64xf32>
    tpu.vector_store %arg6[%c0_86, %c0_87, %c0_88, %c0_89], %107 {strides = array<i32>} : memref<1x16x16x64xf32, #tpu.memory_space<vmem>>, vector<1x16x16x64xf32>,
    return
  }
  func.func @transform_0(%arg0: i32) -> (i32, i32, i32, i32) {
    %c0_i32 = arith.constant 0 : i32
    %c0_i32_0 = arith.constant 0 : i32
    %c0_i32_1 = arith.constant 0 : i32
    %c0_i32_2 = arith.constant 0 : i32
    return %arg0, %c0_i32, %c0_i32_0, %c0_i32_1 : i32, i32, i32, i32
  }
  func.func @transform_1(%arg0: i32) -> (i32, i32, i32) {
    %c0_i32 = arith.constant 0 : i32
    %c0_i32_0 = arith.constant 0 : i32
    %c0_i32_1 = arith.constant 0 : i32
    %c0_i32_2 = arith.constant 0 : i32
    return %c0_i32, %c0_i32_0, %c0_i32_1 : i32, i32, i32
  }
  func.func @transform_2(%arg0: i32) -> (i32, i32) {
    %c0_i32 = arith.constant 0 : i32
    %c0_i32_0 = arith.constant 0 : i32
    %c0_i32_1 = arith.constant 0 : i32
    return %c0_i32, %c0_i32_0 : i32, i32
  }
  func.func @transform_3(%arg0: i32) -> (i32, i32, i32) {
    %c0_i32 = arith.constant 0 : i32
    %c0_i32_0 = arith.constant 0 : i32
    %c0_i32_1 = arith.constant 0 : i32
    %c0_i32_2 = arith.constant 0 : i32
    return %c0_i32, %c0_i32_0, %c0_i32_1 : i32, i32, i32
  }
  func.func @transform_4(%arg0: i32) -> (i32, i32) {
    %c0_i32 = arith.constant 0 : i32
    %c0_i32_0 = arith.constant 0 : i32
    %c0_i32_1 = arith.constant 0 : i32
    return %c0_i32, %c0_i32_0 : i32, i32
  }
  func.func @transform_5(%arg0: i32) -> (i32, i32, i32, i32) {
    %c0_i32 = arith.constant 0 : i32
    %c0_i32_0 = arith.constant 0 : i32
    %c0_i32_1 = arith.constant 0 : i32
    %c0_i32_2 = arith.constant 0 : i32
    return %arg0, %c0_i32, %c0_i32_0, %c0_i32_1 : i32, i32, i32, i32
  }
}

</mosaic_0001>

<bundles_post_ra>
// kernel: tpu_custom_call.1
= control target key start
LH: loop header
LB: loop body
LE: loop exit
PB: predicated region body
PF: predicated region fallthrough
CT: control target
= control target key end

     0   :  { %10 = vsyncpa [#allocation5], 0  ;;  %s7574_s0 = inlined_call_operand.vmem [shape: f32[2,16,16,64], index: 0, kind: input, shape index: {}]   ;;  %s7575_s1 = inlined_call_operand.vmem [shape: f32[3,192,64], index: 1, kind: input, shape index: {}]   ;;  %s7576_s2 = inlined_call_operand.vmem [shape: f32[1,64], index: 2, kind: input, shape index: {}]   ;;  %s7577_s3 = inlined_call_operand.vmem [shape: f32[3,192,64], index: 3, kind: input, shape index: {}]   ;;  %s7578_s4 = inlined_call_operand.vmem [shape: f32[1,64], index: 4, kind: input, shape index: {}]   ;;  %s7579_s5 = inlined_call_operand.hbm [shape: f32[2,16,16,64], index: 5, kind: output, shape index: {}]  }
   0x1   :  { %12 = vsyncpa [#allocation5 + $0x1], 0  ;;  %s5097_s18 = smov 0   ;;  %s5099_s19 = smov 0  }
   0x2   :  { %s5101_s20 = smov 0   ;;  %s5103_s21 = smov 0  }
   0x3 LB: > { %s5118_s22 = sadd.s32 4294967295, %s5061_s21   ;;  %s4601_s23 = sadd.s32 4294967294, %s5061_s21   ;;  %s5061_s21 = sphi %s5103_s21, %s7599_s21   ;;  %s5057_s20 = sphi %s5101_s20, %s7598_s20   ;;  %s5053_s19 = sphi %s5099_s19, %s7597_s19   ;;  %s5049_s18 = sphi %s5097_s18, %s7596_s18  }
   0x4   : > { %s5122_s24 = sadd.s32 1, %s5061_s21   ;;  %s135_s25 = sadd.s32 1, %s5057_s20 }
   0x5   : > { %s132_s26 = ssub.s32 %s5061_s21, %s5122_s24  ;;  %p145_p0 = scmp.ne.s32.totalorder %s5057_s20, %s5053_s19 }
   0x6   : > { %p133_p1 = scmp.eq.s32.totalorder %s132_s26, 0  ;;  %p146_p2 = scmp.eq.s32.totalorder %s5118_s22, 1 }
   0x7   : > { %p151_p3 = scmp.ne.s32.totalorder %s5053_s19, %s5049_s18  ;;  %p152_p4 = scmp.eq.s32.totalorder %s4601_s23, 1 }
   0x8   : > { %s5133_s27 = scalar_select %p133_p1, %s5057_s20, %s135_s25  }
   0x9   : > { %p5135_p5 = por %p146_p2, %p145_p0  ;;  %p5139_p6 = por %p152_p4, %p151_p3 }
   0xa   : > { %p4604_p7 = scmp.ge.s32.totalorder %s5061_s21, 1  ;;  %p190_p8 = scmp.lt.s32.totalorder %s5061_s21, 3 }
   0xc   : > { %p191_p9 = pnand %p4604_p7, %p190_p8 }
   0xe   : > { %194 = sbr.rel (%p191_p9) target bundleno = 1197 (0x4ad), region = 40 }
  0x13   : > { %v945_v0 = vld [vmem:[%s7575_s1 + $0x78] sm:$0xff]  ;;  %v944_v2 = vld [vmem:[%s7575_s1 + $0x70] sm:$0xff]  ;;  %p218_p10 = scmp.lt.s32.totalorder %s5118_s22, 1  ;;  %v223_v3 = vlaneseq  ;;  %v5063_v5 = vmov 0.0   ;;  %vm231_vm0 = vcmask 523264   ;;  %v943_v6 = vld [vmem:[%s7575_s1 + $0x68] sm:$0xff] }
  0x14   : > { %v953_v1 = vld [vmem:[%s7575_s1 + $0xb8] sm:$0xff]  ;;  %1047 = vmatpush.msra.mxu0 %v945_v0  ;;  %v952_v4 = vld [vmem:[%s7575_s1 + $0xb0] sm:$0xff]  ;;  %230 = vst [vmem:[#allocation2] sm:$0xff] %v5063_v5  ;;  %v951_v7 = vld [vmem:[%s7575_s1 + $0xa8] sm:$0xff]  ;;  %vm241_vm1 = vcmask 523271   ;;  %s5064_s12 = smov 64  }
  0x15   : > { %1168 = vmatpush.msra.mxu1 %v953_v1  ;;  %v4661_v8 = vld [vmem:[%s7575_s1 + $0x178] sm:$0xff]  ;;  %s219_s25 = scalar_select %p218_p10, %s5118_s22, 1  ;;  %v5169_v9 = vshrl.u32 %v223_v3, 7  ;;  %v4660_v10 = vld [vmem:[%s7575_s1 + $0x170] sm:$0xff]  ;;  %v942_v11 = vld [vmem:[%s7575_s1 + $0x60] sm:$0xff]  ;;  %vm739_vm3 = vcmask 1046528  }
  0x16   : > { %1048 = vmatpush.msra.mxu0 %v944_v2  ;;  %1611 = vmatpush.msra.mxu3 %v4661_v8  ;;  %v950_v12 = vld [vmem:[%s7575_s1 + $0xa0] sm:$0xff]  ;;  %v4659_v13 = vld [vmem:[%s7575_s1 + $0x168] sm:$0xff]  ;;  %v941_v14 = vld [vmem:[%s7575_s1 + $0x58] sm:$0xff]  ;;  %242 = vst.msk [vmem:[#allocation2 + $0x228] sm:$0x80] %vm241_vm1, %v5063_v5  ;;  %vm238_vm4 = vcmask 516096  }
  0x17   : > { %7587 = vst [vmem:[#allocation7_spill] sm:$0xff] %v5169_v9  ;;  %1169 = vmatpush.msra.mxu1 %v952_v4  ;;  %s4893_s10 = sshll.u32 %s219_s25, 8  ;;  %v949_v15 = vld [vmem:[%s7575_s1 + $0x98] sm:$0xff]  ;;  %vm228_vm2 = vcmp.ge.s32.totalorder %v5169_v9, 1  ;;  %v4658_v18 = vld [vmem:[%s7575_s1 + $0x160] sm:$0xff]  ;;  %v940_v19 = vld [vmem:[%s7575_s1 + $0x50] sm:$0xff] }
  0x18   : > { %1049 = vmatpush.msra.mxu0 %v943_v6  ;;  %s5183_s13 = scalar_lea.vmem %s7574_s0, %s4893_s10  ;;  %1612 = vmatpush.msra.mxu3 %v4660_v10  ;;  %v948_v20 = vld [vmem:[%s7575_s1 + $0x90] sm:$0xff]  ;;  %v4657_v23 = vld [vmem:[%s7575_s1 + $0x158] sm:$0xff]  ;;  %v939_v26 = vld [vmem:[%s7575_s1 + $0x48] sm:$0xff]  ;;  %237 = vst [vmem:[#allocation2 + $0x30] sm:$0x1] %v5063_v5  ;;  %vm476_vm5 = vcmask 523265  }
  0x19   : > { %1170 = vmatpush.msra.mxu1 %v951_v7  ;;  %v247_v16 = vld [vmem:[%s5183_s13] sm:$0xff]  ;;  %v248_v21 = vld [vmem:[%s5183_s13 + $0x8] sm:$0xff]  ;;  %v4656_v28 = vld [vmem:[%s7575_s1 + $0x150] sm:$0xff]  ;;  %240 = vst [vmem:[#allocation2 + $0x220] sm:$0x80] %v5063_v5  ;;  %vm379_vm7 = vcmask 1040384  }
  0x1a   : > { %1050 = vmatpush.msra.mxu0 %v942_v11  ;;  %v5197_v17 = vmax.f32 %v247_v16, 0.0  ;;  %1613 = vmatpush.msra.mxu3 %v4659_v13  ;;  %v5215_v24 = vmax.f32 %v248_v21, 0.0  ;;  %v947_v27 = vld [vmem:[%s7575_s1 + $0x88] sm:$0xff]  ;;  %v249_v30 = vld [vmem:[%s5183_s13 + $0x10] sm:$0xff]  ;;  %v938_v31 = vld [vmem:[%s7575_s1 + $0x40] sm:$0xff]  ;;  %vm638_vm8 = vcmask 1048064  }
  0x1b   : > { %1171 = vmatpush.msra.mxu1 %v950_v12  ;;  %v946_v32 = vld [vmem:[%s7575_s1 + $0x80] sm:$0xff]  ;;  %v937_v33 = vld [vmem:[%s7575_s1 + $0x38] sm:$0xff]  ;;  %v5240_v34 = vmax.f32 %v249_v30, 0.0  ;;  %v4655_v36 = vld [vmem:[%s7575_s1 + $0x148] sm:$0xff]  ;;  %239 = vst.msk [vmem:[#allocation2 + $0x38] sm:$0x1] %vm238_vm4, %v5063_v5 }
  0x1c   : > { %1051 = vmatpush.msra.mxu0 %v941_v14  ;;  %v675_v22 = vsel %vm228_vm2, %v5197_v17, 0.0  ;;  %542 = vrot.lane.b32.xlu0 %v5197_v17, %s5064_s12  ;;  %v741_v29 = vrot.slane %v5215_v24, 1  ;;  %v250_v37 = vld [vmem:[%s5183_s13 + $0x18] sm:$0xff]  ;;  %v251_v38 = vld [vmem:[%s5183_s13 + $0x20] sm:$0xff]  ;;  %v252_v41 = vld [vmem:[%s5183_s13 + $0x28] sm:$0xff]  ;;  %vm868_vm9 = vcmask 522240  }
  0x1d   : > { %1172 = vmatpush.msra.mxu1 %v949_v15  ;;  %v740_v25 = vrot.slane %v675_v22, 1  ;;  %1614 = vmatpush.msra.mxu3 %v4658_v18  ;;  %v677_v39 = vsel %vm228_vm2, %v5240_v34, 0.0  ;;  %v4709_v40 = vld [vmem:[%s7575_s1 + $0x1f8] sm:$0xff]  ;;  %v5258_v42 = vmax.f32 %v250_v37, 0.0  ;;  %v5260_v43 = vmax.f32 %v251_v38, 0.0  ;;  %v936_v44 = vld [vmem:[%s7575_s1 + $0x30] sm:$0xff] }
  0x1e   : > { %1052 = vmatpush.msra.mxu0 %v940_v19  ;;  %546 = vrot.lane.b32.xlu1 %v5240_v34, %s5064_s12  ;;  %v4654_v45 = vld [vmem:[%s7575_s1 + $0x140] sm:$0xff]  ;;  %v743_v46 = vrot.slane %v677_v39, 1  ;;  %v5270_v47 = vmax.f32 %v252_v41, 0.0  ;;  %v4717_v48 = vld [vmem:[%s7575_s1 + $0x238] sm:$0xff]  ;;  %v4708_v54 = vld [vmem:[%s7575_s1 + $0x1f0] sm:$0xff]  ;;  %s215_s25 = sand.u32 1, %s5053_s19  }
  0x1f   : > { %1173 = vmatpush.msra.mxu1 %v948_v20  ;;  %1615 = vmatpush.msra.mxu3 %v4657_v23  ;;  %v742_v35 = vsel %vm739_vm3, %v740_v25, %v741_v29  ;;  %v679_v49 = vsel %vm228_vm2, %v5260_v43, 0.0  ;;  %v745_v50 = vrot.slane %v5258_v42, 1  ;;  %v253_v55 = vld [vmem:[%s5183_s13 + $0x30] sm:$0xff]  ;;  %v935_v56 = vld [vmem:[%s7575_s1 + $0x28] sm:$0xff]  ;;  %v934_v61 = vld [vmem:[%s7575_s1 + $0x20] sm:$0xff]  ;;  %s4605_s6 = sshll.u32 %s215_s25, 8 }
  0x20   : > { %1053 = vmatpush.msra.mxu0 %v939_v26  ;;  %837 = vst.msk [vmem:[#allocation2 + $0x38] sm:$0xff] %vm231_vm0, %v742_v35  ;;  %v744_v51 = vsel %vm739_vm3, %v741_v29, %v743_v46  ;;  %v747_v52 = vrot.slane %v679_v49, 1  ;;  %v749_v53 = vrot.slane %v5270_v47, 1  ;;  %v5294_v58 = vmax.f32 %v253_v55, 0.0  ;;  %550 = vrot.lane.b32.xlu2 %v5260_v43, %s5064_s12  ;;  %v933_v0 = vld [vmem:[%s7575_s1 + $0x18] sm:$0xff]  ;;  %v932_v3 = vld [vmem:[%s7575_s1 + $0x10] sm:$0xff] }
  0x21   : > { %1174 = vmatpush.msra.mxu1 %v947_v27  ;;  %1616 = vmatpush.msra.mxu3 %v4656_v28  ;;  %838 = vst.msk [vmem:[#allocation2 + $0x48] sm:$0xff] %vm231_vm0, %v744_v51  ;;  %v746_v57 = vsel %vm739_vm3, %v743_v46, %v745_v50  ;;  %v4716_v4 = vld [vmem:[%s7575_s1 + $0x230] sm:$0xff]  ;;  %v4707_v6 = vld [vmem:[%s7575_s1 + $0x1e8] sm:$0xff]  ;;  %v254_v8 = vld [vmem:[%s5183_s13 + $0x38] sm:$0xff]  ;;  %s7360_s7 = scalar_lea.vmem [#allocation4], %s4605_s6  ;;  %s5019_s26 = scalar_lea.hbm %s7579_s5, 512 }
  0x22   : > { %1054 = vmatpush.msra.mxu0 %v938_v31  ;;  %v748_v59 = vsel %vm739_vm3, %v745_v50, %v747_v52  ;;  %v750_v60 = vsel %vm739_vm3, %v747_v52, %v749_v53  ;;  %839 = vst.msk [vmem:[#allocation2 + $0x58] sm:$0xff] %vm231_vm0, %v746_v57  ;;  %v681_v62 = vsel %vm228_vm2, %v5294_v58, 0.0  ;;  %v931_v7 = vld [vmem:[%s7575_s1 + $0x8] sm:$0xff]  ;;  %v5333_v10 = vmax.f32 %v254_v8, 0.0  ;;  %v930_v11 = vld [vmem:[%s7575_s1] sm:$0xff]  ;;  %v257_v28 = vld [vmem:[%s5183_s13 + $0x50] sm:$0xff] }
  0x23   : > { %1175 = vmatpush.msra.mxu1 %v946_v32  ;;  %1617 = vmatpush.msra.mxu3 %v4655_v36  ;;  %840 = vst.msk [vmem:[#allocation2 + $0x68] sm:$0xff] %vm231_vm0, %v748_v59  ;;  %v751_v63 = vrot.slane %v681_v62, 1  ;;  %v255_v15 = vld [vmem:[%s5183_s13 + $0x40] sm:$0xff]  ;;  %v256_v23 = vld [vmem:[%s5183_s13 + $0x48] sm:$0xff]  ;;  %v5375_v29 = vmax.f32 %v257_v28, 0.0  ;;  %v258_v36 = vld [vmem:[%s5183_s13 + $0x58] sm:$0xff] }
  0x24   : > { %1176 = vmatmul.f32.vlgmr.msra.gmra.mxu1 %v5063_v5  ;;  %1055 = vmatpush.msra.mxu0 %v937_v33  ;;  %841 = vst.msk [vmem:[#allocation2 + $0x78] sm:$0xff] %vm231_vm0, %v750_v60  ;;  %v753_v13 = vrot.slane %v5333_v10, 1  ;;  %v5349_v16 = vmax.f32 %v255_v15, 0.0  ;;  %v4706_v22 = vld [vmem:[%s7575_s1 + $0x1e0] sm:$0xff]  ;;  %v5365_v25 = vmax.f32 %v256_v23, 0.0  ;;  %v4715_v35 = vld [vmem:[%s7575_s1 + $0x228] sm:$0xff] }
  0x25   : > { %1987 = vmatpush.msrb.mxu1 %v4709_v40  ;;  %544 = vrot.lane.b32.xlu0 %v5215_v24, %s5064_s12  ;;  %v752_v2 = vsel %vm739_vm3, %v749_v53, %v751_v63  ;;  %v685_v30 = vsel %vm228_vm2, %v5375_v29, 0.0  ;;  %v4705_v37 = vld [vmem:[%s7575_s1 + $0x1d8] sm:$0xff]  ;;  %v5393_v38 = vmax.f32 %v258_v36, 0.0  ;;  %v4652_v52 = vld [vmem:[%s7575_s1 + $0x130] sm:$0xff]  ;;  %v4651_v53 = vld [vmem:[%s7575_s1 + $0x128] sm:$0xff]  ;;  %s4536_s11 = sshll.u32 %s7360_s7, 4  ;;  %s4537_s11 = int_to_ptr.vmem [resolvable:$true] %s4536_s11 }
  0x26   : > { %1618 = vmatpush.msra.mxu3 %v4654_v45  ;;  %1056 = vmatpush.msra.mxu0 %v936_v44  ;;  %842 = vst.msk [vmem:[#allocation2 + $0x88] sm:$0xff] %vm231_vm0, %v752_v2  ;;  %v754_v14 = vsel %vm739_vm3, %v751_v63, %v753_v13  ;;  %v683_v18 = vsel %vm228_vm2, %v5349_v16, 0.0  ;;  %v757_v27 = vrot.slane %v5365_v25, 1  ;;  %v759_v32 = vrot.slane %v685_v30, 1  ;;  %v4653_v44 = vld [vmem:[%s7575_s1 + $0x138] sm:$0xff]  ;;  %v259_v45 = vld [vmem:[%s5183_s13 + $0x60] sm:$0xff] }
  0x27   : > { %1988 = vmatpush.msrb.mxu1 %v4708_v54  ;;  %548 = vrot.lane.b32.xlu1 %v5258_v42, %s5064_s12  ;;  %v1306_v1 = vld [vmem:[#allocation2 + $0x38] sm:$0xff]  ;;  %843 = vst.msk [vmem:[#allocation2 + $0x98] sm:$0xff] %vm231_vm0, %v754_v14  ;;  %v755_v20 = vrot.slane %v683_v18, 1  ;;  %v761_v39 = vrot.slane %v5393_v38, 1  ;;  %v5406_v46 = vmax.f32 %v259_v45, 0.0  ;;  %v4704_v54 = vld [vmem:[%s7575_s1 + $0x1d0] sm:$0xff] }
  0x28   : > { %2108 = vmatpush.msrb.mxu3 %v4717_v48  ;;  %1057 = vmatpush.msra.mxu0 %v935_v56  ;;  %v1308_v12 = vld [vmem:[#allocation2 + $0x48] sm:$0xff]  ;;  %v760_v33 = vsel %vm739_vm3, %v757_v27, %v759_v32  ;;  %v4650_v55 = vld [vmem:[%s7575_s1 + $0x120] sm:$0xff]  ;;  %v4649_v59 = vld [vmem:[%s7575_s1 + $0x118] sm:$0xff] }
  0x29   : > { %4662 = vmatmul.msk.f32.vlgmr.msra.gmra.mxu3 %vm231_vm0, %v1306_v1  ;;  %1989 = vmatpush.msrb.mxu1 %v4707_v6  ;;  %v1310_v19 = vld [vmem:[#allocation2 + $0x58] sm:$0xff]  ;;  %v756_v21 = vsel %vm739_vm3, %v753_v13, %v755_v20  ;;  %846 = vst.msk [vmem:[#allocation2 + $0xc8] sm:$0xff] %vm231_vm0, %v760_v33  ;;  %v762_v41 = vsel %vm739_vm3, %v759_v32, %v761_v39  ;;  %v687_v48 = vsel %vm228_vm2, %v5406_v46, 0.0  ;;  %v260_v56 = vld [vmem:[%s5183_s13 + $0x68] sm:$0xff]  ;;  %v4648_v63 = vld [vmem:[%s7575_s1 + $0x110] sm:$0xff] }
  0x2a   : > { %1058 = vmatpush.msra.mxu0 %v934_v61  ;;  %2109 = vmatpush.msrb.mxu3 %v4716_v4  ;;  %844 = vst.msk [vmem:[#allocation2 + $0xa8] sm:$0xff] %vm231_vm0, %v756_v21  ;;  %v1312_v26 = vld [vmem:[#allocation2 + $0x68] sm:$0xff]  ;;  %v763_v50 = vrot.slane %v687_v48, 1  ;;  %v5430_v57 = vmax.f32 %v260_v56, 0.0  ;;  %v4645_v6 = vld [vmem:[%s7575_s1 + $0xf8] sm:$0xff]  ;;  %v4714_v14 = vld [vmem:[%s7575_s1 + $0x220] sm:$0xff] }
  0x2b   : > { %552 = vrot.lane.b32.xlu2 %v5270_v47, %s5064_s12  ;;  %1990 = vmatpush.msrb.mxu1 %v4706_v22  ;;  %v1314_v31 = vld [vmem:[#allocation2 + $0x78] sm:$0xff]  ;;  %847 = vst.msk [vmem:[#allocation2 + $0xd8] sm:$0xff] %vm231_vm0, %v762_v41  ;;  %v4644_v15 = vld [vmem:[%s7575_s1 + $0xf0] sm:$0xff]  ;;  %v4703_v18 = vld [vmem:[%s7575_s1 + $0x1c8] sm:$0xff] }
  0x2c   : > { %1179 = vmatmul.f32.gmra.mxu1 %v5063_v5  ;;  %1059 = vmatpush.msra.mxu0 %v933_v0  ;;  %v764_v51 = vsel %vm739_vm3, %v761_v39, %v763_v50  ;;  %v765_v61 = vrot.slane %v5430_v57, 1  ;;  %v4647_v0 = vld [vmem:[%s7575_s1 + $0x108] sm:$0xff]  ;;  %v4638_v33 = vld [vmem:[%s7575_s1 + $0xc0] sm:$0xff] }
  0x2d   : > { %554 = vrot.lane.b32.xlu0 %v5294_v58, %s5064_s12  ;;  %2110 = vmatpush.msrb.mxu3 %v4715_v35  ;;  %v1316_v40 = vld [vmem:[#allocation2 + $0x88] sm:$0xff]  ;;  %848 = vst.msk [vmem:[#allocation2 + $0xe8] sm:$0xff] %vm231_vm0, %v764_v51  ;;  %v4702_v45 = vld [vmem:[%s7575_s1 + $0x1c0] sm:$0xff] }
  0x2e   : > { %1060 = vmatpush.msra.mxu0 %v932_v3  ;;  %1991 = vmatpush.msrb.mxu1 %v4705_v37  ;;  %v1318_v49 = vld [vmem:[#allocation2 + $0x98] sm:$0xff]  ;;  %v766_v62 = vsel %vm739_vm3, %v763_v50, %v765_v61  ;;  %v4646_v3 = vld [vmem:[%s7575_s1 + $0x100] sm:$0xff]  ;;  %v4639_v30 = vld [vmem:[%s7575_s1 + $0xc8] sm:$0xff]  ;;  %v383_v37 = vrot.slane %v5240_v34, 7 }
  0x2f   : > { %556 = vrot.lane.b32.xlu1 %v5333_v10, %s5064_s12  ;;  %1490 = vmatpush.msra.mxu2 %v4653_v44  ;;  %849 = vst.msk [vmem:[#allocation2 + $0xf8] sm:$0xff] %vm231_vm0, %v766_v62  ;;  %v264_v44 = vld [vmem:[%s5183_s13 + $0x88] sm:$0xff]  ;;  %v4713_v62 = vld [vmem:[%s7575_s1 + $0x218] sm:$0xff] }
  0x30   : > { %1061 = vmatpush.msra.mxu0 %v931_v7  ;;  %1992 = vmatpush.msrb.mxu1 %v4704_v54  ;;  %v1324_v23 = vld [vmem:[#allocation2 + $0xc8] sm:$0xff]  ;;  %v265_v54 = vld [vmem:[%s5183_s13 + $0x90] sm:$0xff] }
  0x31   : > { %4663 = vmatmul.msk.f32.gmra.mxu3 %vm231_vm0, %v1308_v12  ;;  %1491 = vmatpush.msra.mxu2 %v4652_v52  ;;  %v1320_v60 = vld [vmem:[#allocation2 + $0xa8] sm:$0xff] }
  0x32   : > { %1062 = vmatpush.msra.mxu0 %v930_v11  ;;  %v380_v11 = vrot.slane %v5197_v17, 7  ;;  %2111 = vmatpush.msrb.mxu3 %v4714_v14  ;;  %v4643_v17 = vld [vmem:[%s7575_s1 + $0xe8] sm:$0xff]  ;;  %v1326_v39 = vld [vmem:[#allocation2 + $0xd8] sm:$0xff]  ;;  %v267_v14 = vld [vmem:[%s5183_s13 + $0xa0] sm:$0xff] }
  0x33   : > { %1063 = vmatmul.f32.vlgmr.msra.gmra.mxu0 %v5063_v5  ;;  %558 = vrot.lane.b32.xlu2 %v5349_v16, %s5064_s12 }
  0x34   : > { %4608 = vmatmul.msk.f32.gmra.mxu1 %vm231_vm0, %v1306_v1  ;;  %1492 = vmatpush.msra.mxu2 %v4651_v53  ;;  %v261_v1 = vld [vmem:[%s5183_s13 + $0x70] sm:$0xff]  ;;  %477 = vst.msk [vmem:[#allocation2 + $0x30] sm:$0xfe] %vm476_vm5, %v380_v11  ;;  %v1328_v52 = vld [vmem:[#allocation2 + $0xe8] sm:$0xff] }
  0x35   : > { %560 = vrot.lane.b32.xlu0 %v5365_v25, %s5064_s12  ;;  %v5449_v2 = vmax.f32 %v261_v1, 0.0  ;;  %1993 = vmatpush.msrb.mxu1 %v4703_v18 }
  0x36   : > { %1493 = vmatpush.msra.mxu2 %v4650_v55  ;;  %v5548_v55 = vmax.f32 %v265_v54, 0.0  ;;  %2112 = vmatpush.msrb.mxu3 %v4713_v62 }
  0x37   : > { %562 = vrot.lane.b32.xlu1 %v5375_v29, %s5064_s12  ;;  %v689_v4 = vsel %vm228_vm2, %v5449_v2, 0.0  ;;  %1994 = vmatpush.msrb.mxu1 %v4702_v45  ;;  %v269_v45 = vld [vmem:[%s5183_s13 + $0xb0] sm:$0xff] }
  0x38   : > { %1494 = vmatpush.msra.mxu2 %v4649_v59  ;;  %v767_v8 = vrot.slane %v689_v4, 1  ;;  %v693_v56 = vsel %vm228_vm2, %v5548_v55, 0.0  ;;  %v1330_v59 = vld [vmem:[#allocation2 + $0xf8] sm:$0xff] }
  0x39   : > { %4664 = vmatmul.msk.f32.gmra.mxu3 %vm231_vm0, %v1310_v19 }
  0x3a   : > { %1495 = vmatpush.msra.mxu2 %v4648_v63  ;;  %v768_v13 = vsel %vm739_vm3, %v765_v61, %v767_v8  ;;  %v266_v63 = vld [vmem:[%s5183_s13 + $0x98] sm:$0xff] }
  0x3b   : > { %1066 = vmatmul.f32.gmra.mxu0 %v5063_v5  ;;  %v758_v5 = vsel %vm739_vm3, %v755_v20, %v757_v27  ;;  %564 = vrot.lane.b32.xlu2 %v5393_v38, %s5064_s12  ;;  %850 = vst.msk [vmem:[#allocation2 + $0x108] sm:$0xff] %vm231_vm0, %v768_v13  ;;  %v4642_v20 = vld [vmem:[%s7575_s1 + $0xe0] sm:$0xff]  ;;  %v5567_v4 = vmax.f32 %v266_v63, 0.0 }
  0x3c   : > { %4609 = vmatmul.msk.f32.gmra.mxu1 %vm231_vm0, %v1308_v12  ;;  %845 = vst.msk [vmem:[#allocation2 + $0xb8] sm:$0xff] %vm231_vm0, %v758_v5  ;;  %1496 = vmatpush.msra.mxu2 %v4647_v0  ;;  %v5464_v12 = vadd.s32 8, %v5169_v9  ;;  %v4701_v0 = vld [vmem:[%s7575_s1 + $0x1b8] sm:$0xff] }
  0x3d   : > { %566 = vrot.lane.b32.xlu0 %v5406_v46, %s5064_s12  ;;  %1995 = vmatpush.msrb.mxu1 %v4701_v0  ;;  %v4699_v0 = vld [vmem:[%s7575_s1 + $0x1a8] sm:$0xff] }
  0x3e   : > { %1497 = vmatpush.msra.mxu2 %v4646_v3  ;;  %vm227_vm6 = vcmp.lt.s32.totalorder %v5464_v12, 15  ;;  %v387_v3 = vrot.slane %v5260_v43, 7 }
  0x3f   : > { %568 = vrot.lane.b32.xlu1 %v5430_v57, %s5064_s12  ;;  %v316_v22 = vsel %vm227_vm6, %v5215_v24, 0.0  ;;  %v4640_v24 = vld [vmem:[%s7575_s1 + $0xd0] sm:$0xff]  ;;  %v318_v48 = vsel %vm227_vm6, %v5258_v42, 0.0 }
  0x40   : > { %1498 = vmatpush.msra.mxu2 %v4645_v6  ;;  %v381_v28 = vrot.slane %v316_v22, 7  ;;  %v385_v51 = vrot.slane %v318_v48, 7  ;;  %v5624_v48 = vmax.f32 %v269_v45, 0.0 }
  0x41   : > { %4665 = vmatmul.msk.f32.gmra.mxu3 %vm231_vm0, %v1312_v26 }
  0x42   : > { %1499 = vmatpush.msra.mxu2 %v4644_v15  ;;  %v382_v35 = vsel %vm379_vm7, %v380_v11, %v381_v28  ;;  %v384_v34 = vsel %vm379_vm7, %v381_v28, %v383_v37  ;;  %v386_v42 = vsel %vm379_vm7, %v383_v37, %v385_v51  ;;  %v777_v11 = vrot.slane %v5567_v4, 1 }
  0x43   : > { %570 = vrot.lane.b32.xlu2 %v5449_v2, %s5064_s12  ;;  %v1322_v7 = vld [vmem:[#allocation2 + $0xb8] sm:$0xff]  ;;  %478 = vst.msk [vmem:[#allocation2 + $0x40] sm:$0xff] %vm231_vm0, %v382_v35  ;;  %v5582_v15 = vmax.f32 %v267_v14, 0.0  ;;  %v322_v35 = vsel %vm227_vm6, %v5333_v10, 0.0 }
  0x44   : > { %4610 = vmatmul.msk.f32.gmra.mxu1 %vm231_vm0, %v1310_v19  ;;  %v262_v19 = vld [vmem:[%s5183_s13 + $0x78] sm:$0xff]  ;;  %1500 = vmatpush.msra.mxu2 %v4643_v17  ;;  %479 = vst.msk [vmem:[#allocation2 + $0x50] sm:$0xff] %vm231_vm0, %v384_v34  ;;  %v320_v17 = vsel %vm227_vm6, %v5270_v47, 0.0 }
  0x45   : > { %v5488_v21 = vmax.f32 %v262_v19, 0.0  ;;  %480 = vst.msk [vmem:[#allocation2 + $0x60] sm:$0xff] %vm231_vm0, %v386_v42  ;;  %v389_v18 = vrot.slane %v320_v17, 7  ;;  %v695_v22 = vsel %vm228_vm2, %v5582_v15, 0.0  ;;  %v271_v17 = vld [vmem:[%s5183_s13 + $0xc0] sm:$0xff] }
  0x46   : > { %1501 = vmatpush.msra.mxu2 %v4642_v20 }
  0x47   : > { %v769_v27 = vrot.slane %v5488_v21, 1  ;;  %572 = vrot.lane.b32.xlu0 %v5488_v21, %s5064_s12  ;;  %v390_v47 = vsel %vm379_vm7, %v387_v3, %v389_v18 }
  0x48   : > { %482 = vst.msk [vmem:[#allocation2 + $0x80] sm:$0xff] %vm231_vm0, %v390_v47 }
  0x49   : > { %4666 = vmatmul.msk.f32.gmra.mxu3 %vm231_vm0, %v1314_v31  ;;  %v770_v5 = vsel %vm739_vm3, %v767_v8, %v769_v27  ;;  %v388_v8 = vsel %vm379_vm7, %v385_v51, %v387_v3  ;;  %v324_v3 = vsel %vm227_vm6, %v5365_v25, 0.0 }
  0x4a   : > { %851 = vst.msk [vmem:[#allocation2 + $0x118] sm:$0xff] %vm231_vm0, %v770_v5  ;;  %v391_v5 = vrot.slane %v5294_v58, 7 }
  0x4b   : > { %481 = vst.msk [vmem:[#allocation2 + $0x70] sm:$0xff] %vm231_vm0, %v388_v8 }
  0x4c   : > { %4611 = vmatmul.msk.f32.gmra.mxu1 %vm231_vm0, %v1312_v26  ;;  %v4641_v26 = vld [vmem:[%s7575_s1 + $0xd8] sm:$0xff]  ;;  %v392_v58 = vsel %vm379_vm7, %v389_v18, %v391_v5 }
  0x4d   : > { %1502 = vmatpush.msra.mxu2 %v4641_v26  ;;  %483 = vst.msk [vmem:[#allocation2 + $0x90] sm:$0xff] %vm231_vm0, %v392_v58 }
  0x4f   : > { %1503 = vmatpush.msra.mxu2 %v4640_v24  ;;  %578 = vrot.lane.b32.xlu0 %v5548_v55, %s5064_s12 }
  0x51   : > { %4667 = vmatmul.msk.f32.gmra.mxu3 %vm231_vm0, %v1316_v40  ;;  %1504 = vmatpush.msra.mxu2 %v4639_v30  ;;  %v1334_v26 = vld [vmem:[#allocation2 + $0x118] sm:$0xff]  ;;  %v268_v30 = vld [vmem:[%s5183_s13 + $0xa8] sm:$0xff] }
  0x53   : > { %1505 = vmatpush.msra.mxu2 %v4638_v33  ;;  %v5607_v33 = vmax.f32 %v268_v30, 0.0  ;;  %v399_v30 = vrot.slane %v5375_v29, 7 }
  0x54   : > { %4612 = vmatmul.msk.f32.gmra.mxu1 %vm231_vm0, %v1314_v31  ;;  %v263_v31 = vld [vmem:[%s5183_s13 + $0x80] sm:$0xff] }
  0x55   : > { %v5510_v32 = vmax.f32 %v263_v31, 0.0  ;;  %v4700_v31 = vld [vmem:[%s7575_s1 + $0x1b0] sm:$0xff] }
  0x56   : > { %1996 = vmatpush.msrb.mxu1 %v4700_v31 }
  0x57   : > { %v691_v36 = vsel %vm228_vm2, %v5510_v32, 0.0  ;;  %574 = vrot.lane.b32.xlu1 %v5510_v32, %s5064_s12  ;;  %584 = vrot.lane.b32.xlu0 %v5607_v33, %s5064_s12 }
  0x58   : > { %1997 = vmatpush.msrb.mxu1 %v4699_v0 }
  0x59   : > { %4668 = vmatmul.msk.f32.gmra.mxu3 %vm231_vm0, %v1318_v49 }
  0x5c   : > { %4613 = vmatmul.msk.f32.gmra.mxu1 %vm231_vm0, %v1316_v40  ;;  %v771_v40 = vrot.slane %v691_v36, 1 }
  0x5e   : > { %v772_v41 = vsel %vm739_vm3, %v769_v27, %v771_v40  ;;  %v779_v27 = vrot.slane %v695_v22, 1 }
  0x5f   : > { %852 = vst.msk [vmem:[#allocation2 + $0x128] sm:$0xff] %vm231_vm0, %v772_v41  ;;  %580 = vrot.lane.b32.xlu1 %v5567_v4, %s5064_s12  ;;  %v781_v41 = vrot.slane %v5607_v33, 1 }
  0x60   : > { %v780_v28 = vsel %vm739_vm3, %v777_v11, %v779_v27 }
  0x61   : > { %4669 = vmatmul.msk.f32.gmra.mxu3 %vm231_vm0, %v1320_v60  ;;  %856 = vst.msk [vmem:[#allocation2 + $0x168] sm:$0xff] %vm231_vm0, %v780_v28  ;;  %v782_v10 = vsel %vm739_vm3, %v779_v27, %v781_v41 }
  0x62   : > { %857 = vst.msk [vmem:[#allocation2 + $0x178] sm:$0xff] %vm231_vm0, %v782_v10 }
  0x64   : > { %4614 = vmatmul.msk.f32.gmra.mxu1 %vm231_vm0, %v1318_v49  ;;  %v5535_v49 = vmax.f32 %v264_v44, 0.0  ;;  %v393_v44 = vrot.slane %v322_v35, 7  ;;  %v272_v35 = vld [vmem:[%s5183_s13 + $0xc8] sm:$0xff] }
  0x66   : > { %v773_v50 = vrot.slane %v5535_v49, 1  ;;  %576 = vrot.lane.b32.xlu2 %v5535_v49, %s5064_s12 }
  0x67   : > { %586 = vrot.lane.b32.xlu1 %v5624_v48, %s5064_s12 }
  0x68   : > { %v774_v53 = vsel %vm739_vm3, %v771_v40, %v773_v50  ;;  %v1336_v40 = vld [vmem:[#allocation2 + $0x128] sm:$0xff] }
  0x69   : > { %4670 = vmatmul.msk.f32.gmra.mxu3 %vm231_vm0, %v1322_v7  ;;  %853 = vst.msk [vmem:[#allocation2 + $0x138] sm:$0xff] %vm231_vm0, %v774_v53 }
  0x6c   : > { %4615 = vmatmul.msk.f32.gmra.mxu1 %vm231_vm0, %v1320_v60  ;;  %v775_v60 = vrot.slane %v693_v56, 1 }
  0x6e   : > { %v776_v61 = vsel %vm739_vm3, %v773_v50, %v775_v60  ;;  %v778_v43 = vsel %vm739_vm3, %v775_v60, %v777_v11  ;;  %582 = vrot.lane.b32.xlu2 %v5582_v15, %s5064_s12  ;;  %v394_v50 = vsel %vm379_vm7, %v391_v5, %v393_v44 }
  0x6f   : > { %854 = vst.msk [vmem:[#allocation2 + $0x148] sm:$0xff] %vm231_vm0, %v776_v61  ;;  %v270_v61 = vld [vmem:[%s5183_s13 + $0xb8] sm:$0xff] }
  0x70   : > { %855 = vst.msk [vmem:[#allocation2 + $0x158] sm:$0xff] %vm231_vm0, %v778_v43  ;;  %v1338_v42 = vld [vmem:[#allocation2 + $0x138] sm:$0xff]  ;;  %v5648_v63 = vmax.f32 %v270_v61, 0.0 }
  0x71   : > { %4671 = vmatmul.msk.f32.gmra.mxu3 %vm231_vm0, %v1324_v23  ;;  %484 = vst.msk [vmem:[#allocation2 + $0xa0] sm:$0xff] %vm231_vm0, %v394_v50  ;;  %v273_v50 = vld [vmem:[%s5183_s13 + $0xd0] sm:$0xff]  ;;  %v1346_v61 = vld [vmem:[#allocation2 + $0x178] sm:$0xff] }
  0x72   : > { %v785_v11 = vrot.slane %v5648_v63, 1 }
  0x74   : > { %4616 = vmatmul.msk.f32.gmra.mxu1 %vm231_vm0, %v1322_v7  ;;  %v1332_v7 = vld [vmem:[#allocation2 + $0x108] sm:$0xff] }
  0x76   : > { %v1340_v8 = vld [vmem:[#allocation2 + $0x148] sm:$0xff]  ;;  %588 = vrot.lane.b32.xlu2 %v5648_v63, %s5064_s12 }
  0x77   : > { %v1342_v47 = vld [vmem:[#allocation2 + $0x158] sm:$0xff] }
  0x79   : > { %4672 = vmatmul.msk.f32.gmra.mxu3 %vm231_vm0, %v1326_v39 }
  0x7a   : > { %v551_v1 = vpop.permute.xlu2 %550 }
  0x7b   : > { %643 = vst.msk [vmem:[#allocation2 + $0x70] sm:$0xff] %vm638_vm8, %v551_v1  ;;  %v395_v1 = vrot.slane %v5349_v16, 7  ;;  %v397_v16 = vrot.slane %v324_v3, 7  ;;  %v403_v3 = vrot.slane %v5406_v46, 7  ;;  %v4697_v46 = vld [vmem:[%s7575_s1 + $0x198] sm:$0xff] }
  0x7c   : > { %4617 = vmatmul.msk.f32.gmra.mxu1 %vm231_vm0, %v1324_v23 }
  0x7d   : > { %v396_v43 = vsel %vm379_vm7, %v393_v44, %v395_v1  ;;  %v398_v22 = vsel %vm379_vm7, %v395_v1, %v397_v16  ;;  %v400_v29 = vsel %vm379_vm7, %v397_v16, %v399_v30 }
  0x7e   : > { %485 = vst.msk [vmem:[#allocation2 + $0xb0] sm:$0xff] %vm231_vm0, %v396_v43 }
  0x7f   : > { %486 = vst.msk [vmem:[#allocation2 + $0xc0] sm:$0xff] %vm231_vm0, %v398_v22 }
  0x80   : > { %487 = vst.msk [vmem:[#allocation2 + $0xd0] sm:$0xff] %vm231_vm0, %v400_v29 }
  0x81   : > { %4673 = vmatmul.msk.f32.gmra.mxu3 %vm231_vm0, %v1328_v52 }
  0x82   : > { %v5673_v18 = vld [vmem:[#allocation2 + $0x70] sm:$0xff] }
  0x84   : > { %4618 = vmatmul.msk.f32.gmra.mxu1 %vm231_vm0, %v1326_v39 }
  0x85   : > { %v553_v23 = vpop.permute.xlu2 %552 }
  0x86   : > { %644 = vst.msk [vmem:[#allocation2 + $0x80] sm:$0xff] %vm638_vm8, %v553_v23 }
  0x89   : > { %4674 = vmatmul.msk.f32.gmra.mxu3 %vm231_vm0, %v1330_v59 }
  0x8c   : > { %4619 = vmatmul.msk.f32.gmra.mxu1 %vm231_vm0, %v1328_v52  ;;  %v697_v52 = vsel %vm228_vm2, %v5624_v48, 0.0 }
  0x8d   : > { %v783_v54 = vrot.slane %v697_v52, 1  ;;  %v5697_v58 = vld [vmem:[#allocation2 + $0x80] sm:$0xff]  ;;  %v5724_v52 = vmax.f32 %v273_v50, 0.0  ;;  %v276_v50 = vld [vmem:[%s5183_s13 + $0xe8] sm:$0xff] }
  0x8e   : > { %v543_v6 = vpop.permute.xlu0 %542 }
  0x8f   : > { %639 = vst.msk [vmem:[#allocation2 + $0x30] sm:$0xff] %vm638_vm8, %v543_v6  ;;  %v784_v56 = vsel %vm739_vm3, %v781_v41, %v783_v54  ;;  %v559_v6 = vpop.permute.xlu2 %558  ;;  %v786_v25 = vsel %vm739_vm3, %v783_v54, %v785_v11  ;;  %v1344_v41 = vld [vmem:[#allocation2 + $0x168] sm:$0xff]  ;;  %594 = vrot.lane.b32.xlu2 %v5724_v52, %s5064_s12 }
  0x90   : > { %v547_v13 = vpop.permute.xlu1 %546  ;;  %858 = vst.msk [vmem:[#allocation2 + $0x188] sm:$0xff] %vm231_vm0, %v784_v56  ;;  %v701_v56 = vsel %vm228_vm2, %v5724_v52, 0.0 }
  0x91   : > { %4675 = vmatmul.msk.f32.gmra.mxu3 %vm231_vm0, %v1332_v7  ;;  %641 = vst.msk [vmem:[#allocation2 + $0x50] sm:$0xff] %vm638_vm8, %v547_v13  ;;  %v791_v0 = vrot.slane %v701_v56, 1  ;;  %v4696_v56 = vld [vmem:[%s7575_s1 + $0x190] sm:$0xff] }
  0x92   : > { %647 = vst.msk [vmem:[#allocation2 + $0xb0] sm:$0xff] %vm638_vm8, %v559_v6 }
  0x93   : > { %859 = vst.msk [vmem:[#allocation2 + $0x198] sm:$0xff] %vm231_vm0, %v786_v25 }
  0x94   : > { %4620 = vmatmul.msk.f32.gmra.mxu1 %vm231_vm0, %v1330_v59  ;;  %v4712_v59 = vld [vmem:[%s7575_s1 + $0x210] sm:$0xff] }
  0x95   : > { %2113 = vmatpush.msrb.mxu3 %v4712_v59 }
  0x96   : > { %v870_v20 = vld [vmem:[#allocation2 + $0x30] sm:$0xff] }
  0x97   : > { %v545_v19 = vpop.permute.xlu0 %544  ;;  %1069 = vmatmul.f32.gmra.mxu0 %v870_v20  ;;  %1506 = vmatmul.f32.vlgmr.msra.gmra.mxu2 %v870_v20  ;;  %v565_v59 = vpop.permute.xlu2 %564  ;;  %v1348_v22 = vld [vmem:[#allocation2 + $0x188] sm:$0xff] }
  0x98   : > { %640 = vst.msk [vmem:[#allocation2 + $0x40] sm:$0xff] %vm638_vm8, %v545_v19  ;;  %v5622_v34 = vld [vmem:[#allocation2 + $0x50] sm:$0xff]  ;;  %v5675_v19 = vmax.f32 %v271_v17, 0.0  ;;  %v328_v17 = vsel %vm227_vm6, %v5430_v57, 0.0 }
  0x99   : > { %4676 = vmatmul.msk.f32.gmra.mxu3 %vm231_vm0, %v1334_v26  ;;  %v549_v24 = vpop.permute.xlu1 %548 }
  0x9a   : > { %642 = vst.msk [vmem:[#allocation2 + $0x60] sm:$0xff] %vm638_vm8, %v549_v24  ;;  %590 = vrot.lane.b32.xlu0 %v5675_v19, %s5064_s12  ;;  %v1350_v29 = vld [vmem:[#allocation2 + $0x198] sm:$0xff] }
  0x9c   : > { %4621 = vmatmul.msk.f32.gmra.mxu1 %vm231_vm0, %v1332_v7 }
  0x9f   : > { %v872_v36 = vld [vmem:[#allocation2 + $0x40] sm:$0xff]  ;;  %v555_v37 = vpop.permute.xlu0 %554 }
  0xa0   : > { %1072 = vmatmul.f32.gmra.mxu0 %v872_v36  ;;  %1509 = vmatmul.f32.gmra.mxu2 %v872_v36  ;;  %645 = vst.msk [vmem:[#allocation2 + $0x90] sm:$0xff] %vm638_vm8, %v555_v37  ;;  %v4698_v37 = vld [vmem:[%s7575_s1 + $0x1a0] sm:$0xff] }
  0xa1   : > { %v1177_v39 = vpop.f32.mrf.mxu1  ;;  %4677 = vmatmul.msk.f32.gmra.mxu3 %vm231_vm0, %v1336_v40  ;;  %v557_v51 = vpop.permute.xlu1 %556  ;;  %v5643_v60 = vld [vmem:[#allocation2 + $0x60] sm:$0xff]  ;;  %1998 = vmatpush.msrb.mxu1 %v4698_v37 }
  0xa2   : > { %646 = vst.msk [vmem:[#allocation2 + $0xa0] sm:$0xff] %vm638_vm8, %v557_v51 }
  0xa3   : > { %1999 = vmatpush.msrb.mxu1 %v4697_v46 }
  0xa4   : > { %4622 = vmatmul.msk.f32.gmra.mxu1 %vm231_vm0, %v1334_v26  ;;  %v699_v26 = vsel %vm228_vm2, %v5675_v19, 0.0 }
  0xa5   : > { %v787_v5 = vrot.slane %v699_v26, 1  ;;  %2000 = vmatpush.msrb.mxu1 %v4696_v56 }
  0xa7   : > { %v561_v23 = vpop.permute.xlu0 %560  ;;  %v788_v31 = vsel %vm739_vm3, %v785_v11, %v787_v5  ;;  %v5722_v51 = vld [vmem:[#allocation2 + $0x90] sm:$0xff]  ;;  %v274_v11 = vld [vmem:[%s5183_s13 + $0xd8] sm:$0xff] }
  0xa8   : > { %1075 = vmatmul.f32.gmra.mxu0 %v5622_v34  ;;  %1512 = vmatmul.f32.gmra.mxu2 %v5622_v34  ;;  %648 = vst.msk [vmem:[#allocation2 + $0xc0] sm:$0xff] %vm638_vm8, %v561_v23  ;;  %v5760_v25 = vmax.f32 %v274_v11, 0.0  ;;  %v277_v11 = vld [vmem:[%s5183_s13 + $0xf0] sm:$0xff] }
  0xa9   : > { %v1180_v53 = vpop.f32.mrf.mxu1  ;;  %4678 = vmatmul.msk.f32.gmra.mxu3 %vm231_vm0, %v1338_v42  ;;  %860 = vst.msk [vmem:[#allocation2 + $0x1a8] sm:$0xff] %vm231_vm0, %v788_v31 }
  0xaa   : > { %v793_v23 = vrot.slane %v5760_v25, 1  ;;  %596 = vrot.lane.b32.xlu0 %v5760_v25, %s5064_s12 }
  0xac   : > { %4623 = vmatmul.msk.f32.gmra.mxu1 %vm231_vm0, %v1336_v40  ;;  %v5646_v62 = vpop.f32.mrf.mxu3  ;;  %v5706_v40 = vmax.f32 %v272_v35, 0.0  ;;  %v794_v57 = vsel %vm739_vm3, %v791_v0, %v793_v23 }
  0xad   : > { %863 = vst.msk [vmem:[#allocation2 + $0x1d8] sm:$0xff] %vm231_vm0, %v794_v57 }
  0xae   : > { %v789_v44 = vrot.slane %v5706_v40, 1  ;;  %592 = vrot.lane.b32.xlu1 %v5706_v40, %s5064_s12 }
  0xaf   : > { %v567_v16 = vpop.permute.xlu0 %566 }
  0xb0   : > { %1078 = vmatmul.f32.gmra.mxu0 %v5643_v60  ;;  %1515 = vmatmul.f32.gmra.mxu2 %v5643_v60  ;;  %v1064_v7 = vpop.f32.mrf.mxu0  ;;  %v790_v45 = vsel %vm739_vm3, %v787_v5, %v789_v44  ;;  %v792_v6 = vsel %vm739_vm3, %v789_v44, %v791_v0  ;;  %v5779_v5 = vld [vmem:[#allocation2 + $0xb0] sm:$0xff]  ;;  %v571_v0 = vpop.permute.xlu2 %570 }
  0xb1   : > { %v1178_v13 = vadd.f32 %v1177_v39, %v1064_v7  ;;  %v5661_v14 = vpop.f32.mrf.mxu1  ;;  %4679 = vmatmul.msk.f32.gmra.mxu3 %vm231_vm0, %v1340_v8  ;;  %v563_v39 = vpop.permute.xlu1 %562  ;;  %861 = vst.msk [vmem:[#allocation2 + $0x1b8] sm:$0xff] %vm231_vm0, %v790_v45  ;;  %v4711_v7 = vld [vmem:[%s7575_s1 + $0x208] sm:$0xff]  ;;  %v5801_v45 = vld [vmem:[#allocation2 + $0xc0] sm:$0xff] }
  0xb2   : > { %649 = vst.msk [vmem:[#allocation2 + $0xd0] sm:$0xff] %vm638_vm8, %v563_v39  ;;  %2114 = vmatpush.msrb.mxu3 %v4711_v7 }
  0xb3   : > { %1273 = vst.msk [vmem:[#allocation3] sm:$0xff] %vm231_vm0, %v1178_v13 }
  0xb4   : > { %4624 = vmatmul.msk.f32.gmra.mxu1 %vm231_vm0, %v1338_v42  ;;  %v5677_v20 = vpop.f32.mrf.mxu3  ;;  %862 = vst.msk [vmem:[#allocation2 + $0x1c8] sm:$0xff] %vm231_vm0, %v792_v6 }
  0xb8   : > { %1081 = vmatmul.f32.gmra.mxu0 %v5673_v18  ;;  %1518 = vmatmul.f32.gmra.mxu2 %v5673_v18  ;;  %v1067_v27 = vpop.f32.mrf.mxu0 }
  0xb9   : > { %v1181_v28 = vadd.f32 %v1180_v53, %v1067_v27  ;;  %v5689_v24 = vpop.f32.mrf.mxu1  ;;  %4680 = vmatmul.msk.f32.gmra.mxu3 %vm231_vm0, %v1342_v47  ;;  %v326_v53 = vsel %vm227_vm6, %v5393_v38, 0.0  ;;  %v405_v27 = vrot.slane %v328_v17, 7  ;;  %v569_v35 = vpop.permute.xlu1 %568  ;;  %v5830_v46 = vld [vmem:[#allocation2 + $0xd0] sm:$0xff] }
  0xba   : > { %v401_v54 = vrot.slane %v326_v53, 7 }
  0xbb   : > { %1274 = vst.msk [vmem:[#allocation3 + $0x8] sm:$0xff] %vm231_vm0, %v1181_v28  ;;  %v406_v31 = vsel %vm379_vm7, %v403_v3, %v405_v27 }
  0xbc   : > { %4625 = vmatmul.msk.f32.gmra.mxu1 %vm231_vm0, %v1340_v8  ;;  %v5700_v36 = vpop.f32.mrf.mxu3  ;;  %v402_v38 = vsel %vm379_vm7, %v399_v30, %v401_v54  ;;  %v5751_v8 = vld [vmem:[#allocation2 + $0xa0] sm:$0xff]  ;;  %v404_v13 = vsel %vm379_vm7, %v401_v54, %v403_v3  ;;  %490 = vst.msk [vmem:[#allocation2 + $0x100] sm:$0xff] %vm231_vm0, %v406_v31  ;;  %v5806_v54 = vmax.f32 %v276_v50, 0.0  ;;  %v411_v31 = vrot.slane %v5510_v32, 7  ;;  %v4695_v32 = vld [vmem:[%s7575_s1 + $0x188] sm:$0xff] }
  0xbd   : > { %488 = vst.msk [vmem:[#allocation2 + $0xe0] sm:$0xff] %vm231_vm0, %v402_v38  ;;  %v1352_v38 = vld [vmem:[#allocation2 + $0x1a8] sm:$0xff]  ;;  %2001 = vmatpush.msrb.mxu1 %v4695_v32 }
  0xbe   : > { %650 = vst.msk [vmem:[#allocation2 + $0xe0] sm:$0xff] %vm638_vm8, %v565_v59  ;;  %v407_v59 = vrot.slane %v5449_v2, 7  ;;  %v797_v3 = vrot.slane %v5806_v54, 1  ;;  %600 = vrot.lane.b32.xlu2 %v5806_v54, %s5064_s12 }
  0xbf   : > { %489 = vst.msk [vmem:[#allocation2 + $0xf0] sm:$0xff] %vm231_vm0, %v404_v13  ;;  %v5832_v13 = vmax.f32 %v277_v11, 0.0 }
  0xc0   : > { %1084 = vmatmul.f32.gmra.mxu0 %v5697_v58  ;;  %1521 = vmatmul.f32.gmra.mxu2 %v5697_v58  ;;  %651 = vst.msk [vmem:[#allocation2 + $0xf0] sm:$0xff] %vm638_vm8, %v567_v16  ;;  %v408_v6 = vsel %vm379_vm7, %v405_v27, %v407_v59  ;;  %v1354_v27 = vld [vmem:[#allocation2 + $0x1b8] sm:$0xff] }
  0xc1   : > { %v5713_v10 = vpop.f32.mrf.mxu1  ;;  %4681 = vmatmul.msk.f32.gmra.mxu3 %vm231_vm0, %v1344_v41  ;;  %652 = vst.msk [vmem:[#allocation2 + $0x100] sm:$0xff] %vm638_vm8, %v569_v35  ;;  %602 = vrot.lane.b32.xlu0 %v5832_v13, %s5064_s12 }
  0xc2   : > { %491 = vst.msk [vmem:[#allocation2 + $0x110] sm:$0xff] %vm231_vm0, %v408_v6 }
  0xc3   : > { %653 = vst.msk [vmem:[#allocation2 + $0x110] sm:$0xff] %vm638_vm8, %v571_v0 }
  0xc4   : > { %4626 = vmatmul.msk.f32.gmra.mxu1 %vm231_vm0, %v1342_v47  ;;  %v5729_v42 = vpop.f32.mrf.mxu3  ;;  %v275_v47 = vld [vmem:[%s5183_s13 + $0xe0] sm:$0xff] }
  0xc5   : > { %v5781_v28 = vmax.f32 %v275_v47, 0.0 }
  0xc7   : > { %v703_v37 = vsel %vm228_vm2, %v5781_v28, 0.0  ;;  %598 = vrot.lane.b32.xlu1 %v5781_v28, %s5064_s12  ;;  %v5876_v6 = vld [vmem:[#allocation2 + $0xf0] sm:$0xff] }
  0xc8   : > { %1087 = vmatmul.f32.gmra.mxu0 %v5722_v51  ;;  %1524 = vmatmul.f32.gmra.mxu2 %v5722_v51  ;;  %v795_v39 = vrot.slane %v703_v37, 1  ;;  %v4710_v37 = vld [vmem:[%s7575_s1 + $0x200] sm:$0xff] }
  0xc9   : > { %v5739_v1 = vpop.f32.mrf.mxu1  ;;  %4682 = vmatmul.msk.f32.gmra.mxu3 %vm231_vm0, %v1346_v61  ;;  %v575_v56 = vpop.permute.xlu1 %574 }
  0xca   : > { %v796_v44 = vsel %vm739_vm3, %v793_v23, %v795_v39  ;;  %v705_v23 = vsel %vm228_vm2, %v5832_v13, 0.0  ;;  %2115 = vmatpush.msrb.mxu3 %v4710_v37  ;;  %v5899_v37 = vld [vmem:[#allocation2 + $0x100] sm:$0xff] }
  0xcb   : > { %864 = vst.msk [vmem:[#allocation2 + $0x1e8] sm:$0xff] %vm231_vm0, %v796_v44  ;;  %v799_v57 = vrot.slane %v705_v23, 1  ;;  %v1358_v23 = vld [vmem:[#allocation2 + $0x1d8] sm:$0xff] }
  0xcc   : > { %4627 = vmatmul.msk.f32.gmra.mxu1 %vm231_vm0, %v1344_v41  ;;  %v5754_v43 = vpop.f32.mrf.mxu3 }
  0xcd   : > { %v800_v35 = vsel %vm739_vm3, %v797_v3, %v799_v57 }
  0xce   : > { %866 = vst.msk [vmem:[#allocation2 + $0x208] sm:$0xff] %vm231_vm0, %v800_v35  ;;  %v415_v35 = vrot.slane %v5548_v55, 7  ;;  %v4694_v55 = vld [vmem:[%s7575_s1 + $0x180] sm:$0xff] }
  0xcf   : > { %2002 = vmatpush.msrb.mxu1 %v4694_v55 }
  0xd0   : > { %1090 = vmatmul.f32.gmra.mxu0 %v5751_v8  ;;  %1527 = vmatmul.f32.gmra.mxu2 %v5751_v8 }
  0xd1   : > { %v5770_v26 = vpop.f32.mrf.mxu1  ;;  %4683 = vmatmul.msk.f32.gmra.mxu3 %vm231_vm0, %v1348_v22 }
  0xd4   : > { %4628 = vmatmul.msk.f32.gmra.mxu1 %vm231_vm0, %v1346_v61  ;;  %v5783_v30 = vpop.f32.mrf.mxu3  ;;  %v330_v61 = vsel %vm227_vm6, %v5488_v21, 0.0  ;;  %v798_v21 = vsel %vm739_vm3, %v795_v39, %v797_v3  ;;  %v278_v39 = vld [vmem:[%s5183_s13 + $0xf8] sm:$0xff] }
  0xd5   : > { %v409_v2 = vrot.slane %v330_v61, 7  ;;  %865 = vst.msk [vmem:[#allocation2 + $0x1f8] sm:$0xff] %vm231_vm0, %v798_v21  ;;  %v1356_v61 = vld [vmem:[#allocation2 + $0x1c8] sm:$0xff] }
  0xd6   : > { %v1364_v55 = vld [vmem:[#allocation2 + $0x208] sm:$0xff] }
  0xd7   : > { %v410_v17 = vsel %vm379_vm7, %v407_v59, %v409_v2  ;;  %v412_v50 = vsel %vm379_vm7, %v409_v2, %v411_v31  ;;  %v310_v59 = vmax.f32 %v278_v39, 0.0  ;;  %v332_v2 = vsel %vm227_vm6, %v5535_v49, 0.0  ;;  %v577_v49 = vpop.permute.xlu2 %576 }
  0xd8   : > { %1093 = vmatmul.f32.gmra.mxu0 %v5779_v5  ;;  %1530 = vmatmul.f32.gmra.mxu2 %v5779_v5  ;;  %492 = vst.msk [vmem:[#allocation2 + $0x120] sm:$0xff] %vm231_vm0, %v410_v17  ;;  %v413_v17 = vrot.slane %v332_v2, 7 }
  0xd9   : > { %v5795_v41 = vpop.f32.mrf.mxu1  ;;  %4684 = vmatmul.msk.f32.gmra.mxu3 %vm231_vm0, %v1350_v29  ;;  %493 = vst.msk [vmem:[#allocation2 + $0x130] sm:$0xff] %vm231_vm0, %v412_v50  ;;  %v801_v0 = vrot.slane %v310_v59, 1  ;;  %604 = vrot.lane.b32.xlu1 %v310_v59, %s5064_s12  ;;  %v5885_v11 = vsel %vm227_vm6, %v310_v59, 0.0  ;;  %v334_v50 = vsel %vm227_vm6, %v5567_v4, 0.0  ;;  %v5921_v4 = vld [vmem:[#allocation2 + $0x110] sm:$0xff] }
  0xda   : > { %655 = vst.msk [vmem:[#allocation2 + $0x130] sm:$0xff] %vm638_vm8, %v575_v56  ;;  %v416_v32 = vsel %vm379_vm7, %v413_v17, %v415_v35 }
  0xdb   : > { %v802_v3 = vsel %vm739_vm3, %v799_v57, %v801_v0  ;;  %869 = vst.msk [vmem:[#allocation2 + $0x228] sm:$0x7f] %vm868_vm9, %v801_v0  ;;  %v417_v0 = vrot.slane %v334_v50, 7 }
  0xdc   : > { %4629 = vmatmul.msk.f32.gmra.mxu1 %vm231_vm0, %v1348_v22  ;;  %v5804_v53 = vpop.f32.mrf.mxu3  ;;  %v573_v22 = vpop.permute.xlu0 %572  ;;  %867 = vst.msk [vmem:[#allocation2 + $0x218] sm:$0xff] %vm231_vm0, %v802_v3  ;;  %v1362_v2 = vld [vmem:[#allocation2 + $0x1f8] sm:$0xff] }
  0xdd   : > { %654 = vst.msk [vmem:[#allocation2 + $0x120] sm:$0xff] %vm638_vm8, %v573_v22 }
  0xde   : > { %495 = vst.msk [vmem:[#allocation2 + $0x150] sm:$0xff] %vm231_vm0, %v416_v32 }
  0xdf   : > { %7588 = vst [vmem:[#allocation8_spill] sm:$0xff] %v5921_v4 }
  0xe0   : > { %1096 = vmatmul.f32.gmra.mxu0 %v5801_v45  ;;  %1533 = vmatmul.f32.gmra.mxu2 %v5801_v45 }
  0xe1   : > { %v5819_v7 = vpop.f32.mrf.mxu1  ;;  %4685 = vmatmul.msk.f32.gmra.mxu3 %vm231_vm0, %v1352_v38 }
  0xe4   : > { %4630 = vmatmul.msk.f32.gmra.mxu1 %vm231_vm0, %v1350_v29  ;;  %v5834_v16 = vpop.f32.mrf.mxu3  ;;  %v5856_v29 = vld [vmem:[#allocation2 + $0xe0] sm:$0xff]  ;;  %v579_v59 = vpop.permute.xlu0 %578 }
  0xe5   : > { %657 = vst.msk [vmem:[#allocation2 + $0x150] sm:$0xff] %vm638_vm8, %v579_v59  ;;  %v5937_v32 = vld [vmem:[#allocation2 + $0x120] sm:$0xff] }
  0xe6   : > { %7589 = vst [vmem:[#allocation9_spill] sm:$0xff] %v5937_v32 }
  0xe8   : > { %1099 = vmatmul.f32.gmra.mxu0 %v5830_v46  ;;  %1536 = vmatmul.f32.gmra.mxu2 %v5830_v46 }
  0xe9   : > { %v5846_v47 = vpop.f32.mrf.mxu1  ;;  %4686 = vmatmul.msk.f32.gmra.mxu3 %vm231_vm0, %v1354_v27 }
  0xec   : > { %4631 = vmatmul.msk.f32.gmra.mxu1 %vm231_vm0, %v1352_v38  ;;  %v5859_v44 = vpop.f32.mrf.mxu3 }
  0xf0   : > { %1102 = vmatmul.f32.gmra.mxu0 %v5856_v29  ;;  %1539 = vmatmul.f32.gmra.mxu2 %v5856_v29 }
  0xf1   : > { %v5869_v38 = vpop.f32.mrf.mxu1  ;;  %4687 = vmatmul.msk.f32.gmra.mxu3 %vm231_vm0, %v1356_v61 }
  0xf4   : > { %4632 = vmatmul.msk.f32.gmra.mxu1 %vm231_vm0, %v1354_v27  ;;  %v5881_v21 = vpop.f32.mrf.mxu3  ;;  %v414_v27 = vsel %vm379_vm7, %v411_v31, %v413_v17  ;;  %v1360_v31 = vld [vmem:[#allocation2 + $0x1e8] sm:$0xff]  ;;  %v418_v17 = vsel %vm379_vm7, %v415_v35, %v417_v0  ;;  %v419_v35 = vrot.slane %v5582_v15, 7 }
  0xf5   : > { %494 = vst.msk [vmem:[#allocation2 + $0x140] sm:$0xff] %vm231_vm0, %v414_v27 }
  0xf6   : > { %656 = vst.msk [vmem:[#allocation2 + $0x140] sm:$0xff] %vm638_vm8, %v577_v49  ;;  %v581_v49 = vpop.permute.xlu1 %580  ;;  %v420_v59 = vsel %vm379_vm7, %v417_v0, %v419_v35 }
  0xf7   : > { %496 = vst.msk [vmem:[#allocation2 + $0x160] sm:$0xff] %vm231_vm0, %v418_v17 }
  0xf8   : > { %1105 = vmatmul.f32.gmra.mxu0 %v5876_v6  ;;  %1542 = vmatmul.f32.gmra.mxu2 %v5876_v6  ;;  %658 = vst.msk [vmem:[#allocation2 + $0x160] sm:$0xff] %vm638_vm8, %v581_v49 }
  0xf9   : > { %v5892_v57 = vpop.f32.mrf.mxu1  ;;  %4688 = vmatmul.msk.f32.gmra.mxu3 %vm231_vm0, %v1358_v23  ;;  %497 = vst.msk [vmem:[#allocation2 + $0x170] sm:$0xff] %vm231_vm0, %v420_v59 }
  0xfc   : > { %4633 = vmatmul.msk.f32.gmra.mxu1 %vm231_vm0, %v1356_v61  ;;  %v5901_v39 = vpop.f32.mrf.mxu3  ;;  %v3038_v61 = vld [vmem:[%s7577_s3 + $0xb8] sm:$0xff] }
  0xfd   : > { %3250 = vmatpush.msrb.mxu2 %v3038_v61  ;;  %v336_v61 = vsel %vm227_vm6, %v5607_v33, 0.0  ;;  %v1366_v33 = vld [vmem:[#allocation2 + $0x218] sm:$0xff] }
  0xfe   : > { %v421_v15 = vrot.slane %v336_v61, 7  ;;  %v3029_v61 = vld [vmem:[%s7577_s3 + $0x70] sm:$0xff] }
 0x100   : > { %1108 = vmatmul.f32.gmra.mxu0 %v5899_v37  ;;  %1545 = vmatmul.f32.gmra.mxu2 %v5899_v37  ;;  %v422_v59 = vsel %vm379_vm7, %v419_v35, %v421_v15  ;;  %v1716_v35 = vld [vmem:[#allocation3] sm:$0xff] }
 0x101   : > { %v5909_v56 = vpop.f32.mrf.mxu1  ;;  %4689 = vmatmul.msk.f32.gmra.mxu3 %vm231_vm0, %v1360_v31  ;;  %498 = vst.msk [vmem:[#allocation2 + $0x180] sm:$0xff] %vm231_vm0, %v422_v59  ;;  %v5974_v59 = vld [vmem:[#allocation2 + $0x140] sm:$0xff] }
 0x104   : > { %4634 = vmatmul.msk.f32.gmra.mxu1 %vm231_vm0, %v1358_v23  ;;  %v5923_v3 = vpop.f32.mrf.mxu3  ;;  %v3030_v23 = vld [vmem:[%s7577_s3 + $0x78] sm:$0xff] }
 0x105   : > { %3129 = vmatpush.msrb.mxu0 %v3030_v23  ;;  %v5954_v23 = vld [vmem:[#allocation2 + $0x130] sm:$0xff] }
 0x106   : > { %7590 = vst [vmem:[#allocation10_spill] sm:$0xff] %v5954_v23 }
 0x107   : > { %3130 = vmatpush.msrb.mxu0 %v3029_v61  ;;  %v338_v61 = vsel %vm227_vm6, %v5648_v63, 0.0 }
 0x108   : > { %1111 = vmatmul.f32.gmra.mxu0 %v5921_v4  ;;  %1548 = vmatmul.f32.gmra.mxu2 %v5921_v4 }
 0x109   : > { %v5928_v27 = vpop.f32.mrf.mxu1  ;;  %4690 = vmatmul.msk.f32.gmra.mxu3 %vm231_vm0, %v1362_v2 }
 0x10c   : > { %4635 = vmatmul.msk.f32.gmra.mxu1 %vm231_vm0, %v1360_v31  ;;  %v5939_v50 = vpop.f32.mrf.mxu3  ;;  %v583_v31 = vpop.permute.xlu2 %582 }
 0x10d   : > { %659 = vst.msk [vmem:[#allocation2 + $0x170] sm:$0xff] %vm638_vm8, %v583_v31 }
 0x110   : > { %1114 = vmatmul.f32.gmra.mxu0 %v5937_v32  ;;  %1551 = vmatmul.f32.gmra.mxu2 %v5937_v32 }
 0x111   : > { %v5948_v17 = vpop.f32.mrf.mxu1  ;;  %4691 = vmatmul.msk.f32.gmra.mxu3 %vm231_vm0, %v1364_v55 }
 0x114   : > { %4636 = vmatmul.msk.f32.gmra.mxu1 %vm231_vm0, %v1362_v2  ;;  %v1070_v49 = vpop.f32.mrf.mxu0  ;;  %v5956_v0 = vpop.f32.mrf.mxu3 }
 0x115   : > { %v1184_v22 = vadd.f32 %v5661_v14, %v1070_v49  ;;  %v585_v2 = vpop.permute.xlu0 %584  ;;  %v589_v63 = vpop.permute.xlu2 %588 }
 0x116   : > { %660 = vst.msk [vmem:[#allocation2 + $0x180] sm:$0xff] %vm638_vm8, %v585_v2 }
 0x117   : > { %1275 = vst.msk [vmem:[#allocation3 + $0x10] sm:$0xff] %vm231_vm0, %v1184_v22  ;;  %v423_v22 = vrot.slane %v5624_v48, 7  ;;  %v1368_v48 = vld [vmem:[#allocation2 + $0x228] sm:$0xff] }
 0x118   : > { %1117 = vmatmul.f32.gmra.mxu0 %v5954_v23  ;;  %1554 = vmatmul.f32.gmra.mxu2 %v5954_v23 }
 0x119   : > { %v5963_v31 = vpop.f32.mrf.mxu1  ;;  %4692 = vmatmul.msk.f32.gmra.mxu3 %vm231_vm0, %v1366_v33  ;;  %v587_v33 = vpop.permute.xlu1 %586 }
 0x11a   : > { %v1507_v14 = vpop.f32.mrf.mxu2 }
 0x11b   : > { %v1621_v49 = vadd.f32 %v5646_v62, %v1507_v14  ;;  %v424_v62 = vsel %vm379_vm7, %v421_v15, %v423_v22 }
 0x11c   : > { %4637 = vmatmul.msk.f32.gmra.mxu1 %vm231_vm0, %v1364_v55  ;;  %v5976_v32 = vpop.f32.mrf.mxu3  ;;  %499 = vst.msk [vmem:[#allocation2 + $0x190] sm:$0xff] %vm231_vm0, %v424_v62 }
 0x11d   : > { %v1073_v9 = vpop.f32.mrf.mxu0  ;;  %v1748_v23 = vadd.f32 %v1716_v35, %v1621_v49  ;;  %661 = vst.msk [vmem:[#allocation2 + $0x190] sm:$0xff] %vm638_vm8, %v587_v33  ;;  %v3028_v33 = vld [vmem:[%s7577_s3 + $0x68] sm:$0xff] }
 0x11e   : > { %v1187_v4 = vadd.f32 %v5689_v24, %v1073_v9  ;;  %v3037_v9 = vld [vmem:[%s7577_s3 + $0xb0] sm:$0xff]  ;;  %3131 = vmatpush.msrb.mxu0 %v3028_v33 }
 0x11f   : > { %1780 = vst.msk [vmem:[#allocation3] sm:$0xff] %vm231_vm0, %v1748_v23  ;;  %3251 = vmatpush.msrb.mxu2 %v3037_v9  ;;  %v5994_v23 = vld [vmem:[#allocation2 + $0x150] sm:$0xff]  ;;  %v1718_v9 = vld [vmem:[#allocation3 + $0x10] sm:$0xff] }
 0x120   : > { %1120 = vmatmul.f32.gmra.mxu0 %v5974_v59  ;;  %1557 = vmatmul.f32.gmra.mxu2 %v5974_v59  ;;  %1276 = vst.msk [vmem:[#allocation3 + $0x18] sm:$0xff] %vm231_vm0, %v1187_v4  ;;  %v1717_v4 = vld [vmem:[#allocation3 + $0x8] sm:$0xff] }
 0x121   : > { %v5984_v55 = vpop.f32.mrf.mxu1  ;;  %4693 = vmatmul.msk.f32.gmra.mxu3 %vm231_vm0, %v1368_v48  ;;  %v425_v48 = vrot.slane %v338_v61, 7 }
 0x123   : > { %v1510_v2 = vpop.f32.mrf.mxu2 }
 0x124   : > { %v1624_v24 = vadd.f32 %v5677_v20, %v1510_v2  ;;  %2003 = vmatmul.f32.vlgmr.msrb.gmra.mxu1 %v5622_v34  ;;  %v5999_v49 = vpop.f32.mrf.mxu3  ;;  %v1813_v34 = vld [vmem:[#allocation2 + $0x58] sm:$0xff]  ;;  %v426_v20 = vsel %vm379_vm7, %v423_v22, %v425_v48  ;;  %v427_v2 = vrot.slane %v5675_v19, 7  ;;  %v1815_v19 = vld [vmem:[#allocation2 + $0x68] sm:$0xff] }
 0x125   : > { %v1076_v15 = vpop.f32.mrf.mxu0  ;;  %500 = vst.msk [vmem:[#allocation2 + $0x1a0] sm:$0xff] %vm231_vm0, %v426_v20 }
 0x126   : > { %v1749_v14 = vadd.f32 %v1717_v4, %v1624_v24  ;;  %v1190_v35 = vadd.f32 %v5713_v10, %v1076_v15  ;;  %662 = vst.msk [vmem:[#allocation2 + $0x1a0] sm:$0xff] %vm638_vm8, %v589_v63  ;;  %v6018_v4 = vld [vmem:[#allocation2 + $0x160] sm:$0xff] }
 0x128   : > { %1781 = vst.msk [vmem:[#allocation3 + $0x8] sm:$0xff] %vm231_vm0, %v1749_v14  ;;  %1123 = vmatmul.f32.gmra.mxu0 %v5994_v23  ;;  %1560 = vmatmul.f32.gmra.mxu2 %v5994_v23 }
 0x129   : > { %1277 = vst.msk [vmem:[#allocation3 + $0x20] sm:$0xff] %vm231_vm0, %v1190_v35  ;;  %v6007_v62 = vpop.f32.mrf.mxu1  ;;  %4718 = vmatmul.msk.f32.vlgmr.msrb.gmra.mxu3 %vm231_vm0, %v1813_v34  ;;  %v591_v34 = vpop.permute.xlu0 %590 }
 0x12b   : > { %v1513_v10 = vpop.f32.mrf.mxu2 }
 0x12c   : > { %v1627_v22 = vadd.f32 %v5700_v36, %v1513_v10  ;;  %2006 = vmatmul.f32.gmra.mxu1 %v5643_v60  ;;  %v6020_v61 = vpop.f32.mrf.mxu3  ;;  %v428_v36 = vsel %vm379_vm7, %v425_v48, %v427_v2  ;;  %v340_v60 = vsel %vm227_vm6, %v5706_v40, 0.0  ;;  %v1719_v48 = vld [vmem:[#allocation3 + $0x18] sm:$0xff]  ;;  %v6038_v40 = vld [vmem:[#allocation2 + $0x170] sm:$0xff] }
 0x12d   : > { %v1079_v24 = vpop.f32.mrf.mxu0  ;;  %501 = vst.msk [vmem:[#allocation2 + $0x1b0] sm:$0xff] %vm231_vm0, %v428_v36  ;;  %v429_v20 = vrot.slane %v340_v60, 7  ;;  %v6058_v60 = vld [vmem:[#allocation2 + $0x180] sm:$0xff] }
 0x12e   : > { %v1750_v15 = vadd.f32 %v1718_v9, %v1627_v22  ;;  %v1193_v14 = vadd.f32 %v5739_v1, %v1079_v24  ;;  %663 = vst.msk [vmem:[#allocation2 + $0x1b0] sm:$0xff] %vm638_vm8, %v591_v34  ;;  %v1817_v24 = vld [vmem:[#allocation2 + $0x78] sm:$0xff] }
 0x130   : > { %1782 = vst.msk [vmem:[#allocation3 + $0x10] sm:$0xff] %vm231_vm0, %v1750_v15  ;;  %1126 = vmatmul.f32.gmra.mxu0 %v6018_v4  ;;  %1563 = vmatmul.f32.gmra.mxu2 %v6018_v4  ;;  %v593_v15 = vpop.permute.xlu1 %592 }
 0x131   : > { %1278 = vst.msk [vmem:[#allocation3 + $0x28] sm:$0xff] %vm231_vm0, %v1193_v14  ;;  %v6031_v35 = vpop.f32.mrf.mxu1  ;;  %4719 = vmatmul.msk.f32.gmra.mxu3 %vm231_vm0, %v1815_v19  ;;  %v3027_v14 = vld [vmem:[%s7577_s3 + $0x60] sm:$0xff] }
 0x132   : > { %3132 = vmatpush.msrb.mxu0 %v3027_v14 }
 0x133   : > { %v1516_v1 = vpop.f32.mrf.mxu2 }
 0x134   : > { %v1630_v63 = vadd.f32 %v5729_v42, %v1516_v1  ;;  %2009 = vmatmul.f32.gmra.mxu1 %v5673_v18  ;;  %v6040_v22 = vpop.f32.mrf.mxu3  ;;  %v430_v42 = vsel %vm379_vm7, %v427_v2, %v429_v20  ;;  %v1720_v2 = vld [vmem:[#allocation3 + $0x20] sm:$0xff] }
 0x135   : > { %v1082_v33 = vpop.f32.mrf.mxu0  ;;  %502 = vst.msk [vmem:[#allocation2 + $0x1c0] sm:$0xff] %vm231_vm0, %v430_v42 }
 0x136   : > { %v1751_v10 = vadd.f32 %v1719_v48, %v1630_v63  ;;  %v1196_v9 = vadd.f32 %v5770_v26, %v1082_v33  ;;  %664 = vst.msk [vmem:[#allocation2 + $0x1c0] sm:$0xff] %vm638_vm8, %v593_v15  ;;  %v431_v48 = vrot.slane %v5724_v52, 7  ;;  %v342_v33 = vsel %vm227_vm6, %v5760_v25, 0.0  ;;  %v6082_v15 = vld [vmem:[#allocation2 + $0x190] sm:$0xff] }
 0x138   : > { %1783 = vst.msk [vmem:[#allocation3 + $0x18] sm:$0xff] %vm231_vm0, %v1751_v10  ;;  %1129 = vmatmul.f32.gmra.mxu0 %v6038_v40  ;;  %1566 = vmatmul.f32.gmra.mxu2 %v6038_v40  ;;  %v1721_v25 = vld [vmem:[#allocation3 + $0x28] sm:$0xff] }
 0x139   : > { %1279 = vst.msk [vmem:[#allocation3 + $0x30] sm:$0xff] %vm231_vm0, %v1196_v9  ;;  %v6048_v18 = vpop.f32.mrf.mxu1  ;;  %4720 = vmatmul.msk.f32.gmra.mxu3 %vm231_vm0, %v1817_v24  ;;  %v433_v9 = vrot.slane %v342_v33, 7  ;;  %v6103_v33 = vld [vmem:[#allocation2 + $0x1a0] sm:$0xff] }
 0x13b   : > { %v1519_v26 = vpop.f32.mrf.mxu2 }
 0x13c   : > { %v1633_v19 = vadd.f32 %v5754_v43, %v1519_v26  ;;  %2012 = vmatmul.f32.gmra.mxu1 %v5697_v58  ;;  %v6060_v1 = vpop.f32.mrf.mxu3  ;;  %v1819_v43 = vld [vmem:[#allocation2 + $0x88] sm:$0xff]  ;;  %v432_v58 = vsel %vm379_vm7, %v429_v20, %v431_v48 }
 0x13d   : > { %v1085_v36 = vpop.f32.mrf.mxu0  ;;  %503 = vst.msk [vmem:[#allocation2 + $0x1d0] sm:$0xff] %vm231_vm0, %v432_v58  ;;  %v3036_v20 = vld [vmem:[%s7577_s3 + $0xa8] sm:$0xff] }
 0x13e   : > { %v1752_v34 = vadd.f32 %v1720_v2, %v1633_v19  ;;  %v1199_v63 = vadd.f32 %v5795_v41, %v1085_v36  ;;  %v595_v41 = vpop.permute.xlu2 %594  ;;  %3252 = vmatpush.msrb.mxu2 %v3036_v20  ;;  %v1821_v2 = vld [vmem:[#allocation2 + $0x98] sm:$0xff]  ;;  %v597_v36 = vpop.permute.xlu0 %596 }
 0x13f   : > { %665 = vst.msk [vmem:[#allocation2 + $0x1d0] sm:$0xff] %vm638_vm8, %v595_v41 }
 0x140   : > { %1784 = vst.msk [vmem:[#allocation3 + $0x20] sm:$0xff] %vm231_vm0, %v1752_v34  ;;  %1132 = vmatmul.f32.gmra.mxu0 %v6058_v60  ;;  %1569 = vmatmul.f32.gmra.mxu2 %v6058_v60  ;;  %v3026_v34 = vld [vmem:[%s7577_s3 + $0x58] sm:$0xff] }
 0x141   : > { %1280 = vst.msk [vmem:[#allocation3 + $0x38] sm:$0xff] %vm231_vm0, %v1199_v63  ;;  %v6072_v10 = vpop.f32.mrf.mxu1  ;;  %4721 = vmatmul.msk.f32.gmra.mxu3 %vm231_vm0, %v1819_v43  ;;  %3133 = vmatpush.msrb.mxu0 %v3026_v34  ;;  %v435_v63 = vrot.slane %v5781_v28, 7  ;;  %v1722_v43 = vld [vmem:[#allocation3 + $0x30] sm:$0xff]  ;;  %v1823_v28 = vld [vmem:[#allocation2 + $0xa8] sm:$0xff] }
 0x143   : > { %v1522_v52 = vpop.f32.mrf.mxu2 }
 0x144   : > { %v1636_v24 = vadd.f32 %v5783_v30, %v1522_v52  ;;  %2015 = vmatmul.f32.gmra.mxu1 %v5722_v51  ;;  %v6084_v26 = vpop.f32.mrf.mxu3  ;;  %v434_v30 = vsel %vm379_vm7, %v431_v48, %v433_v9 }
 0x145   : > { %v1088_v42 = vpop.f32.mrf.mxu0  ;;  %504 = vst.msk [vmem:[#allocation2 + $0x1e0] sm:$0xff] %vm231_vm0, %v434_v30 }
 0x146   : > { %v1753_v14 = vadd.f32 %v1721_v25, %v1636_v24  ;;  %v1202_v19 = vadd.f32 %v5819_v7, %v1088_v42  ;;  %666 = vst.msk [vmem:[#allocation2 + $0x1e0] sm:$0xff] %vm638_vm8, %v597_v36  ;;  %v599_v24 = vpop.permute.xlu1 %598 }
 0x148   : > { %1785 = vst.msk [vmem:[#allocation3 + $0x28] sm:$0xff] %vm231_vm0, %v1753_v14  ;;  %1135 = vmatmul.f32.gmra.mxu0 %v6082_v15  ;;  %1572 = vmatmul.f32.gmra.mxu2 %v6082_v15  ;;  %v1723_v42 = vld [vmem:[#allocation3 + $0x38] sm:$0xff] }
 0x149   : > { %1281 = vst.msk [vmem:[#allocation3 + $0x40] sm:$0xff] %vm231_vm0, %v1202_v19  ;;  %v6092_v51 = vpop.f32.mrf.mxu1  ;;  %4722 = vmatmul.msk.f32.gmra.mxu3 %vm231_vm0, %v1821_v2  ;;  %v6120_v19 = vld [vmem:[#allocation2 + $0x1b0] sm:$0xff] }
 0x14b   : > { %v1525_v7 = vpop.f32.mrf.mxu2 }
 0x14c   : > { %v1639_v48 = vadd.f32 %v5804_v53, %v1525_v7  ;;  %2018 = vmatmul.f32.gmra.mxu1 %v5751_v8  ;;  %v6105_v52 = vpop.f32.mrf.mxu3  ;;  %v436_v53 = vsel %vm379_vm7, %v433_v9, %v435_v63  ;;  %v344_v9 = vsel %vm227_vm6, %v5806_v54, 0.0  ;;  %v601_v54 = vpop.permute.xlu2 %600 }
 0x14d   : > { %v1091_v58 = vpop.f32.mrf.mxu0  ;;  %505 = vst.msk [vmem:[#allocation2 + $0x1f0] sm:$0xff] %vm231_vm0, %v436_v53  ;;  %v437_v34 = vrot.slane %v344_v9, 7 }
 0x14e   : > { %v1754_v41 = vadd.f32 %v1722_v43, %v1639_v48  ;;  %v1205_v20 = vadd.f32 %v5846_v47, %v1091_v58  ;;  %667 = vst.msk [vmem:[#allocation2 + $0x1f0] sm:$0xff] %vm638_vm8, %v599_v24  ;;  %v3025_v48 = vld [vmem:[%s7577_s3 + $0x50] sm:$0xff]  ;;  %v439_v43 = vrot.slane %v5832_v13, 7  ;;  %v1827_v13 = vld [vmem:[#allocation2 + $0xc8] sm:$0xff] }
 0x14f   : > { %3134 = vmatpush.msrb.mxu0 %v3025_v48  ;;  %v605_v48 = vpop.permute.xlu1 %604 }
 0x150   : > { %1786 = vst.msk [vmem:[#allocation3 + $0x30] sm:$0xff] %vm231_vm0, %v1754_v41  ;;  %1138 = vmatmul.f32.gmra.mxu0 %v6103_v33  ;;  %1575 = vmatmul.f32.gmra.mxu2 %v6103_v33  ;;  %v1724_v58 = vld [vmem:[#allocation3 + $0x40] sm:$0xff] }
 0x151   : > { %1282 = vst.msk [vmem:[#allocation3 + $0x48] sm:$0xff] %vm231_vm0, %v1205_v20  ;;  %v6113_v8 = vpop.f32.mrf.mxu1  ;;  %4723 = vmatmul.msk.f32.gmra.mxu3 %vm231_vm0, %v1823_v28  ;;  %v6144_v20 = vld [vmem:[#allocation2 + $0x1c0] sm:$0xff] }
 0x153   : > { %v1528_v25 = vpop.f32.mrf.mxu2 }
 0x154   : > { %v1642_v47 = vadd.f32 %v5834_v16, %v1528_v25  ;;  %2021 = vmatmul.f32.gmra.mxu1 %v5779_v5  ;;  %v6125_v30 = vpop.f32.mrf.mxu3  ;;  %v1825_v5 = vld [vmem:[#allocation2 + $0xb8] sm:$0xff]  ;;  %v438_v16 = vsel %vm379_vm7, %v435_v63, %v437_v34  ;;  %v603_v25 = vpop.permute.xlu0 %602 }
 0x155   : > { %v1094_v14 = vpop.f32.mrf.mxu0  ;;  %506 = vst.msk [vmem:[#allocation2 + $0x200] sm:$0xff] %vm231_vm0, %v438_v16  ;;  %v1829_v16 = vld [vmem:[#allocation2 + $0xd8] sm:$0xff] }
 0x156   : > { %v1755_v2 = vadd.f32 %v1723_v42, %v1642_v47  ;;  %v1208_v36 = vadd.f32 %v5869_v38, %v1094_v14  ;;  %668 = vst.msk [vmem:[#allocation2 + $0x200] sm:$0xff] %vm638_vm8, %v601_v54 }
 0x158   : > { %1787 = vst.msk [vmem:[#allocation3 + $0x38] sm:$0xff] %vm231_vm0, %v1755_v2  ;;  %1141 = vmatmul.f32.gmra.mxu0 %v6120_v19  ;;  %1578 = vmatmul.f32.gmra.mxu2 %v6120_v19  ;;  %v1725_v14 = vld [vmem:[#allocation3 + $0x48] sm:$0xff]  ;;  %v6164_v2 = vld [vmem:[#allocation2 + $0x1d0] sm:$0xff] }
 0x159   : > { %1283 = vst.msk [vmem:[#allocation3 + $0x50] sm:$0xff] %vm231_vm0, %v1208_v36  ;;  %v6133_v7 = vpop.f32.mrf.mxu1  ;;  %4724 = vmatmul.msk.f32.gmra.mxu3 %vm231_vm0, %v1825_v5 }
 0x15b   : > { %v1531_v38 = vpop.f32.mrf.mxu2 }
 0x15c   : > { %v1645_v63 = vadd.f32 %v5859_v44, %v1531_v38  ;;  %2024 = vmatmul.f32.gmra.mxu1 %v5801_v45  ;;  %v6146_v53 = vpop.f32.mrf.mxu3  ;;  %v440_v44 = vsel %vm379_vm7, %v437_v34, %v439_v43 }
 0x15d   : > { %v1097_v41 = vpop.f32.mrf.mxu0  ;;  %507 = vst.msk [vmem:[#allocation2 + $0x210] sm:$0xff] %vm231_vm0, %v440_v44 }
 0x15e   : > { %v1756_v28 = vadd.f32 %v1724_v58, %v1645_v63  ;;  %v1211_v24 = vadd.f32 %v5892_v57, %v1097_v41  ;;  %669 = vst.msk [vmem:[#allocation2 + $0x210] sm:$0xff] %vm638_vm8, %v603_v25  ;;  %v3035_v57 = vld [vmem:[%s7577_s3 + $0xa0] sm:$0xff] }
 0x15f   : > { %3253 = vmatpush.msrb.mxu2 %v3035_v57  ;;  %v6186_v58 = vld [vmem:[#allocation2 + $0x1e0] sm:$0xff] }
 0x160   : > { %1788 = vst.msk [vmem:[#allocation3 + $0x40] sm:$0xff] %vm231_vm0, %v1756_v28  ;;  %1144 = vmatmul.f32.gmra.mxu0 %v6144_v20  ;;  %1581 = vmatmul.f32.gmra.mxu2 %v6144_v20 }
 0x161   : > { %1284 = vst.msk [vmem:[#allocation3 + $0x58] sm:$0xff] %vm231_vm0, %v1211_v24  ;;  %v6154_v45 = vpop.f32.mrf.mxu1  ;;  %4725 = vmatmul.msk.f32.gmra.mxu3 %vm231_vm0, %v1827_v13  ;;  %v1831_v13 = vld [vmem:[#allocation2 + $0xe8] sm:$0xff] }
 0x163   : > { %v1534_v47 = vpop.f32.mrf.mxu2 }
 0x164   : > { %v1648_v42 = vadd.f32 %v5881_v21, %v1534_v47  ;;  %2027 = vmatmul.f32.gmra.mxu1 %v5830_v46  ;;  %v6166_v34 = vpop.f32.mrf.mxu3  ;;  %v7591_v21 = vrot.slane %v5885_v11, 7  ;;  %v6200_v47 = vld [vmem:[#allocation2 + $0x1f0] sm:$0xff] }
 0x165   : > { %v1100_v9 = vpop.f32.mrf.mxu0 }
 0x166   : > { %v1757_v36 = vadd.f32 %v1725_v14, %v1648_v42  ;;  %v1214_v5 = vadd.f32 %v5909_v56, %v1100_v9  ;;  %v442_v46 = vsel %vm379_vm7, %v439_v43, %v7591_v21  ;;  %v3024_v56 = vld [vmem:[%s7577_s3 + $0x48] sm:$0xff]  ;;  %v1726_v43 = vld [vmem:[#allocation3 + $0x50] sm:$0xff]  ;;  %v1833_v9 = vld [vmem:[#allocation2 + $0xf8] sm:$0xff] }
 0x167   : > { %508 = vst.msk [vmem:[#allocation2 + $0x220] sm:$0xff] %vm231_vm0, %v442_v46  ;;  %3135 = vmatpush.msrb.mxu0 %v3024_v56  ;;  %v6217_v21 = vld [vmem:[#allocation2 + $0x200] sm:$0xff] }
 0x168   : > { %1789 = vst.msk [vmem:[#allocation3 + $0x48] sm:$0xff] %vm231_vm0, %v1757_v36  ;;  %1147 = vmatmul.f32.gmra.mxu0 %v6164_v2  ;;  %1584 = vmatmul.f32.gmra.mxu2 %v6164_v2  ;;  %v1727_v25 = vld [vmem:[#allocation3 + $0x58] sm:$0xff] }
 0x169   : > { %1285 = vst.msk [vmem:[#allocation3 + $0x60] sm:$0xff] %vm231_vm0, %v1214_v5  ;;  %v6176_v54 = vpop.f32.mrf.mxu1  ;;  %4726 = vmatmul.msk.f32.gmra.mxu3 %vm231_vm0, %v1829_v16 }
 0x16a   : > { %670 = vst.msk [vmem:[#allocation2 + $0x220] sm:$0xff] %vm638_vm8, %v605_v48 }
 0x16b   : > { %v1537_v38 = vpop.f32.mrf.mxu2 }
 0x16c   : > { %v1651_v11 = vadd.f32 %v5901_v39, %v1537_v38  ;;  %2030 = vmatmul.f32.gmra.mxu1 %v5856_v29  ;;  %v6188_v28 = vpop.f32.mrf.mxu3  ;;  %v1835_v38 = vld [vmem:[#allocation2 + $0x108] sm:$0xff] }
 0x16d   : > { %v1103_v63 = vpop.f32.mrf.mxu0 }
 0x16e   : > { %v1758_v41 = vadd.f32 %v1726_v43, %v1651_v11  ;;  %v1217_v24 = vadd.f32 %v5928_v27, %v1103_v63  ;;  %v3034_v11 = vld [vmem:[%s7577_s3 + $0x98] sm:$0xff] }
 0x16f   : > { %v7592_v43 = vld [vmem:[#allocation8_spill] sm:$0xff]  ;;  %3254 = vmatpush.msrb.mxu2 %v3034_v11 }
 0x170   : > { %1790 = vst.msk [vmem:[#allocation3 + $0x50] sm:$0xff] %vm231_vm0, %v1758_v41  ;;  %1150 = vmatmul.f32.gmra.mxu0 %v6186_v58  ;;  %1587 = vmatmul.f32.gmra.mxu2 %v6186_v58  ;;  %v1728_v5 = vld [vmem:[#allocation3 + $0x60] sm:$0xff] }
 0x171   : > { %1286 = vst.msk [vmem:[#allocation3 + $0x68] sm:$0xff] %vm231_vm0, %v1217_v24  ;;  %v6195_v39 = vpop.f32.mrf.mxu1  ;;  %4727 = vmatmul.msk.f32.gmra.mxu3 %vm231_vm0, %v1831_v13  ;;  %v6234_v24 = vld [vmem:[#allocation2 + $0x210] sm:$0xff] }
 0x173   : > { %v1540_v29 = vpop.f32.mrf.mxu2 }
 0x174   : > { %v1654_v44 = vadd.f32 %v5923_v3, %v1540_v29  ;;  %2033 = vmatmul.f32.gmra.mxu1 %v5876_v6  ;;  %v6202_v42 = vpop.f32.mrf.mxu3  ;;  %v3023_v6 = vld [vmem:[%s7577_s3 + $0x40] sm:$0xff] }
 0x175   : > { %v1106_v27 = vpop.f32.mrf.mxu0  ;;  %3136 = vmatpush.msrb.mxu0 %v3023_v6 }
 0x176   : > { %v1759_v57 = vadd.f32 %v1727_v25, %v1654_v44  ;;  %v1220_v14 = vadd.f32 %v5948_v17, %v1106_v27  ;;  %v1837_v25 = vld [vmem:[#allocation2 + $0x118] sm:$0xff] }
 0x177   : > { %v3022_v27 = vld [vmem:[%s7577_s3 + $0x38] sm:$0xff] }
 0x178   : > { %1791 = vst.msk [vmem:[#allocation3 + $0x58] sm:$0xff] %vm231_vm0, %v1759_v57  ;;  %1153 = vmatmul.f32.gmra.mxu0 %v6200_v47  ;;  %1590 = vmatmul.f32.gmra.mxu2 %v6200_v47  ;;  %v1729_v63 = vld [vmem:[#allocation3 + $0x68] sm:$0xff] }
 0x179   : > { %1287 = vst.msk [vmem:[#allocation3 + $0x70] sm:$0xff] %vm231_vm0, %v1220_v14  ;;  %v6209_v3 = vpop.f32.mrf.mxu1  ;;  %4728 = vmatmul.msk.f32.gmra.mxu3 %vm231_vm0, %v1833_v9  ;;  %3137 = vmatpush.msrb.mxu0 %v3022_v27 }
 0x17b   : > { %v1543_v36 = vpop.f32.mrf.mxu2 }
 0x17c   : > { %v1657_v17 = vadd.f32 %v5939_v50, %v1543_v36  ;;  %2036 = vmatmul.f32.gmra.mxu1 %v5899_v37  ;;  %v6219_v48 = vpop.f32.mrf.mxu3  ;;  %v6250_v36 = vld [vmem:[#allocation2 + $0x220] sm:$0xff] }
 0x17d   : > { %v1109_v16 = vpop.f32.mrf.mxu0 }
 0x17e   : > { %v1760_v46 = vadd.f32 %v1728_v5, %v1657_v17  ;;  %v1223_v56 = vadd.f32 %v5963_v31, %v1109_v16 }
 0x180   : > { %1792 = vst.msk [vmem:[#allocation3 + $0x60] sm:$0xff] %vm231_vm0, %v1760_v46  ;;  %1156 = vmatmul.f32.gmra.mxu0 %v6217_v21  ;;  %1593 = vmatmul.f32.gmra.mxu2 %v6217_v21  ;;  %v1730_v9 = vld [vmem:[#allocation3 + $0x70] sm:$0xff]  ;;  %v1839_v46 = vld [vmem:[#allocation2 + $0x128] sm:$0xff] }
 0x181   : > { %1288 = vst.msk [vmem:[#allocation3 + $0x78] sm:$0xff] %vm231_vm0, %v1223_v56  ;;  %v6226_v50 = vpop.f32.mrf.mxu1  ;;  %4729 = vmatmul.msk.f32.gmra.mxu3 %vm231_vm0, %v1835_v38 }
 0x183   : > { %v1546_v37 = vpop.f32.mrf.mxu2 }
 0x184   : > { %v1660_v31 = vadd.f32 %v5956_v0, %v1546_v37  ;;  %2039 = vmatmul.f32.gmra.mxu1 %v7592_v43  ;;  %v6236_v29 = vpop.f32.mrf.mxu3  ;;  %v7594_v37 = vld [vmem:[#allocation10_spill] sm:$0xff] }
 0x185   : > { %v1112_v41 = vpop.f32.mrf.mxu0 }
 0x186   : > { %v1761_v13 = vadd.f32 %v1729_v63, %v1660_v31  ;;  %v1226_v44 = vadd.f32 %v5984_v55, %v1112_v41  ;;  %v7593_v55 = vld [vmem:[#allocation9_spill] sm:$0xff]  ;;  %v1841_v41 = vld [vmem:[#allocation2 + $0x138] sm:$0xff] }
 0x188   : > { %1793 = vst.msk [vmem:[#allocation3 + $0x68] sm:$0xff] %vm231_vm0, %v1761_v13  ;;  %1596 = vmatmul.f32.gmra.mxu2 %v6234_v24  ;;  %v1731_v11 = vld [vmem:[#allocation3 + $0x78] sm:$0xff] }
 0x189   : > { %1289 = vst.msk [vmem:[#allocation3 + $0x80] sm:$0xff] %vm231_vm0, %v1226_v44  ;;  %v6242_v0 = vpop.f32.mrf.mxu1  ;;  %4730 = vmatmul.msk.f32.gmra.mxu3 %vm231_vm0, %v1837_v25 }
 0x18b   : > { %v1549_v57 = vpop.f32.mrf.mxu2 }
 0x18c   : > { %v1663_v14 = vadd.f32 %v5976_v32, %v1549_v57  ;;  %2042 = vmatmul.f32.gmra.mxu1 %v7593_v55  ;;  %v6252_v5 = vpop.f32.mrf.mxu3 }
 0x18d   : > { %v1115_v6 = vpop.f32.mrf.mxu0 }
 0x18e   : > { %v1762_v17 = vadd.f32 %v1730_v9, %v1663_v14  ;;  %v1229_v16 = vadd.f32 %v6007_v62, %v1115_v6  ;;  %v3032_v6 = vld [vmem:[%s7577_s3 + $0x88] sm:$0xff] }
 0x190   : > { %1794 = vst.msk [vmem:[#allocation3 + $0x70] sm:$0xff] %vm231_vm0, %v1762_v17  ;;  %1599 = vmatmul.f32.gmra.mxu2 %v6250_v36  ;;  %v1732_v27 = vld [vmem:[#allocation3 + $0x80] sm:$0xff]  ;;  %v3031_v17 = vld [vmem:[%s7577_s3 + $0x80] sm:$0xff] }
 0x191   : > { %1290 = vst.msk [vmem:[#allocation3 + $0x88] sm:$0xff] %vm231_vm0, %v1229_v16  ;;  %v6258_v56 = vpop.f32.mrf.mxu1  ;;  %4731 = vmatmul.msk.f32.gmra.mxu3 %vm231_vm0, %v1839_v46  ;;  %v6293_v46 = vld [vmem:[#allocation2] sm:$0xff] }
 0x193   : > { %v1552_v32 = vpop.f32.mrf.mxu2 }
 0x194   : > { %v1666_v38 = vadd.f32 %v5999_v49, %v1552_v32  ;;  %2045 = vmatmul.f32.gmra.mxu1 %v7594_v37  ;;  %v6263_v62 = vpop.f32.mrf.mxu3  ;;  %v3021_v49 = vld [vmem:[%s7577_s3 + $0x30] sm:$0xff] }
 0x195   : > { %v1118_v31 = vpop.f32.mrf.mxu0  ;;  %3138 = vmatpush.msrb.mxu0 %v3021_v49 }
 0x196   : > { %v1763_v43 = vadd.f32 %v1731_v11, %v1666_v38  ;;  %v1232_v63 = vadd.f32 %v6031_v35, %v1118_v31  ;;  %v3033_v35 = vld [vmem:[%s7577_s3 + $0x90] sm:$0xff] }
 0x197   : > { %3255 = vmatpush.msrb.mxu2 %v3033_v35 }
 0x198   : > { %1795 = vst.msk [vmem:[#allocation3 + $0x78] sm:$0xff] %vm231_vm0, %v1763_v43  ;;  %v1733_v32 = vld [vmem:[#allocation3 + $0x88] sm:$0xff] }
 0x199   : > { %1291 = vst.msk [vmem:[#allocation3 + $0x90] sm:$0xff] %vm231_vm0, %v1232_v63  ;;  %v6268_v13 = vpop.f32.mrf.mxu1  ;;  %4732 = vmatmul.msk.f32.gmra.mxu3 %vm231_vm0, %v1841_v41  ;;  %3256 = vmatpush.msrb.mxu2 %v3032_v6  ;;  %v1845_v43 = vld [vmem:[#allocation2 + $0x158] sm:$0xff] }
 0x19b   : > { %v1555_v44 = vpop.f32.mrf.mxu2  ;;  %3257 = vmatpush.msrb.mxu2 %v3031_v17 }
 0x19c   : > { %v1669_v25 = vadd.f32 %v6020_v61, %v1555_v44  ;;  %2048 = vmatmul.f32.gmra.mxu1 %v5974_v59  ;;  %v6279_v55 = vpop.f32.mrf.mxu3  ;;  %v1843_v59 = vld [vmem:[#allocation2 + $0x148] sm:$0xff]  ;;  %3258 = vmatmul.f32.vlgmr.msrb.gmra.mxu2 %v6293_v46 }
 0x19d   : > { %v1121_v57 = vpop.f32.mrf.mxu0 }
 0x19e   : > { %v1764_v14 = vadd.f32 %v1732_v27, %v1669_v25  ;;  %v1235_v9 = vadd.f32 %v6048_v18, %v1121_v57  ;;  %v2213_v57 = vld [vmem:[#allocation3] sm:$0xff] }
 0x1a0   : > { %1796 = vst.msk [vmem:[#allocation3 + $0x80] sm:$0xff] %vm231_vm0, %v1764_v14  ;;  %v1734_v44 = vld [vmem:[#allocation3 + $0x90] sm:$0xff]  ;;  %v1847_v14 = vld [vmem:[#allocation2 + $0x168] sm:$0xff] }
 0x1a1   : > { %1292 = vst.msk [vmem:[#allocation3 + $0x98] sm:$0xff] %vm231_vm0, %v1235_v9  ;;  %v2004_v61 = vpop.f32.mrf.mxu1  ;;  %4733 = vmatmul.msk.f32.gmra.mxu3 %vm231_vm0, %v1843_v59 }
 0x1a3   : > { %v1558_v16 = vpop.f32.mrf.mxu2 }
 0x1a4   : > { %v1672_v18 = vadd.f32 %v6040_v22, %v1558_v16  ;;  %2051 = vmatmul.f32.gmra.mxu1 %v5994_v23  ;;  %v6296_v11 = vpop.f32.mrf.mxu3  ;;  %v3020_v22 = vld [vmem:[%s7577_s3 + $0x28] sm:$0xff]  ;;  %3261 = vmatmul.f32.gmra.mxu2 %v6293_v46 }
 0x1a5   : > { %v1124_v38 = vpop.f32.mrf.mxu0  ;;  %3139 = vmatpush.msrb.mxu0 %v3020_v22 }
 0x1a6   : > { %v1765_v37 = vadd.f32 %v1733_v32, %v1672_v18  ;;  %v1238_v31 = vadd.f32 %v6072_v10, %v1124_v38  ;;  %v6319_v32 = vld [vmem:[%s7576_s2] ss:$0 sm:$0xff]  ;;  %v2214_v38 = vld [vmem:[#allocation3 + $0x8] sm:$0xff] }
 0x1a8   : > { %1797 = vst.msk [vmem:[#allocation3 + $0x88] sm:$0xff] %vm231_vm0, %v1765_v37  ;;  %v1735_v59 = vld [vmem:[#allocation3 + $0x98] sm:$0xff]  ;;  %v1849_v37 = vld [vmem:[#allocation2 + $0x178] sm:$0xff] }
 0x1a9   : > { %1293 = vst.msk [vmem:[#allocation3 + $0xa0] sm:$0xff] %vm231_vm0, %v1238_v31  ;;  %v2007_v63 = vpop.f32.mrf.mxu1  ;;  %4734 = vmatmul.msk.f32.gmra.mxu3 %vm231_vm0, %v1845_v43 }
 0x1ab   : > { %v1561_v23 = vpop.f32.mrf.mxu2 }
 0x1ac   : > { %v1675_v41 = vadd.f32 %v6060_v1, %v1561_v23  ;;  %2054 = vmatmul.f32.gmra.mxu1 %v6018_v4  ;;  %v2117_v25 = vpop.f32.mrf.mxu3 }
 0x1ad   : > { %v1127_v10 = vpop.f32.mrf.mxu0  ;;  %v2118_v27 = vadd.f32 %v2117_v25, %v2004_v61 }
 0x1ae   : > { %v1766_v49 = vadd.f32 %v1734_v44, %v1675_v41  ;;  %v1241_v35 = vadd.f32 %v6092_v51, %v1127_v10 }
 0x1af   : > { %v2245_v9 = vadd.f32 %v2213_v57, %v2118_v27 }
 0x1b0   : > { %1798 = vst.msk [vmem:[#allocation3 + $0x90] sm:$0xff] %vm231_vm0, %v1766_v49  ;;  %v1736_v22 = vld [vmem:[#allocation3 + $0xa0] sm:$0xff] }
 0x1b1   : > { %1294 = vst.msk [vmem:[#allocation3 + $0xa8] sm:$0xff] %vm231_vm0, %v1241_v35  ;;  %v2010_v1 = vpop.f32.mrf.mxu1  ;;  %4735 = vmatmul.msk.f32.gmra.mxu3 %vm231_vm0, %v1847_v14  ;;  %v2215_v14 = vld [vmem:[#allocation3 + $0x10] sm:$0xff] }
 0x1b2   : > { %2277 = vst.msk [vmem:[#allocation3] sm:$0xff] %vm231_vm0, %v2245_v9 }
 0x1b3   : > { %v1564_v4 = vpop.f32.mrf.mxu2 }
 0x1b4   : > { %v1678_v6 = vadd.f32 %v6084_v26, %v1564_v4  ;;  %2057 = vmatmul.f32.gmra.mxu1 %v6038_v40  ;;  %v2120_v17 = vpop.f32.mrf.mxu3 }
 0x1b5   : > { %v1130_v51 = vpop.f32.mrf.mxu0  ;;  %v2121_v18 = vadd.f32 %v2120_v17, %v2007_v63  ;;  %v3019_v63 = vld [vmem:[%s7577_s3 + $0x20] sm:$0xff] }
 0x1b6   : > { %v1767_v61 = vadd.f32 %v1735_v59, %v1678_v6  ;;  %v1244_v16 = vadd.f32 %v6113_v8, %v1130_v51  ;;  %3140 = vmatpush.msrb.mxu0 %v3019_v63  ;;  %v1853_v63 = vld [vmem:[#allocation2 + $0x198] sm:$0xff] }
 0x1b7   : > { %v2246_v31 = vadd.f32 %v2214_v38, %v2121_v18 }
 0x1b8   : > { %1799 = vst.msk [vmem:[#allocation3 + $0x98] sm:$0xff] %vm231_vm0, %v1767_v61 }
 0x1b9   : > { %1295 = vst.msk [vmem:[#allocation3 + $0xb0] sm:$0xff] %vm231_vm0, %v1244_v16  ;;  %v2013_v40 = vpop.f32.mrf.mxu1  ;;  %v2309_v26 = vld [vmem:[#allocation3] sm:$0xff]  ;;  %4736 = vmatmul.msk.f32.gmra.mxu3 %vm231_vm0, %v1849_v37 }
 0x1ba   : > { %2278 = vst.msk [vmem:[#allocation3 + $0x8] sm:$0xff] %vm231_vm0, %v2246_v31  ;;  %v2345_v43 = vadd.f32 %v6319_v32, %v2309_v26 }
 0x1bb   : > { %v1567_v8 = vpop.f32.mrf.mxu2 }
 0x1bc   : > { %v1681_v23 = vadd.f32 %v6105_v52, %v1567_v8  ;;  %2060 = vmatmul.f32.gmra.mxu1 %v6058_v60  ;;  %v2377_v41 = vmax.f32 %v2345_v43, 0.0  ;;  %v2123_v49 = vpop.f32.mrf.mxu3  ;;  %v1851_v60 = vld [vmem:[#allocation2 + $0x188] sm:$0xff] }
 0x1bd   : > { %v1133_v44 = vpop.f32.mrf.mxu0  ;;  %v2124_v25 = vadd.f32 %v2123_v49, %v2010_v1  ;;  %v2216_v43 = vld [vmem:[#allocation3 + $0x18] sm:$0xff] }
 0x1be   : > { %v1768_v10 = vadd.f32 %v1736_v22, %v1681_v23  ;;  %2634 = vrot.lane.b32.xlu2 %v2377_v41, %s5064_s12  ;;  %v2473_v35 = vrot.slane %v2377_v41, 7  ;;  %v2762_v57 = vsel %vm228_vm2, %v2377_v41, 0.0  ;;  %v1247_v52 = vadd.f32 %v6133_v7, %v1133_v44  ;;  %v1737_v7 = vld [vmem:[#allocation3 + $0xa8] sm:$0xff] }
 0x1bf   : > { %v2826_v9 = vrot.slane %v2762_v57, 1  ;;  %v2247_v4 = vadd.f32 %v2215_v14, %v2124_v25 }
 0x1c0   : > { %1800 = vst.msk [vmem:[#allocation3 + $0xa0] sm:$0xff] %vm231_vm0, %v1768_v10  ;;  %v3018_v10 = vld [vmem:[%s7577_s3 + $0x18] sm:$0xff]  ;;  %v1738_v25 = vld [vmem:[#allocation3 + $0xb0] sm:$0xff] }
 0x1c1   : > { %2569 = vst.msk [vmem:[#allocation2 + $0x30] sm:$0xfe] %vm476_vm5, %v2473_v35  ;;  %v2016_v6 = vpop.f32.mrf.mxu1  ;;  %v2310_v59 = vld [vmem:[#allocation3 + $0x8] sm:$0xff]  ;;  %4737 = vmatmul.msk.f32.gmra.mxu3 %vm231_vm0, %v1851_v60  ;;  %3141 = vmatpush.msrb.mxu0 %v3018_v10 }
 0x1c2   : > { %2279 = vst.msk [vmem:[#allocation3 + $0x10] sm:$0xff] %vm231_vm0, %v2247_v4  ;;  %v2346_v51 = vadd.f32 %v6319_v32, %v2310_v59 }
 0x1c3   : > { %v1570_v1 = vpop.f32.mrf.mxu2  ;;  %1296 = vst.msk [vmem:[#allocation3 + $0xb8] sm:$0xff] %vm231_vm0, %v1247_v52 }
 0x1c4   : > { %v1684_v61 = vadd.f32 %v6125_v30, %v1570_v1  ;;  %2063 = vmatmul.f32.gmra.mxu1 %v6082_v15  ;;  %v2378_v17 = vmax.f32 %v2346_v51, 0.0  ;;  %v2126_v38 = vpop.f32.mrf.mxu3  ;;  %v1855_v1 = vld [vmem:[#allocation2 + $0x1a8] sm:$0xff] }
 0x1c5   : > { %v1136_v16 = vpop.f32.mrf.mxu0  ;;  %v2127_v31 = vadd.f32 %v2126_v38, %v2013_v40 }
 0x1c6   : > { %v1769_v18 = vadd.f32 %v1737_v7, %v1684_v61  ;;  %v1250_v37 = vadd.f32 %v6154_v45, %v1136_v16  ;;  %2636 = vrot.lane.b32.xlu0 %v2378_v17, %s5064_s12  ;;  %v2410_v26 = vsel %vm227_vm6, %v2378_v17, 0.0  ;;  %v2827_v8 = vrot.slane %v2378_v17, 1 }
 0x1c7   : > { %v2474_v30 = vrot.slane %v2410_v26, 7  ;;  %v2248_v15 = vadd.f32 %v2216_v43, %v2127_v31 }
 0x1c8   : > { %1801 = vst.msk [vmem:[#allocation3 + $0xa8] sm:$0xff] %vm231_vm0, %v1769_v18  ;;  %v2828_v23 = vsel %vm739_vm3, %v2826_v9, %v2827_v8 }
 0x1c9   : > { %1297 = vst.msk [vmem:[#allocation3 + $0xc0] sm:$0xff] %vm231_vm0, %v1250_v37  ;;  %v2019_v22 = vpop.f32.mrf.mxu1  ;;  %v2311_v45 = vld [vmem:[#allocation3 + $0x10] sm:$0xff]  ;;  %v2475_v40 = vsel %vm379_vm7, %v2473_v35, %v2474_v30  ;;  %4738 = vmatmul.msk.f32.gmra.mxu3 %vm231_vm0, %v1853_v63 }
 0x1ca   : > { %2923 = vst.msk [vmem:[#allocation2 + $0x38] sm:$0xff] %vm231_vm0, %v2828_v23  ;;  %v2347_v44 = vadd.f32 %v6319_v32, %v2311_v45  ;;  %v1739_v37 = vld [vmem:[#allocation3 + $0xb8] sm:$0xff]  ;;  %v2218_v45 = vld [vmem:[#allocation3 + $0x28] sm:$0xff] }
 0x1cb   : > { %2280 = vst.msk [vmem:[#allocation3 + $0x18] sm:$0xff] %vm231_vm0, %v2248_v15  ;;  %v1573_v41 = vpop.f32.mrf.mxu2 }
 0x1cc   : > { %v1687_v49 = vadd.f32 %v6146_v53, %v1573_v41  ;;  %2066 = vmatmul.f32.gmra.mxu1 %v6103_v33  ;;  %2570 = vst.msk [vmem:[#allocation2 + $0x40] sm:$0xff] %vm231_vm0, %v2475_v40  ;;  %v2379_v35 = vmax.f32 %v2347_v44, 0.0  ;;  %v2129_v9 = vpop.f32.mrf.mxu3  ;;  %v2217_v33 = vld [vmem:[#allocation3 + $0x20] sm:$0xff]  ;;  %v1857_v40 = vld [vmem:[#allocation2 + $0x1b8] sm:$0xff] }
 0x1cd   : > { %v1139_v57 = vpop.f32.mrf.mxu0  ;;  %v2130_v60 = vadd.f32 %v2129_v9, %v2016_v6 }
 0x1ce   : > { %v1770_v14 = vadd.f32 %v1738_v25, %v1687_v49  ;;  %v1253_v52 = vadd.f32 %v6176_v54, %v1139_v57  ;;  %2638 = vrot.lane.b32.xlu1 %v2379_v35, %s5064_s12  ;;  %v2476_v4 = vrot.slane %v2379_v35, 7  ;;  %v2764_v59 = vsel %vm228_vm2, %v2379_v35, 0.0  ;;  %v3017_v35 = vld [vmem:[%s7577_s3 + $0x10] sm:$0xff] }
 0x1cf   : > { %v2829_v53 = vrot.slane %v2764_v59, 1  ;;  %v2249_v51 = vadd.f32 %v2217_v33, %v2130_v60  ;;  %3142 = vmatpush.msrb.mxu0 %v3017_v35 }
 0x1d0   : > { %1802 = vst.msk [vmem:[#allocation3 + $0xb0] sm:$0xff] %vm231_vm0, %v1770_v14  ;;  %v2477_v54 = vsel %vm379_vm7, %v2474_v30, %v2476_v4  ;;  %v1740_v14 = vld [vmem:[#allocation3 + $0xc0] sm:$0xff] }
 0x1d1   : > { %1298 = vst.msk [vmem:[#allocation3 + $0xc8] sm:$0xff] %vm231_vm0, %v1253_v52  ;;  %v6367_v61 = vld [vmem:[#allocation2 + $0x38] sm:$0xff]  ;;  %v2022_v7 = vpop.f32.mrf.mxu1  ;;  %v2830_v6 = vsel %vm739_vm3, %v2827_v8, %v2829_v53  ;;  %4739 = vmatmul.msk.f32.gmra.mxu3 %vm231_vm0, %v1855_v1 }
 0x1d2   : > { %4748 = vmatmul.msk.f32.gmra.mxu2 %vm231_vm0, %v6367_v61  ;;  %v2312_v17 = vld [vmem:[#allocation3 + $0x18] sm:$0xff]  ;;  %2571 = vst.msk [vmem:[#allocation2 + $0x50] sm:$0xff] %vm231_vm0, %v2477_v54 }
 0x1d3   : > { %2281 = vst.msk [vmem:[#allocation3 + $0x20] sm:$0xff] %vm231_vm0, %v2249_v51  ;;  %v1576_v16 = vpop.f32.mrf.mxu2  ;;  %v2348_v18 = vadd.f32 %v6319_v32, %v2312_v17  ;;  %v1859_v51 = vld [vmem:[#allocation2 + $0x1c8] sm:$0xff] }
 0x1d4   : > { %2924 = vst.msk [vmem:[#allocation2 + $0x48] sm:$0xff] %vm231_vm0, %v2830_v6  ;;  %v1690_v38 = vadd.f32 %v6166_v34, %v1576_v16  ;;  %2069 = vmatmul.f32.gmra.mxu1 %v6120_v19  ;;  %v2132_v43 = vpop.f32.mrf.mxu3 }
 0x1d5   : > { %v2380_v31 = vmax.f32 %v2348_v18, 0.0  ;;  %v1142_v26 = vpop.f32.mrf.mxu0  ;;  %v2133_v63 = vadd.f32 %v2132_v43, %v2019_v22 }
 0x1d6   : > { %v1771_v8 = vadd.f32 %v1739_v37, %v1690_v38  ;;  %v1256_v30 = vadd.f32 %v6195_v39, %v1142_v26 }
 0x1d7   : > { %2640 = vrot.lane.b32.xlu2 %v2380_v31, %s5064_s12  ;;  %v2412_v15 = vsel %vm227_vm6, %v2380_v31, 0.0  ;;  %v2831_v23 = vrot.slane %v2380_v31, 1  ;;  %v2250_v19 = vadd.f32 %v2218_v45, %v2133_v63 }
 0x1d8   : > { %1803 = vst.msk [vmem:[#allocation3 + $0xb8] sm:$0xff] %vm231_vm0, %v1771_v8  ;;  %v2478_v34 = vrot.slane %v2412_v15, 7  ;;  %v1741_v31 = vld [vmem:[#allocation3 + $0xc8] sm:$0xff] }
 0x1d9   : > { %v2832_v41 = vsel %vm739_vm3, %v2829_v53, %v2831_v23  ;;  %1299 = vst.msk [vmem:[#allocation3 + $0xd0] sm:$0xff] %vm231_vm0, %v1256_v30  ;;  %v2025_v44 = vpop.f32.mrf.mxu1  ;;  %4740 = vmatmul.msk.f32.gmra.mxu3 %vm231_vm0, %v1857_v40  ;;  %v1861_v40 = vld [vmem:[#allocation2 + $0x1d8] sm:$0xff] }
 0x1da   : > { %2925 = vst.msk [vmem:[#allocation2 + $0x58] sm:$0xff] %vm231_vm0, %v2832_v41  ;;  %v2313_v39 = vld [vmem:[#allocation3 + $0x20] sm:$0xff]  ;;  %v2479_v22 = vsel %vm379_vm7, %v2476_v4, %v2478_v34 }
 0x1db   : > { %2282 = vst.msk [vmem:[#allocation3 + $0x28] sm:$0xff] %vm231_vm0, %v2250_v19  ;;  %v6391_v10 = vld [vmem:[#allocation2 + $0x48] sm:$0xff]  ;;  %v1579_v49 = vpop.f32.mrf.mxu2  ;;  %v2349_v25 = vadd.f32 %v6319_v32, %v2313_v39  ;;  %v4792_v39 = vld [vmem:[%s7577_s3 + $0x130] sm:$0xff] }
 0x1dc   : > { %4749 = vmatmul.msk.f32.gmra.mxu2 %vm231_vm0, %v6391_v10  ;;  %v1693_v57 = vadd.f32 %v6188_v28, %v1579_v49  ;;  %2072 = vmatmul.f32.gmra.mxu1 %v6144_v20  ;;  %2572 = vst.msk [vmem:[#allocation2 + $0x60] sm:$0xff] %vm231_vm0, %v2479_v22  ;;  %v2135_v4 = vpop.f32.mrf.mxu3  ;;  %v2219_v20 = vld [vmem:[#allocation3 + $0x30] sm:$0xff] }
 0x1dd   : > { %v2381_v9 = vmax.f32 %v2349_v25, 0.0  ;;  %v1145_v52 = vpop.f32.mrf.mxu0  ;;  %v2136_v33 = vadd.f32 %v2135_v4, %v2022_v7 }
 0x1de   : > { %v1772_v60 = vadd.f32 %v1740_v14, %v1693_v57  ;;  %v1259_v59 = vadd.f32 %v6209_v3, %v1145_v52  ;;  %v3016_v57 = vld [vmem:[%s7577_s3 + $0x8] sm:$0xff] }
 0x1df   : > { %2642 = vrot.lane.b32.xlu0 %v2381_v9, %s5064_s12  ;;  %v2480_v53 = vrot.slane %v2381_v9, 7  ;;  %v2766_v1 = vsel %vm228_vm2, %v2381_v9, 0.0  ;;  %v2251_v54 = vadd.f32 %v2219_v20, %v2136_v33  ;;  %v4791_v9 = vld [vmem:[%s7577_s3 + $0x128] sm:$0xff]  ;;  %3143 = vmatpush.msrb.mxu0 %v3016_v57  ;;  %v4784_v57 = vld [vmem:[%s7577_s3 + $0xf0] sm:$0xff] }
 0x1e0   : > { %1804 = vst.msk [vmem:[#allocation3 + $0xc0] sm:$0xff] %vm231_vm0, %v1772_v60  ;;  %v2833_v28 = vrot.slane %v2766_v1, 1  ;;  %v1742_v52 = vld [vmem:[#allocation3 + $0xd0] sm:$0xff] }
 0x1e1   : > { %1300 = vst.msk [vmem:[#allocation3 + $0xd8] sm:$0xff] %vm231_vm0, %v1259_v59  ;;  %v2028_v6 = vpop.f32.mrf.mxu1  ;;  %v6408_v17 = vld [vmem:[#allocation2 + $0x58] sm:$0xff]  ;;  %v2481_v3 = vsel %vm379_vm7, %v2478_v34, %v2480_v53  ;;  %4741 = vmatmul.msk.f32.gmra.mxu3 %vm231_vm0, %v1859_v51  ;;  %v2220_v34 = vld [vmem:[#allocation3 + $0x38] sm:$0xff] }
 0x1e2   : > { %v2834_v7 = vsel %vm739_vm3, %v2831_v23, %v2833_v28  ;;  %v2314_v16 = vld [vmem:[#allocation3 + $0x28] sm:$0xff]  ;;  %2573 = vst.msk [vmem:[#allocation2 + $0x70] sm:$0xff] %vm231_vm0, %v2481_v3 }
 0x1e3   : > { %2283 = vst.msk [vmem:[#allocation3 + $0x30] sm:$0xff] %vm231_vm0, %v2251_v54  ;;  %v1582_v18 = vpop.f32.mrf.mxu2  ;;  %v2350_v38 = vadd.f32 %v6319_v32, %v2314_v16  ;;  %v4789_v54 = vld [vmem:[%s7577_s3 + $0x118] sm:$0xff] }
 0x1e4   : > { %2926 = vst.msk [vmem:[#allocation2 + $0x68] sm:$0xff] %vm231_vm0, %v2834_v7  ;;  %4750 = vmatmul.msk.f32.gmra.mxu2 %vm231_vm0, %v6408_v17  ;;  %v1696_v37 = vadd.f32 %v6202_v42, %v1582_v18  ;;  %2075 = vmatmul.f32.gmra.mxu1 %v6164_v2  ;;  %v2138_v30 = vpop.f32.mrf.mxu3  ;;  %v4793_v2 = vld [vmem:[%s7577_s3 + $0x138] sm:$0xff] }
 0x1e5   : > { %v2382_v26 = vmax.f32 %v2350_v38, 0.0  ;;  %v1148_v8 = vpop.f32.mrf.mxu0  ;;  %v2139_v15 = vadd.f32 %v2138_v30, %v2025_v44  ;;  %3572 = vmatpush.msra.mxu1 %v4793_v2  ;;  %v4801_v30 = vld [vmem:[%s7577_s3 + $0x178] sm:$0xff] }
 0x1e6   : > { %v1773_v43 = vadd.f32 %v1741_v31, %v1696_v37  ;;  %v1262_v63 = vadd.f32 %v6226_v50, %v1148_v8  ;;  %v3015_v37 = vld [vmem:[%s7577_s3] sm:$0xff]  ;;  %v4788_v31 = vld [vmem:[%s7577_s3 + $0x110] sm:$0xff]  ;;  %3693 = vmatpush.msra.mxu3 %v4801_v30 }
 0x1e7   : > { %2644 = vrot.lane.b32.xlu1 %v2382_v26, %s5064_s12  ;;  %v2414_v23 = vsel %vm227_vm6, %v2382_v26, 0.0  ;;  %v2835_v45 = vrot.slane %v2382_v26, 1  ;;  %v2252_v19 = vadd.f32 %v2220_v34, %v2139_v15  ;;  %3573 = vmatpush.msra.mxu1 %v4792_v39  ;;  %v4785_v39 = vld [vmem:[%s7577_s3 + $0xf8] sm:$0xff] }
 0x1e8   : > { %1805 = vst.msk [vmem:[#allocation3 + $0xc8] sm:$0xff] %vm231_vm0, %v1773_v43  ;;  %v2482_v42 = vrot.slane %v2414_v23, 7  ;;  %3144 = vmatpush.msrb.mxu0 %v3015_v37  ;;  %v1743_v15 = vld [vmem:[#allocation3 + $0xd8] sm:$0xff] }
 0x1e9   : > { %v2836_v41 = vsel %vm739_vm3, %v2833_v28, %v2835_v45  ;;  %1301 = vst.msk [vmem:[#allocation3 + $0xe0] sm:$0xff] %vm231_vm0, %v1262_v63  ;;  %v6431_v50 = vpop.f32.mrf.mxu1  ;;  %4742 = vmatmul.msk.f32.gmra.mxu3 %vm231_vm0, %v1861_v40  ;;  %3574 = vmatpush.msra.mxu1 %v4791_v9  ;;  %v2221_v28 = vld [vmem:[#allocation3 + $0x40] sm:$0xff]  ;;  %v4787_v63 = vld [vmem:[%s7577_s3 + $0x108] sm:$0xff] }
 0x1ea   : > { %2927 = vst.msk [vmem:[#allocation2 + $0x78] sm:$0xff] %vm231_vm0, %v2836_v41  ;;  %v2315_v44 = vld [vmem:[#allocation3 + $0x30] sm:$0xff]  ;;  %v2483_v22 = vsel %vm379_vm7, %v2480_v53, %v2482_v42  ;;  %3145 = vmatmul.f32.vlgmr.msrb.gmra.mxu0 %v6293_v46  ;;  %v4799_v37 = vld [vmem:[%s7577_s3 + $0x168] sm:$0xff] }
 0x1eb   : > { %2284 = vst.msk [vmem:[#allocation3 + $0x38] sm:$0xff] %vm231_vm0, %v2252_v19  ;;  %v6440_v49 = vld [vmem:[#allocation2 + $0x68] sm:$0xff]  ;;  %v1585_v25 = vpop.f32.mrf.mxu2  ;;  %v2351_v35 = vadd.f32 %v6319_v32, %v2315_v44  ;;  %v1865_v44 = vld [vmem:[#allocation2 + $0x1f8] sm:$0xff] }
 0x1ec   : > { %4751 = vmatmul.msk.f32.gmra.mxu2 %vm231_vm0, %v6440_v49  ;;  %v1699_v14 = vadd.f32 %v6219_v48, %v1585_v25  ;;  %2078 = vmatmul.f32.gmra.mxu1 %v6186_v58  ;;  %2574 = vst.msk [vmem:[#allocation2 + $0x80] sm:$0xff] %vm231_vm0, %v2483_v22  ;;  %v2141_v33 = vpop.f32.mrf.mxu3  ;;  %v4790_v58 = vld [vmem:[%s7577_s3 + $0x120] sm:$0xff] }
 0x1ed   : > { %v6454_v60 = vmax.f32 %v2351_v35, 0.0  ;;  %v1151_v4 = vpop.f32.mrf.mxu0  ;;  %v2142_v48 = vadd.f32 %v2141_v33, %v2028_v6  ;;  %3575 = vmatpush.msra.mxu1 %v4790_v58 }
 0x1ee   : > { %v1774_v59 = vadd.f32 %v1742_v52, %v1699_v14  ;;  %v1265_v53 = vadd.f32 %v6242_v0, %v1151_v4  ;;  %v1863_v0 = vld [vmem:[#allocation2 + $0x1e8] sm:$0xff] }
 0x1ef   : > { %2646 = vrot.lane.b32.xlu2 %v6454_v60, %s5064_s12  ;;  %v2484_v1 = vrot.slane %v6454_v60, 7  ;;  %v2768_v20 = vsel %vm228_vm2, %v6454_v60, 0.0  ;;  %v2253_v6 = vadd.f32 %v2221_v28, %v2142_v48  ;;  %3576 = vmatpush.msra.mxu1 %v4789_v54 }
 0x1f0   : > { %1806 = vst.msk [vmem:[#allocation3 + $0xd0] sm:$0xff] %vm231_vm0, %v1774_v59  ;;  %v2837_v51 = vrot.slane %v2768_v20, 1  ;;  %v4783_v59 = vld [vmem:[%s7577_s3 + $0xe8] sm:$0xff]  ;;  %v1744_v33 = vld [vmem:[#allocation3 + $0xe0] sm:$0xff] }
 0x1f1   : > { %1302 = vst.msk [vmem:[#allocation3 + $0xe8] sm:$0xff] %vm231_vm0, %v1265_v53  ;;  %v6471_v3 = vpop.f32.mrf.mxu1  ;;  %v6473_v7 = vld [vmem:[#allocation2 + $0x78] sm:$0xff]  ;;  %v2485_v16 = vsel %vm379_vm7, %v2482_v42, %v2484_v1  ;;  %4743 = vmatmul.msk.f32.gmra.mxu3 %vm231_vm0, %v1863_v0  ;;  %3577 = vmatpush.msra.mxu1 %v4788_v31  ;;  %v2223_v0 = vld [vmem:[#allocation3 + $0x50] sm:$0xff] }
 0x1f2   : > { %v2838_v18 = vsel %vm739_vm3, %v2835_v45, %v2837_v51  ;;  %v2316_v38 = vld [vmem:[#allocation3 + $0x38] sm:$0xff]  ;;  %2575 = vst.msk [vmem:[#allocation2 + $0x90] sm:$0xff] %vm231_vm0, %v2485_v16  ;;  %3148 = vmatmul.f32.gmra.mxu0 %v6293_v46 }
 0x1f3   : > { %2285 = vst.msk [vmem:[#allocation3 + $0x40] sm:$0xff] %vm231_vm0, %v2253_v6  ;;  %v1588_v26 = vpop.f32.mrf.mxu2  ;;  %v2352_v8 = vadd.f32 %v6319_v32, %v2316_v38  ;;  %3578 = vmatpush.msra.mxu1 %v4787_v63  ;;  %v1867_v6 = vld [vmem:[#allocation2 + $0x208] sm:$0xff] }
 0x1f4   : > { %2928 = vst.msk [vmem:[#allocation2 + $0x88] sm:$0xff] %vm231_vm0, %v2838_v18  ;;  %4752 = vmatmul.msk.f32.gmra.mxu2 %vm231_vm0, %v6473_v7  ;;  %v1702_v43 = vadd.f32 %v6236_v29, %v1588_v26  ;;  %2081 = vmatmul.f32.gmra.mxu1 %v6200_v47  ;;  %v2144_v42 = vpop.f32.mrf.mxu3  ;;  %v4786_v47 = vld [vmem:[%s7577_s3 + $0x100] sm:$0xff] }
 0x1f5   : > { %v6498_v23 = vmax.f32 %v2352_v8, 0.0  ;;  %v1154_v45 = vpop.f32.mrf.mxu0  ;;  %v2145_v40 = vadd.f32 %v2144_v42, %v6431_v50  ;;  %3579 = vmatpush.msra.mxu1 %v4786_v47  ;;  %v4797_v47 = vld [vmem:[%s7577_s3 + $0x158] sm:$0xff] }
 0x1f6   : > { %v1775_v34 = vadd.f32 %v1743_v15, %v1702_v43  ;;  %v1268_v29 = vadd.f32 %v6258_v56, %v1154_v45  ;;  %v2222_v56 = vld [vmem:[#allocation3 + $0x48] sm:$0xff]  ;;  %v4780_v43 = vld [vmem:[%s7577_s3 + $0xd0] sm:$0xff]  ;;  %v4798_v15 = vld [vmem:[%s7577_s3 + $0x160] sm:$0xff] }
 0x1f7   : > { %2648 = vrot.lane.b32.xlu0 %v6498_v23, %s5064_s12  ;;  %v2416_v2 = vsel %vm227_vm6, %v6498_v23, 0.0  ;;  %v2839_v19 = vrot.slane %v6498_v23, 1  ;;  %v2254_v50 = vadd.f32 %v2222_v56, %v2145_v40  ;;  %3580 = vmatpush.msra.mxu1 %v4785_v39  ;;  %v4779_v45 = vld [vmem:[%s7577_s3 + $0xc8] sm:$0xff] }
 0x1f8   : > { %1807 = vst.msk [vmem:[#allocation3 + $0xd8] sm:$0xff] %vm231_vm0, %v1775_v34  ;;  %v2486_v41 = vrot.slane %v2416_v2, 7  ;;  %v4857_v34 = vld [vmem:[%s7577_s3 + $0x238] sm:$0xff] }
 0x1f9   : > { %v2840_v22 = vsel %vm739_vm3, %v2837_v51, %v2839_v19  ;;  %1303 = vst.msk [vmem:[#allocation3 + $0xf0] sm:$0xff] %vm231_vm0, %v1268_v29  ;;  %v6518_v25 = vpop.f32.mrf.mxu1  ;;  %4744 = vmatmul.msk.f32.gmra.mxu3 %vm231_vm0, %v1865_v44  ;;  %3581 = vmatpush.msra.mxu1 %v4784_v57  ;;  %v1745_v42 = vld [vmem:[#allocation3 + $0xe8] sm:$0xff]  ;;  %v2224_v44 = vld [vmem:[#allocation3 + $0x58] sm:$0xff] }
 0x1fa   : > { %2929 = vst.msk [vmem:[#allocation2 + $0x98] sm:$0xff] %vm231_vm0, %v2840_v22  ;;  %v2317_v35 = vld [vmem:[#allocation3 + $0x40] sm:$0xff]  ;;  %v2487_v14 = vsel %vm379_vm7, %v2484_v1, %v2486_v41  ;;  %4190 = vmatpush.msra.mxu2 %v4857_v34 }
 0x1fb   : > { %2286 = vst.msk [vmem:[#allocation3 + $0x48] sm:$0xff] %vm231_vm0, %v2254_v50  ;;  %v6527_v9 = vld [vmem:[#allocation2 + $0x88] sm:$0xff]  ;;  %v1591_v52 = vpop.f32.mrf.mxu2  ;;  %v2353_v60 = vadd.f32 %v6319_v32, %v2317_v35  ;;  %3582 = vmatpush.msra.mxu1 %v4783_v59  ;;  %v1869_v50 = vld [vmem:[#allocation2 + $0x218] sm:$0xff] }
 0x1fc   : > { %4753 = vmatmul.msk.f32.gmra.mxu2 %vm231_vm0, %v6527_v9  ;;  %v1705_v4 = vadd.f32 %v6252_v5, %v1591_v52  ;;  %2084 = vmatmul.f32.gmra.mxu1 %v6217_v21  ;;  %2576 = vst.msk [vmem:[#allocation2 + $0xa0] sm:$0xff] %vm231_vm0, %v2487_v14  ;;  %v2147_v1 = vpop.f32.mrf.mxu3  ;;  %v4782_v21 = vld [vmem:[%s7577_s3 + $0xe0] sm:$0xff]  ;;  %v4795_v14 = vld [vmem:[%s7577_s3 + $0x148] sm:$0xff] }
 0x1fd   : > { %v6538_v53 = vmax.f32 %v2353_v60, 0.0  ;;  %v1157_v58 = vpop.f32.mrf.mxu0  ;;  %v2148_v5 = vadd.f32 %v2147_v1, %v6471_v3  ;;  %v4781_v3 = vld [vmem:[%s7577_s3 + $0xd8] sm:$0xff]  ;;  %3583 = vmatpush.msra.mxu1 %v4782_v21 }
 0x1fe   : > { %v1776_v48 = vadd.f32 %v1744_v33, %v1705_v4  ;;  %v1271_v20 = vadd.f32 %v6268_v13, %v1157_v58  ;;  %v4800_v13 = vld [vmem:[%s7577_s3 + $0x170] sm:$0xff]  ;;  %v4849_v33 = vld [vmem:[%s7577_s3 + $0x1f8] sm:$0xff]  ;;  %v4794_v58 = vld [vmem:[%s7577_s3 + $0x140] sm:$0xff] }
 0x1ff   : > { %2650 = vrot.lane.b32.xlu1 %v6538_v53, %s5064_s12  ;;  %v2488_v28 = vrot.slane %v6538_v53, 7  ;;  %v2770_v51 = vsel %vm228_vm2, %v6538_v53, 0.0  ;;  %3694 = vmatpush.msra.mxu3 %v4800_v13  ;;  %v2255_v16 = vadd.f32 %v2223_v0, %v2148_v5  ;;  %v1871_v13 = vld [vmem:[#allocation2 + $0x228] sm:$0xff] }
 0x200   : > { %1808 = vst.msk [vmem:[#allocation3 + $0xe0] sm:$0xff] %vm231_vm0, %v1776_v48  ;;  %v2841_v54 = vrot.slane %v2770_v51, 1  ;;  %3584 = vmatpush.msra.mxu1 %v4781_v3  ;;  %v1746_v48 = vld [vmem:[#allocation3 + $0xf0] sm:$0xff]  ;;  %4069 = vmatpush.msra.mxu0 %v4849_v33 }
 0x201   : > { %1304 = vst.msk [vmem:[#allocation3 + $0xf8] sm:$0xff] %vm231_vm0, %v1271_v20  ;;  %v6560_v18 = vpop.f32.mrf.mxu1  ;;  %v6562_v38 = vld [vmem:[#allocation2 + $0x98] sm:$0xff]  ;;  %v2489_v31 = vsel %vm379_vm7, %v2486_v41, %v2488_v28  ;;  %3695 = vmatpush.msra.mxu3 %v4799_v37  ;;  %v4796_v41 = vld [vmem:[%s7577_s3 + $0x150] sm:$0xff] }
 0x202   : > { %v2842_v26 = vsel %vm739_vm3, %v2839_v19, %v2841_v54  ;;  %v2318_v8 = vld [vmem:[#allocation3 + $0x48] sm:$0xff]  ;;  %2577 = vst.msk [vmem:[#allocation2 + $0xb0] sm:$0xff] %vm231_vm0, %v2489_v31  ;;  %4745 = vmatmul.msk.f32.gmra.mxu3 %vm231_vm0, %v1867_v6  ;;  %3585 = vmatpush.msra.mxu1 %v4780_v43 }
 0x203   : > { %2287 = vst.msk [vmem:[#allocation3 + $0x50] sm:$0xff] %vm231_vm0, %v2255_v16  ;;  %v1594_v30 = vpop.f32.mrf.mxu2  ;;  %v2354_v63 = vadd.f32 %v6319_v32, %v2318_v8  ;;  %3696 = vmatpush.msra.mxu3 %v4798_v15 }
 0x204   : > { %2930 = vst.msk [vmem:[#allocation2 + $0xa8] sm:$0xff] %vm231_vm0, %v2842_v26  ;;  %4754 = vmatmul.msk.f32.gmra.mxu2 %vm231_vm0, %v6562_v38  ;;  %v1708_v23 = vadd.f32 %v6263_v62, %v1594_v30  ;;  %2087 = vmatmul.f32.gmra.mxu1 %v6234_v24  ;;  %v2150_v62 = vpop.f32.mrf.mxu3  ;;  %v4778_v24 = vld [vmem:[%s7577_s3 + $0xc0] sm:$0xff] }
 0x205   : > { %v2386_v29 = vmax.f32 %v2354_v63, 0.0  ;;  %v2151_v2 = vadd.f32 %v2150_v62, %v6518_v25  ;;  %3586 = vmatpush.msra.mxu1 %v4779_v45  ;;  %3697 = vmatpush.msra.mxu3 %v4797_v47 }
 0x206   : > { %v1777_v40 = vadd.f32 %v1745_v42, %v1708_v23 }
 0x207   : > { %2652 = vrot.lane.b32.xlu2 %v2386_v29, %s5064_s12  ;;  %v2418_v19 = vsel %vm227_vm6, %v2386_v29, 0.0  ;;  %v2843_v56 = vrot.slane %v2386_v29, 1  ;;  %v2256_v22 = vadd.f32 %v2224_v44, %v2151_v2  ;;  %3587 = vmatpush.msra.mxu1 %v4778_v24 }
 0x208   : > { %1809 = vst.msk [vmem:[#allocation3 + $0xe8] sm:$0xff] %vm231_vm0, %v1777_v40  ;;  %v2490_v39 = vrot.slane %v2418_v19, 7  ;;  %3698 = vmatpush.msra.mxu3 %v4796_v41  ;;  %v1747_v8 = vld [vmem:[#allocation3 + $0xf8] sm:$0xff] }
 0x209   : > { %v2844_v25 = vsel %vm739_vm3, %v2841_v54, %v2843_v56  ;;  %v2043_v35 = vpop.f32.mrf.mxu1  ;;  %2288 = vst.msk [vmem:[#allocation3 + $0x58] sm:$0xff] %vm231_vm0, %v2256_v22  ;;  %4895 = vmatpush.msrb.mxu1 %v4849_v33 }
 0x20a   : > { %2931 = vst.msk [vmem:[#allocation2 + $0xb8] sm:$0xff] %vm231_vm0, %v2844_v25  ;;  %v2319_v57 = vld [vmem:[#allocation3 + $0x50] sm:$0xff]  ;;  %v2491_v52 = vsel %vm379_vm7, %v2488_v28, %v2490_v39  ;;  %4746 = vmatmul.msk.f32.gmra.mxu3 %vm231_vm0, %v1869_v50  ;;  %v2225_v28 = vld [vmem:[#allocation3 + $0x60] sm:$0xff] }
 0x20b   : > { %v6616_v60 = vld [vmem:[#allocation2 + $0xa8] sm:$0xff]  ;;  %v1597_v4 = vpop.f32.mrf.mxu2  ;;  %v2355_v59 = vadd.f32 %v6319_v32, %v2319_v57  ;;  %2578 = vst.msk [vmem:[#allocation2 + $0xc0] sm:$0xff] %vm231_vm0, %v2491_v52  ;;  %3699 = vmatpush.msra.mxu3 %v4795_v14  ;;  %v2227_v25 = vld [vmem:[#allocation3 + $0x70] sm:$0xff] }
 0x20c   : > { %4755 = vmatmul.msk.f32.gmra.mxu2 %vm231_vm0, %v6616_v60  ;;  %v1711_v53 = vadd.f32 %v6279_v55, %v1597_v4  ;;  %2090 = vmatmul.f32.gmra.mxu1 %v6250_v36  ;;  %v2153_v21 = vpop.f32.mrf.mxu3 }
 0x20d   : > { %v2387_v1 = vmax.f32 %v2355_v59, 0.0  ;;  %v2154_v5 = vadd.f32 %v2153_v21, %v6560_v18  ;;  %3700 = vmatpush.msra.mxu3 %v4794_v58 }
 0x20e   : > { %v1778_v20 = vadd.f32 %v1746_v48, %v1711_v53 }
 0x20f   : > { %2654 = vrot.lane.b32.xlu0 %v2387_v1, %s5064_s12  ;;  %v2492_v55 = vrot.slane %v2387_v1, 7  ;;  %v2772_v36 = vsel %vm228_vm2, %v2387_v1, 0.0  ;;  %4911 = vmatpush.msrb.mxu3 %v4857_v34  ;;  %v2257_v0 = vadd.f32 %v2225_v28, %v2154_v5  ;;  %v2226_v34 = vld [vmem:[#allocation3 + $0x68] sm:$0xff]  ;;  %v4856_v1 = vld [vmem:[%s7577_s3 + $0x230] sm:$0xff] }
 0x210   : > { %1810 = vst.msk [vmem:[#allocation3 + $0xf0] sm:$0xff] %vm231_vm0, %v1778_v20  ;;  %v2845_v51 = vrot.slane %v2772_v36, 1  ;;  %v2320_v18 = vld [vmem:[#allocation3 + $0x58] sm:$0xff]  ;;  %4191 = vmatpush.msra.mxu2 %v4856_v1 }
 0x211   : > { %v2046_v54 = vpop.f32.mrf.mxu1  ;;  %v6635_v6 = vld [vmem:[#allocation2 + $0xb8] sm:$0xff]  ;;  %v2493_v3 = vsel %vm379_vm7, %v2490_v39, %v2492_v55  ;;  %2289 = vst.msk [vmem:[#allocation3 + $0x60] sm:$0xff] %vm231_vm0, %v2257_v0  ;;  %v2356_v31 = vadd.f32 %v6319_v32, %v2320_v18  ;;  %4912 = vmatpush.msrb.mxu3 %v4856_v1  ;;  %v4847_v18 = vld [vmem:[%s7577_s3 + $0x1e8] sm:$0xff] }
 0x212   : > { %v2846_v16 = vsel %vm739_vm3, %v2843_v56, %v2845_v51  ;;  %2579 = vst.msk [vmem:[#allocation2 + $0xd0] sm:$0xff] %vm231_vm0, %v2493_v3  ;;  %4747 = vmatmul.msk.f32.gmra.mxu3 %vm231_vm0, %v1871_v13  ;;  %v4848_v56 = vld [vmem:[%s7577_s3 + $0x1f0] sm:$0xff] }
 0x213   : > { %v1600_v37 = vpop.f32.mrf.mxu2  ;;  %2932 = vst.msk [vmem:[#allocation2 + $0xc8] sm:$0xff] %vm231_vm0, %v2846_v16  ;;  %v2388_v43 = vmax.f32 %v2356_v31, 0.0  ;;  %4070 = vmatpush.msra.mxu0 %v4848_v56  ;;  %4896 = vmatpush.msrb.mxu1 %v4848_v56  ;;  %v2230_v56 = vld [vmem:[#allocation3 + $0x88] sm:$0xff] }
 0x214   : > { %4756 = vmatmul.msk.f32.gmra.mxu2 %vm231_vm0, %v6635_v6  ;;  %v1714_v26 = vadd.f32 %v6296_v11, %v1600_v37  ;;  %2093 = vmatmul.f32.gmra.mxu1 %v6293_v46  ;;  %v2156_v63 = vpop.f32.mrf.mxu3 }
 0x215   : > { %v2157_v15 = vadd.f32 %v2156_v63, %v2043_v35  ;;  %2656 = vrot.lane.b32.xlu1 %v2388_v43, %s5064_s12  ;;  %v2420_v23 = vsel %vm227_vm6, %v2388_v43, 0.0  ;;  %v2847_v45 = vrot.slane %v2388_v43, 1  ;;  %4071 = vmatpush.msra.mxu0 %v4847_v18  ;;  %v2229_v43 = vld [vmem:[#allocation3 + $0x80] sm:$0xff] }
 0x216   : > { %v1779_v30 = vadd.f32 %v1747_v8, %v1714_v26  ;;  %v2494_v42 = vrot.slane %v2420_v23, 7  ;;  %4897 = vmatpush.msrb.mxu1 %v4847_v18 }
 0x217   : > { %v2258_v29 = vadd.f32 %v2226_v34, %v2157_v15  ;;  %v2848_v11 = vsel %vm739_vm3, %v2845_v51, %v2847_v45 }
 0x218   : > { %1811 = vst.msk [vmem:[#allocation3 + $0xf8] sm:$0xff] %vm231_vm0, %v1779_v30  ;;  %v2635_v47 = vpop.permute.xlu2 %2634  ;;  %v2321_v62 = vld [vmem:[#allocation3 + $0x60] sm:$0xff]  ;;  %v2495_v24 = vsel %vm379_vm7, %v2492_v55, %v2494_v42  ;;  %v2228_v55 = vld [vmem:[#allocation3 + $0x78] sm:$0xff] }
 0x219   : > { %v2049_v40 = vpop.f32.mrf.mxu1  ;;  %2933 = vst.msk [vmem:[#allocation2 + $0xd8] sm:$0xff] %vm231_vm0, %v2848_v11  ;;  %v2357_v19 = vadd.f32 %v6319_v32, %v2321_v62 }
 0x21a   : > { %2290 = vst.msk [vmem:[#allocation3 + $0x68] sm:$0xff] %vm231_vm0, %v2258_v29  ;;  %2206 = vmatmul.f32.gmra.mxu3 %v6293_v46  ;;  %v6657_v2 = vld [vmem:[#allocation2 + $0xc8] sm:$0xff] }
 0x21b   : > { %2730 = vst.msk [vmem:[#allocation2 + $0x30] sm:$0xff] %vm638_vm8, %v2635_v47  ;;  %v2389_v41 = vmax.f32 %v2357_v19, 0.0 }
 0x21c   : > { %4757 = vmatmul.msk.f32.gmra.mxu2 %vm231_vm0, %v6657_v2  ;;  %2096 = vmatmul.f32.gmra.mxu1 %v6293_v46  ;;  %2580 = vst.msk [vmem:[#allocation2 + $0xe0] sm:$0xff] %vm231_vm0, %v2495_v24  ;;  %v2159_v44 = vpop.f32.mrf.mxu3 }
 0x21d   : > { %v2160_v39 = vadd.f32 %v2159_v44, %v2046_v54  ;;  %2658 = vrot.lane.b32.xlu2 %v2389_v41, %s5064_s12  ;;  %v2496_v50 = vrot.slane %v2389_v41, 7  ;;  %v2774_v22 = vsel %vm228_vm2, %v2389_v41, 0.0 }
 0x21e   : > { %v2849_v35 = vrot.slane %v2774_v22, 1 }
 0x21f   : > { %v2259_v57 = vadd.f32 %v2227_v25, %v2160_v39  ;;  %v2497_v4 = vsel %vm379_vm7, %v2494_v42, %v2496_v50  ;;  %v6746_v1 = vpop.f32.mrf.mxu2 }
 0x220   : > { %v6671_v52 = vld [vmem:[#allocation2 + $0xd8] sm:$0xff]  ;;  %v2850_v59 = vsel %vm739_vm3, %v2847_v45, %v2849_v35  ;;  %2581 = vst.msk [vmem:[#allocation2 + $0xf0] sm:$0xff] %vm231_vm0, %v2497_v4 }
 0x221   : > { %v2052_v14 = vpop.f32.mrf.mxu1  ;;  %v2322_v33 = vld [vmem:[#allocation3 + $0x68] sm:$0xff]  ;;  %2291 = vst.msk [vmem:[#allocation3 + $0x70] sm:$0xff] %vm231_vm0, %v2259_v57 }
 0x222   : > { %v2955_v53 = vld [vmem:[#allocation2 + $0x30] sm:$0xff]  ;;  %2209 = vmatmul.f32.gmra.mxu3 %v6293_v46  ;;  %v2358_v58 = vadd.f32 %v6319_v32, %v2322_v33  ;;  %2934 = vst.msk [vmem:[#allocation2 + $0xe8] sm:$0xff] %vm231_vm0, %v2850_v59 }
 0x223   : > { %3151 = vmatmul.f32.gmra.mxu0 %v2955_v53 }
 0x224   : > { %4758 = vmatmul.msk.f32.gmra.mxu2 %vm231_vm0, %v6671_v52  ;;  %3588 = vmatmul.f32.vlgmr.msra.gmra.mxu1 %v2955_v53  ;;  %v2390_v48 = vmax.f32 %v2358_v58, 0.0  ;;  %v2162_v20 = vpop.f32.mrf.mxu3  ;;  %v2231_v58 = vld [vmem:[#allocation3 + $0x90] sm:$0xff] }
 0x225   : > { %v2163_v21 = vadd.f32 %v2162_v20, %v2049_v40 }
 0x226   : > { %2660 = vrot.lane.b32.xlu0 %v2390_v48, %s5064_s12  ;;  %v2422_v46 = vsel %vm227_vm6, %v2390_v48, 0.0  ;;  %v2851_v5 = vrot.slane %v2390_v48, 1 }
 0x227   : > { %v2498_v36 = vrot.slane %v2422_v46, 7  ;;  %v2260_v28 = vadd.f32 %v2228_v55, %v2163_v21 }
 0x228   : > { %v2852_v51 = vsel %vm739_vm3, %v2849_v35, %v2851_v5  ;;  %v2323_v0 = vld [vmem:[#allocation3 + $0x70] sm:$0xff] }
 0x229   : > { %v2055_v13 = vpop.f32.mrf.mxu1  ;;  %2935 = vst.msk [vmem:[#allocation2 + $0xf8] sm:$0xff] %vm231_vm0, %v2852_v51  ;;  %v2499_v54 = vsel %vm379_vm7, %v2496_v50, %v2498_v36  ;;  %v6692_v3 = vld [vmem:[#allocation2 + $0xe8] sm:$0xff]  ;;  %v2359_v16 = vadd.f32 %v6319_v32, %v2323_v0  ;;  %v6733_v35 = vld [vmem:[%s7576_s2] ss:$0 sm:$0xff] }
 0x22a   : > { %2292 = vst.msk [vmem:[#allocation3 + $0x78] sm:$0xff] %vm231_vm0, %v2260_v28  ;;  %4802 = vmatmul.msk.f32.vlgmr.msra.gmra.mxu3 %vm231_vm0, %v6367_v61 }
 0x22b   : > { %2582 = vst.msk [vmem:[#allocation2 + $0x100] sm:$0xff] %vm231_vm0, %v2499_v54  ;;  %v2391_v37 = vmax.f32 %v2359_v16, 0.0  ;;  %v4855_v54 = vld [vmem:[%s7577_s3 + $0x228] sm:$0xff] }
 0x22c   : > { %4759 = vmatmul.msk.f32.gmra.mxu2 %vm231_vm0, %v6692_v3  ;;  %v2165_v31 = vpop.f32.mrf.mxu3  ;;  %4913 = vmatpush.msrb.mxu3 %v4855_v54 }
 0x22d   : > { %v2166_v26 = vadd.f32 %v2165_v31, %v2052_v14  ;;  %2662 = vrot.lane.b32.xlu1 %v2391_v37, %s5064_s12  ;;  %v2500_v8 = vrot.slane %v2391_v37, 7  ;;  %v2776_v61 = vsel %vm228_vm2, %v2391_v37, 0.0  ;;  %v4846_v14 = vld [vmem:[%s7577_s3 + $0x1e0] sm:$0xff]  ;;  %4192 = vmatpush.msra.mxu2 %v4855_v54  ;;  %v2232_v31 = vld [vmem:[#allocation3 + $0x98] sm:$0xff]  ;;  %v4844_v54 = vld [vmem:[%s7577_s3 + $0x1d0] sm:$0xff] }
 0x22e   : > { %v2853_v30 = vrot.slane %v2776_v61, 1  ;;  %4072 = vmatpush.msra.mxu0 %v4846_v14  ;;  %4898 = vmatpush.msrb.mxu1 %v4846_v14 }
 0x22f   : > { %v2261_v63 = vadd.f32 %v2229_v43, %v2166_v26  ;;  %v2501_v29 = vsel %vm379_vm7, %v2498_v36, %v2500_v8 }
 0x230   : > { %v6706_v45 = vld [vmem:[#allocation2 + $0xf8] sm:$0xff]  ;;  %v2854_v34 = vsel %vm739_vm3, %v2851_v5, %v2853_v30  ;;  %2583 = vst.msk [vmem:[#allocation2 + $0x110] sm:$0xff] %vm231_vm0, %v2501_v29 }
 0x231   : > { %v2641_v15 = vpop.permute.xlu2 %2640  ;;  %v2058_v23 = vpop.f32.mrf.mxu1  ;;  %v2324_v42 = vld [vmem:[#allocation3 + $0x78] sm:$0xff]  ;;  %2293 = vst.msk [vmem:[#allocation3 + $0x80] sm:$0xff] %vm231_vm0, %v2261_v63 }
 0x232   : > { %2733 = vst.msk [vmem:[#allocation2 + $0x60] sm:$0xff] %vm638_vm8, %v2641_v15  ;;  %4803 = vmatmul.msk.f32.gmra.mxu3 %vm231_vm0, %v6391_v10  ;;  %v2360_v11 = vadd.f32 %v6319_v32, %v2324_v42  ;;  %v6775_v42 = vpop.f32.mrf.mxu2 }
 0x233   : > { %2936 = vst.msk [vmem:[#allocation2 + $0x108] sm:$0xff] %vm231_vm0, %v2854_v34 }
 0x234   : > { %4760 = vmatmul.msk.f32.gmra.mxu2 %vm231_vm0, %v6706_v45  ;;  %v2392_v47 = vmax.f32 %v2360_v11, 0.0  ;;  %v2168_v40 = vpop.f32.mrf.mxu3  ;;  %v4845_v11 = vld [vmem:[%s7577_s3 + $0x1d8] sm:$0xff] }
 0x235   : > { %v2169_v62 = vadd.f32 %v2168_v40, %v2055_v13  ;;  %4073 = vmatpush.msra.mxu0 %v4845_v11  ;;  %4899 = vmatpush.msrb.mxu1 %v4845_v11 }
 0x236   : > { %2664 = vrot.lane.b32.xlu2 %v2392_v47, %s5064_s12  ;;  %v2424_v24 = vsel %vm227_vm6, %v2392_v47, 0.0  ;;  %v2855_v19 = vrot.slane %v2392_v47, 1 }
 0x237   : > { %v2502_v10 = vrot.slane %v2424_v24, 7  ;;  %v2262_v41 = vadd.f32 %v2230_v56, %v2169_v62  ;;  %4074 = vmatpush.msra.mxu0 %v4844_v54  ;;  %4900 = vmatpush.msrb.mxu1 %v4844_v54 }
 0x238   : > { %v2856_v32 = vsel %vm739_vm3, %v2853_v30, %v2855_v19  ;;  %v2637_v44 = vpop.permute.xlu0 %2636  ;;  %v2325_v50 = vld [vmem:[#allocation3 + $0x80] sm:$0xff] }
 0x239   : > { %v2061_v39 = vpop.f32.mrf.mxu1  ;;  %2937 = vst.msk [vmem:[#allocation2 + $0x118] sm:$0xff] %vm231_vm0, %v2856_v32  ;;  %v2503_v22 = vsel %vm379_vm7, %v2500_v8, %v2502_v10  ;;  %v2361_v57 = vadd.f32 %v6733_v35, %v2325_v50 }
 0x23a   : > { %2294 = vst.msk [vmem:[#allocation3 + $0x88] sm:$0xff] %vm231_vm0, %v2262_v41  ;;  %v6726_v25 = vld [vmem:[#allocation2 + $0x108] sm:$0xff]  ;;  %4804 = vmatmul.msk.f32.gmra.mxu3 %vm231_vm0, %v6408_v17 }
 0x23b   : > { %2731 = vst.msk [vmem:[#allocation2 + $0x40] sm:$0xff] %vm638_vm8, %v2637_v44  ;;  %v2393_v4 = vmax.f32 %v2361_v57, 0.0  ;;  %v2961_v57 = vld [vmem:[#allocation2 + $0x60] sm:$0xff] }
 0x23c   : > { %4761 = vmatmul.msk.f32.gmra.mxu2 %vm231_vm0, %v6726_v25  ;;  %2584 = vst.msk [vmem:[#allocation2 + $0x120] sm:$0xff] %vm231_vm0, %v2503_v22  ;;  %v2171_v17 = vpop.f32.mrf.mxu3 }
 0x23d   : > { %v2172_v59 = vadd.f32 %v2171_v17, %v2058_v23  ;;  %2666 = vrot.lane.b32.xlu0 %v2393_v4, %s5064_s12  ;;  %v2504_v33 = vrot.slane %v2393_v4, 7  ;;  %v2778_v53 = vsel %vm228_vm2, %v2393_v4, 0.0 }
 0x23e   : > { %v2857_v48 = vrot.slane %v2778_v53, 1 }
 0x23f   : > { %v2263_v20 = vadd.f32 %v2231_v58, %v2172_v59  ;;  %v2505_v28 = vsel %vm379_vm7, %v2502_v10, %v2504_v33  ;;  %v2234_v58 = vld [vmem:[#allocation3 + $0xa8] sm:$0xff] }
 0x240   : > { %v2639_v21 = vpop.permute.xlu1 %2638  ;;  %v2858_v5 = vsel %vm739_vm3, %v2855_v19, %v2857_v48  ;;  %v6750_v55 = vld [vmem:[#allocation2 + $0x118] sm:$0xff]  ;;  %2585 = vst.msk [vmem:[#allocation2 + $0x130] sm:$0xff] %vm231_vm0, %v2505_v28  ;;  %v2233_v19 = vld [vmem:[#allocation3 + $0xa0] sm:$0xff] }
 0x241   : > { %v2064_v46 = vpop.f32.mrf.mxu1  ;;  %2732 = vst.msk [vmem:[#allocation2 + $0x50] sm:$0xff] %vm638_vm8, %v2639_v21  ;;  %v2326_v36 = vld [vmem:[#allocation3 + $0x88] sm:$0xff] }
 0x242   : > { %2295 = vst.msk [vmem:[#allocation3 + $0x90] sm:$0xff] %vm231_vm0, %v2263_v20  ;;  %v2957_v51 = vld [vmem:[#allocation2 + $0x40] sm:$0xff]  ;;  %4805 = vmatmul.msk.f32.gmra.mxu3 %vm231_vm0, %v6440_v49  ;;  %v2362_v13 = vadd.f32 %v6733_v35, %v2326_v36 }
 0x243   : > { %2938 = vst.msk [vmem:[#allocation2 + $0x128] sm:$0xff] %vm231_vm0, %v2858_v5  ;;  %3154 = vmatmul.f32.gmra.mxu0 %v2957_v51  ;;  %3591 = vmatmul.f32.gmra.mxu1 %v2957_v51 }
 0x244   : > { %4762 = vmatmul.msk.f32.gmra.mxu2 %vm231_vm0, %v6750_v55  ;;  %v2394_v0 = vmax.f32 %v2362_v13, 0.0  ;;  %v2174_v16 = vpop.f32.mrf.mxu3 }
 0x245   : > { %v2175_v49 = vadd.f32 %v2174_v16, %v2061_v39 }
 0x246   : > { %2668 = vrot.lane.b32.xlu1 %v2394_v0, %s5064_s12  ;;  %v2426_v18 = vsel %vm227_vm6, %v2394_v0, 0.0  ;;  %v2859_v37 = vrot.slane %v2394_v0, 1 }
 0x247   : > { %v2506_v26 = vrot.slane %v2426_v18, 7  ;;  %v2264_v8 = vadd.f32 %v2232_v31, %v2175_v49 }
 0x248   : > { %v2860_v61 = vsel %vm739_vm3, %v2857_v48, %v2859_v37  ;;  %v2959_v30 = vld [vmem:[#allocation2 + $0x50] sm:$0xff] }
 0x249   : > { %v2647_v43 = vpop.permute.xlu2 %2646  ;;  %v2067_v63 = vpop.f32.mrf.mxu1  ;;  %2939 = vst.msk [vmem:[#allocation2 + $0x138] sm:$0xff] %vm231_vm0, %v2860_v61  ;;  %v2327_v15 = vld [vmem:[#allocation3 + $0x90] sm:$0xff]  ;;  %v2507_v23 = vsel %vm379_vm7, %v2504_v33, %v2506_v26 }
 0x24a   : > { %2296 = vst.msk [vmem:[#allocation3 + $0x98] sm:$0xff] %vm231_vm0, %v2264_v8  ;;  %v6771_v34 = vld [vmem:[#allocation2 + $0x128] sm:$0xff]  ;;  %4806 = vmatmul.msk.f32.gmra.mxu3 %vm231_vm0, %v6473_v7  ;;  %v2363_v29 = vadd.f32 %v6733_v35, %v2327_v15 }
 0x24b   : > { %2736 = vst.msk [vmem:[#allocation2 + $0x90] sm:$0xff] %vm638_vm8, %v2647_v43  ;;  %3157 = vmatmul.f32.gmra.mxu0 %v2959_v30  ;;  %3594 = vmatmul.f32.gmra.mxu1 %v2959_v30 }
 0x24c   : > { %4763 = vmatmul.msk.f32.gmra.mxu2 %vm231_vm0, %v6771_v34  ;;  %v2395_v47 = vmax.f32 %v2363_v29, 0.0  ;;  %2586 = vst.msk [vmem:[#allocation2 + $0x140] sm:$0xff] %vm231_vm0, %v2507_v23  ;;  %v2177_v7 = vpop.f32.mrf.mxu3 }
 0x24d   : > { %v2178_v40 = vadd.f32 %v2177_v7, %v2064_v46 }
 0x24e   : > { %2670 = vrot.lane.b32.xlu2 %v2395_v47, %s5064_s12  ;;  %v2508_v62 = vrot.slane %v2395_v47, 7  ;;  %v2780_v24 = vsel %vm228_vm2, %v2395_v47, 0.0 }
 0x24f   : > { %v2861_v56 = vrot.slane %v2780_v24, 1  ;;  %v2265_v10 = vadd.f32 %v2233_v19, %v2178_v40  ;;  %v4854_v40 = vld [vmem:[%s7577_s3 + $0x220] sm:$0xff] }
 0x250   : > { %v6790_v39 = vld [vmem:[#allocation2 + $0x138] sm:$0xff]  ;;  %v2509_v22 = vsel %vm379_vm7, %v2506_v26, %v2508_v62  ;;  %v2235_v26 = vld [vmem:[#allocation3 + $0xb0] sm:$0xff]  ;;  %4193 = vmatpush.msra.mxu2 %v4854_v40  ;;  %4914 = vmatpush.msrb.mxu3 %v4854_v40 }
 0x251   : > { %v2643_v41 = vpop.permute.xlu0 %2642  ;;  %v2070_v32 = vpop.f32.mrf.mxu1  ;;  %v2862_v44 = vsel %vm739_vm3, %v2859_v37, %v2861_v56  ;;  %v2328_v50 = vld [vmem:[#allocation3 + $0x98] sm:$0xff]  ;;  %2297 = vst.msk [vmem:[#allocation3 + $0xa0] sm:$0xff] %vm231_vm0, %v2265_v10 }
 0x252   : > { %2734 = vst.msk [vmem:[#allocation2 + $0x70] sm:$0xff] %vm638_vm8, %v2643_v41  ;;  %4807 = vmatmul.msk.f32.gmra.mxu3 %vm231_vm0, %v6527_v9  ;;  %v2364_v14 = vadd.f32 %v6733_v35, %v2328_v50  ;;  %v2236_v10 = vld [vmem:[#allocation3 + $0xb8] sm:$0xff] }
 0x253   : > { %2940 = vst.msk [vmem:[#allocation2 + $0x148] sm:$0xff] %vm231_vm0, %v2862_v44  ;;  %3160 = vmatmul.f32.gmra.mxu0 %v2961_v57  ;;  %3597 = vmatmul.f32.gmra.mxu1 %v2961_v57 }
 0x254   : > { %4764 = vmatmul.msk.f32.gmra.mxu2 %vm231_vm0, %v6790_v39  ;;  %v2396_v17 = vmax.f32 %v2364_v14, 0.0  ;;  %2587 = vst.msk [vmem:[#allocation2 + $0x150] sm:$0xff] %vm231_vm0, %v2509_v22  ;;  %v2180_v59 = vpop.f32.mrf.mxu3 }
 0x255   : > { %v6800_v4 = vpop.f32.mrf.mxu2  ;;  %v2181_v33 = vadd.f32 %v2180_v59, %v2067_v63 }
 0x256   : > { %2672 = vrot.lane.b32.xlu0 %v2396_v17, %s5064_s12  ;;  %v2428_v9 = vsel %vm227_vm6, %v2396_v17, 0.0  ;;  %v2863_v53 = vrot.slane %v2396_v17, 1  ;;  %v2967_v17 = vld [vmem:[#allocation2 + $0x90] sm:$0xff] }
 0x257   : > { %v2510_v48 = vrot.slane %v2428_v9, 7  ;;  %v2266_v20 = vadd.f32 %v2234_v58, %v2181_v33  ;;  %v4843_v9 = vld [vmem:[%s7577_s3 + $0x1c8] sm:$0xff] }
 0x258   : > { %v2864_v21 = vsel %vm739_vm3, %v2861_v56, %v2863_v53  ;;  %v2329_v28 = vld [vmem:[#allocation3 + $0xa0] sm:$0xff]  ;;  %4075 = vmatpush.msra.mxu0 %v4843_v9  ;;  %4901 = vmatpush.msrb.mxu1 %v4843_v9 }
 0x259   : > { %v2645_v46 = vpop.permute.xlu1 %2644  ;;  %v2963_v5 = vld [vmem:[#allocation2 + $0x70] sm:$0xff]  ;;  %v2073_v36 = vpop.f32.mrf.mxu1  ;;  %2941 = vst.msk [vmem:[#allocation2 + $0x158] sm:$0xff] %vm231_vm0, %v2864_v21  ;;  %v2511_v51 = vsel %vm379_vm7, %v2508_v62, %v2510_v48  ;;  %v2365_v0 = vadd.f32 %v6733_v35, %v2329_v28 }
 0x25a   : > { %2298 = vst.msk [vmem:[#allocation3 + $0xa8] sm:$0xff] %vm231_vm0, %v2266_v20  ;;  %v6810_v13 = vld [vmem:[#allocation2 + $0x148] sm:$0xff]  ;;  %4808 = vmatmul.msk.f32.gmra.mxu3 %vm231_vm0, %v6562_v38 }
 0x25b   : > { %2735 = vst.msk [vmem:[#allocation2 + $0x80] sm:$0xff] %vm638_vm8, %v2645_v46  ;;  %3163 = vmatmul.f32.gmra.mxu0 %v2963_v5  ;;  %3600 = vmatmul.f32.gmra.mxu1 %v2963_v5  ;;  %v2397_v16 = vmax.f32 %v2365_v0, 0.0  ;;  %v2237_v46 = vld [vmem:[#allocation3 + $0xc0] sm:$0xff] }
 0x25c   : > { %4765 = vmatmul.msk.f32.gmra.mxu2 %vm231_vm0, %v6810_v13  ;;  %2588 = vst.msk [vmem:[#allocation2 + $0x160] sm:$0xff] %vm231_vm0, %v2511_v51  ;;  %v2183_v49 = vpop.f32.mrf.mxu3 }
 0x25d   : > { %v2184_v38 = vadd.f32 %v2183_v49, %v2070_v32  ;;  %2674 = vrot.lane.b32.xlu1 %v2397_v16, %s5064_s12  ;;  %v2512_v37 = vrot.slane %v2397_v16, 7  ;;  %v2782_v31 = vsel %vm228_vm2, %v2397_v16, 0.0 }
 0x25e   : > { %v2865_v8 = vrot.slane %v2782_v31, 1 }
 0x25f   : > { %v6822_v18 = vpop.f32.mrf.mxu2  ;;  %v2267_v61 = vadd.f32 %v2235_v26, %v2184_v38  ;;  %v2513_v29 = vsel %vm379_vm7, %v2510_v48, %v2512_v37 }
 0x260   : > { %v2866_v63 = vsel %vm739_vm3, %v2863_v53, %v2865_v8  ;;  %v6829_v15 = vld [vmem:[#allocation2 + $0x158] sm:$0xff]  ;;  %2589 = vst.msk [vmem:[#allocation2 + $0x170] sm:$0xff] %vm231_vm0, %v2513_v29 }
 0x261   : > { %v2653_v43 = vpop.permute.xlu2 %2652  ;;  %v2076_v30 = vpop.f32.mrf.mxu1  ;;  %v2330_v23 = vld [vmem:[#allocation3 + $0xa8] sm:$0xff]  ;;  %2299 = vst.msk [vmem:[#allocation3 + $0xb0] sm:$0xff] %vm231_vm0, %v2267_v61 }
 0x262   : > { %2739 = vst.msk [vmem:[#allocation2 + $0xc0] sm:$0xff] %vm638_vm8, %v2653_v43  ;;  %v2965_v11 = vld [vmem:[#allocation2 + $0x80] sm:$0xff]  ;;  %4809 = vmatmul.msk.f32.gmra.mxu3 %vm231_vm0, %v6616_v60  ;;  %v2366_v47 = vadd.f32 %v6733_v35, %v2330_v23  ;;  %v2238_v23 = vld [vmem:[#allocation3 + $0xc8] sm:$0xff] }
 0x263   : > { %2942 = vst.msk [vmem:[#allocation2 + $0x168] sm:$0xff] %vm231_vm0, %v2866_v63  ;;  %3166 = vmatmul.f32.gmra.mxu0 %v2965_v11  ;;  %3603 = vmatmul.f32.gmra.mxu1 %v2965_v11 }
 0x264   : > { %4766 = vmatmul.msk.f32.gmra.mxu2 %vm231_vm0, %v6829_v15  ;;  %v2398_v7 = vmax.f32 %v2366_v47, 0.0  ;;  %v2186_v62 = vpop.f32.mrf.mxu3 }
 0x265   : > { %v2187_v60 = vadd.f32 %v2186_v62, %v2073_v36 }
 0x266   : > { %2676 = vrot.lane.b32.xlu2 %v2398_v7, %s5064_s12  ;;  %v2430_v19 = vsel %vm227_vm6, %v2398_v7, 0.0  ;;  %v2867_v56 = vrot.slane %v2398_v7, 1 }
 0x267   : > { %v6843_v24 = vpop.f32.mrf.mxu2  ;;  %v2514_v41 = vrot.slane %v2430_v19, 7  ;;  %v2268_v32 = vadd.f32 %v2236_v10, %v2187_v60  ;;  %v3146_v49 = vpop.f32.mrf.mxu0 }
 0x268   : > { %v2868_v44 = vsel %vm739_vm3, %v2865_v8, %v2867_v56  ;;  %v2331_v57 = vld [vmem:[#allocation3 + $0xb0] sm:$0xff]  ;;  %v3260_v26 = vadd.f32 %v6746_v1, %v3146_v49 }
 0x269   : > { %v2649_v50 = vpop.permute.xlu0 %2648  ;;  %v2079_v22 = vpop.f32.mrf.mxu1  ;;  %2943 = vst.msk [vmem:[#allocation2 + $0x178] sm:$0xff] %vm231_vm0, %v2868_v44  ;;  %v2515_v14 = vsel %vm379_vm7, %v2512_v37, %v2514_v41  ;;  %v2367_v33 = vadd.f32 %v6733_v35, %v2331_v57 }
 0x26a   : > { %2300 = vst.msk [vmem:[#allocation3 + $0xb8] sm:$0xff] %vm231_vm0, %v2268_v32  ;;  %v6852_v59 = vld [vmem:[#allocation2 + $0x168] sm:$0xff]  ;;  %4810 = vmatmul.msk.f32.gmra.mxu3 %vm231_vm0, %v6635_v6  ;;  %v4842_v32 = vld [vmem:[%s7577_s3 + $0x1c0] sm:$0xff] }
 0x26b   : > { %2737 = vst.msk [vmem:[#allocation2 + $0xa0] sm:$0xff] %vm638_vm8, %v2649_v50  ;;  %3169 = vmatmul.f32.gmra.mxu0 %v2967_v17  ;;  %3606 = vmatmul.f32.gmra.mxu1 %v2967_v17  ;;  %v2399_v53 = vmax.f32 %v2367_v33, 0.0 }
 0x26c   : > { %4767 = vmatmul.msk.f32.gmra.mxu2 %vm231_vm0, %v6852_v59  ;;  %2590 = vst.msk [vmem:[#allocation2 + $0x180] sm:$0xff] %vm231_vm0, %v2515_v14  ;;  %v2189_v58 = vpop.f32.mrf.mxu3  ;;  %4076 = vmatpush.msra.mxu0 %v4842_v32  ;;  %v2239_v14 = vld [vmem:[#allocation3 + $0xd0] sm:$0xff] }
 0x26d   : > { %v2190_v6 = vadd.f32 %v2189_v58, %v2076_v30  ;;  %2678 = vrot.lane.b32.xlu0 %v2399_v53, %s5064_s12  ;;  %v2516_v20 = vrot.slane %v2399_v53, 7  ;;  %v2784_v21 = vsel %vm228_vm2, %v2399_v53, 0.0  ;;  %3355 = vst.msk [vmem:[#allocation3] sm:$0xff] %vm231_vm0, %v3260_v26  ;;  %4902 = vmatpush.msrb.mxu1 %v4842_v32 }
 0x26e   : > { %v2869_v5 = vrot.slane %v2784_v21, 1  ;;  %v2973_v21 = vld [vmem:[#allocation2 + $0xc0] sm:$0xff] }
 0x26f   : > { %v6864_v48 = vpop.f32.mrf.mxu2  ;;  %v2269_v36 = vadd.f32 %v2237_v46, %v2190_v6  ;;  %v2517_v38 = vsel %vm379_vm7, %v2514_v41, %v2516_v20  ;;  %v3149_v62 = vpop.f32.mrf.mxu0 }
 0x270   : > { %v2870_v51 = vsel %vm739_vm3, %v2867_v56, %v2869_v5  ;;  %v6871_v54 = vld [vmem:[#allocation2 + $0x178] sm:$0xff]  ;;  %2591 = vst.msk [vmem:[#allocation2 + $0x190] sm:$0xff] %vm231_vm0, %v2517_v38  ;;  %v3263_v56 = vadd.f32 %v6775_v42, %v3149_v62  ;;  %v2240_v38 = vld [vmem:[#allocation3 + $0xd8] sm:$0xff] }
 0x271   : > { %v2651_v28 = vpop.permute.xlu1 %2650  ;;  %v2082_v0 = vpop.f32.mrf.mxu1  ;;  %v2332_v16 = vld [vmem:[#allocation3 + $0xb8] sm:$0xff]  ;;  %2301 = vst.msk [vmem:[#allocation3 + $0xc0] sm:$0xff] %vm231_vm0, %v2269_v36  ;;  %v4853_v36 = vld [vmem:[%s7577_s3 + $0x218] sm:$0xff] }
 0x272   : > { %2738 = vst.msk [vmem:[#allocation2 + $0xb0] sm:$0xff] %vm638_vm8, %v2651_v28  ;;  %v2969_v37 = vld [vmem:[#allocation2 + $0xa0] sm:$0xff]  ;;  %4811 = vmatmul.msk.f32.gmra.mxu3 %vm231_vm0, %v6657_v2  ;;  %v2368_v31 = vadd.f32 %v6733_v35, %v2332_v16  ;;  %4194 = vmatpush.msra.mxu2 %v4853_v36 }
 0x273   : > { %2944 = vst.msk [vmem:[#allocation2 + $0x188] sm:$0xff] %vm231_vm0, %v2870_v51  ;;  %3172 = vmatmul.f32.gmra.mxu0 %v2969_v37  ;;  %3609 = vmatmul.f32.gmra.mxu1 %v2969_v37 }
 0x274   : > { %4768 = vmatmul.msk.f32.gmra.mxu2 %vm231_vm0, %v6871_v54  ;;  %v2400_v8 = vmax.f32 %v2368_v31, 0.0  ;;  %v2192_v61 = vpop.f32.mrf.mxu3  ;;  %3356 = vst.msk [vmem:[#allocation3 + $0x8] sm:$0xff] %vm231_vm0, %v3263_v56  ;;  %4915 = vmatpush.msrb.mxu3 %v4853_v36 }
 0x275   : > { %v2193_v43 = vadd.f32 %v2192_v61, %v2079_v22 }
 0x276   : > { %2680 = vrot.lane.b32.xlu1 %v2400_v8, %s5064_s12  ;;  %v2432_v2 = vsel %vm227_vm6, %v2400_v8, 0.0  ;;  %v2871_v63 = vrot.slane %v2400_v8, 1 }
 0x277   : > { %v6884_v30 = vpop.f32.mrf.mxu2  ;;  %v2518_v1 = vrot.slane %v2432_v2, 7  ;;  %v2270_v29 = vadd.f32 %v2238_v23, %v2193_v43  ;;  %v2659_v47 = vpop.permute.xlu2 %2658 }
 0x278   : > { %v2872_v11 = vsel %vm739_vm3, %v2869_v5, %v2871_v63  ;;  %v2333_v40 = vld [vmem:[#allocation3 + $0xc0] sm:$0xff]  ;;  %2742 = vst.msk [vmem:[#allocation2 + $0xf0] sm:$0xff] %vm638_vm8, %v2659_v47 }
 0x279   : > { %v2971_v7 = vld [vmem:[#allocation2 + $0xb0] sm:$0xff]  ;;  %2945 = vst.msk [vmem:[#allocation2 + $0x198] sm:$0xff] %vm231_vm0, %v2872_v11  ;;  %v2369_v19 = vadd.f32 %v6733_v35, %v2333_v40  ;;  %v2519_v10 = vsel %vm379_vm7, %v2516_v20, %v2518_v1  ;;  %v2085_v41 = vpop.f32.mrf.mxu1 }
 0x27a   : > { %2302 = vst.msk [vmem:[#allocation3 + $0xc8] sm:$0xff] %vm231_vm0, %v2270_v29  ;;  %v6892_v60 = vld [vmem:[#allocation2 + $0x188] sm:$0xff]  ;;  %4812 = vmatmul.msk.f32.gmra.mxu3 %vm231_vm0, %v6671_v52 }
 0x27b   : > { %3175 = vmatmul.f32.gmra.mxu0 %v2971_v7  ;;  %3612 = vmatmul.f32.gmra.mxu1 %v2971_v7  ;;  %v2401_v44 = vmax.f32 %v2369_v19, 0.0  ;;  %2592 = vst.msk [vmem:[#allocation2 + $0x1a0] sm:$0xff] %vm231_vm0, %v2519_v10  ;;  %v2241_v19 = vld [vmem:[#allocation3 + $0xe0] sm:$0xff] }
 0x27c   : > { %4769 = vmatmul.msk.f32.gmra.mxu2 %vm231_vm0, %v6892_v60  ;;  %v2195_v52 = vpop.f32.mrf.mxu3 }
 0x27d   : > { %v2196_v42 = vadd.f32 %v2195_v52, %v2082_v0  ;;  %2682 = vrot.lane.b32.xlu2 %v2401_v44, %s5064_s12  ;;  %v2520_v22 = vrot.slane %v2401_v44, 7  ;;  %v2786_v57 = vsel %vm228_vm2, %v2401_v44, 0.0 }
 0x27e   : > { %v2873_v17 = vrot.slane %v2786_v57, 1 }
 0x27f   : > { %v6907_v50 = vpop.f32.mrf.mxu2  ;;  %v2271_v33 = vadd.f32 %v2239_v14, %v2196_v42  ;;  %v2521_v20 = vsel %vm379_vm7, %v2518_v1, %v2520_v22  ;;  %v4841_v1 = vld [vmem:[%s7577_s3 + $0x1b8] sm:$0xff] }
 0x280   : > { %v2874_v53 = vsel %vm739_vm3, %v2871_v63, %v2873_v17  ;;  %v6914_v58 = vld [vmem:[#allocation2 + $0x198] sm:$0xff]  ;;  %2593 = vst.msk [vmem:[#allocation2 + $0x1b0] sm:$0xff] %vm231_vm0, %v2521_v20  ;;  %4077 = vmatpush.msra.mxu0 %v4841_v1  ;;  %4903 = vmatpush.msrb.mxu1 %v4841_v1 }
 0x281   : > { %v2655_v9 = vpop.permute.xlu0 %2654  ;;  %v2334_v6 = vld [vmem:[#allocation3 + $0xc8] sm:$0xff]  ;;  %2303 = vst.msk [vmem:[#allocation3 + $0xd0] sm:$0xff] %vm231_vm0, %v2271_v33  ;;  %v2088_v28 = vpop.f32.mrf.mxu1 }
 0x282   : > { %2740 = vst.msk [vmem:[#allocation2 + $0xd0] sm:$0xff] %vm638_vm8, %v2655_v9  ;;  %4813 = vmatmul.msk.f32.gmra.mxu3 %vm231_vm0, %v6692_v3  ;;  %v2370_v46 = vadd.f32 %v6733_v35, %v2334_v6  ;;  %v2242_v6 = vld [vmem:[#allocation3 + $0xe8] sm:$0xff] }
 0x283   : > { %2946 = vst.msk [vmem:[#allocation2 + $0x1a8] sm:$0xff] %vm231_vm0, %v2874_v53  ;;  %3178 = vmatmul.f32.gmra.mxu0 %v2973_v21  ;;  %3615 = vmatmul.f32.gmra.mxu1 %v2973_v21 }
 0x284   : > { %4770 = vmatmul.msk.f32.gmra.mxu2 %vm231_vm0, %v6914_v58  ;;  %v2402_v5 = vmax.f32 %v2370_v46, 0.0 }
 0x285   : > { %v2198_v51 = vpop.f32.mrf.mxu3 }
 0x286   : > { %v2199_v3 = vadd.f32 %v2198_v51, %v2085_v41  ;;  %2684 = vrot.lane.b32.xlu0 %v2402_v5, %s5064_s12  ;;  %v2434_v16 = vsel %vm227_vm6, %v2402_v5, 0.0  ;;  %v2875_v49 = vrot.slane %v2402_v5, 1 }
 0x287   : > { %v6928_v0 = vpop.f32.mrf.mxu2  ;;  %v2522_v37 = vrot.slane %v2434_v16, 7  ;;  %v2657_v8 = vpop.permute.xlu1 %2656 }
 0x288   : > { %v2272_v31 = vadd.f32 %v2240_v38, %v2199_v3  ;;  %v2876_v26 = vsel %vm739_vm3, %v2873_v17, %v2875_v49  ;;  %v2335_v43 = vld [vmem:[#allocation3 + $0xd0] sm:$0xff]  ;;  %2741 = vst.msk [vmem:[#allocation2 + $0xe0] sm:$0xff] %vm638_vm8, %v2657_v8  ;;  %v2979_v3 = vld [vmem:[#allocation2 + $0xf0] sm:$0xff] }
 0x289   : > { %v2975_v61 = vld [vmem:[#allocation2 + $0xd0] sm:$0xff]  ;;  %2947 = vst.msk [vmem:[#allocation2 + $0x1b8] sm:$0xff] %vm231_vm0, %v2876_v26  ;;  %v2523_v2 = vsel %vm379_vm7, %v2520_v22, %v2522_v37  ;;  %v2371_v23 = vadd.f32 %v6733_v35, %v2335_v43  ;;  %v2091_v62 = vpop.f32.mrf.mxu1 }
 0x28a   : > { %2304 = vst.msk [vmem:[#allocation3 + $0xd8] sm:$0xff] %vm231_vm0, %v2272_v31  ;;  %v6937_v63 = vld [vmem:[#allocation2 + $0x1a8] sm:$0xff]  ;;  %4814 = vmatmul.msk.f32.gmra.mxu3 %vm231_vm0, %v6706_v45  ;;  %v4840_v38 = vld [vmem:[%s7577_s3 + $0x1b0] sm:$0xff] }
 0x28b   : > { %3181 = vmatmul.f32.gmra.mxu0 %v2975_v61  ;;  %3618 = vmatmul.f32.gmra.mxu1 %v2975_v61  ;;  %v2403_v29 = vmax.f32 %v2371_v23, 0.0  ;;  %2594 = vst.msk [vmem:[#allocation2 + $0x1c0] sm:$0xff] %vm231_vm0, %v2523_v2  ;;  %v4852_v43 = vld [vmem:[%s7577_s3 + $0x210] sm:$0xff]  ;;  %v2243_v2 = vld [vmem:[#allocation3 + $0xf0] sm:$0xff] }
 0x28c   : > { %4771 = vmatmul.msk.f32.gmra.mxu2 %vm231_vm0, %v6937_v63  ;;  %4078 = vmatpush.msra.mxu0 %v4840_v38 }
 0x28d   : > { %v2201_v11 = vpop.f32.mrf.mxu3  ;;  %2686 = vrot.lane.b32.xlu1 %v2403_v29, %s5064_s12  ;;  %v2524_v7 = vrot.slane %v2403_v29, 7  ;;  %v2788_v40 = vsel %vm228_vm2, %v2403_v29, 0.0  ;;  %4904 = vmatpush.msrb.mxu1 %v4840_v38  ;;  %v4839_v38 = vld [vmem:[%s7577_s3 + $0x1a8] sm:$0xff] }
 0x28e   : > { %v2202_v45 = vadd.f32 %v2201_v11, %v2088_v28  ;;  %v2877_v56 = vrot.slane %v2788_v40, 1  ;;  %4195 = vmatpush.msra.mxu2 %v4852_v43  ;;  %4916 = vmatpush.msrb.mxu3 %v4852_v43 }
 0x28f   : > { %v6949_v47 = vpop.f32.mrf.mxu2  ;;  %v2525_v42 = vsel %vm379_vm7, %v2522_v37, %v2524_v7  ;;  %v2977_v22 = vld [vmem:[#allocation2 + $0xe0] sm:$0xff]  ;;  %4079 = vmatpush.msra.mxu0 %v4839_v38  ;;  %4905 = vmatpush.msrb.mxu1 %v4839_v38  ;;  %v3897_v38 = vld [vmem:[#allocation2 + $0x68] sm:$0xff] }
 0x290   : > { %v2273_v10 = vadd.f32 %v2241_v19, %v2202_v45  ;;  %v2665_v41 = vpop.permute.xlu2 %2664  ;;  %v2878_v32 = vsel %vm739_vm3, %v2875_v49, %v2877_v56  ;;  %v6956_v44 = vld [vmem:[#allocation2 + $0x1b8] sm:$0xff]  ;;  %2595 = vst.msk [vmem:[#allocation2 + $0x1d0] sm:$0xff] %vm231_vm0, %v2525_v42  ;;  %v4851_v19 = vld [vmem:[%s7577_s3 + $0x208] sm:$0xff] }
 0x291   : > { %2745 = vst.msk [vmem:[#allocation2 + $0x120] sm:$0xff] %vm638_vm8, %v2665_v41  ;;  %v2336_v52 = vld [vmem:[#allocation3 + $0xd8] sm:$0xff]  ;;  %v2094_v36 = vpop.f32.mrf.mxu1  ;;  %4196 = vmatpush.msra.mxu2 %v4851_v19  ;;  %4917 = vmatpush.msrb.mxu3 %v4851_v19 }
 0x292   : > { %2305 = vst.msk [vmem:[#allocation3 + $0xe0] sm:$0xff] %vm231_vm0, %v2273_v10  ;;  %4815 = vmatmul.msk.f32.gmra.mxu3 %vm231_vm0, %v6726_v25  ;;  %v2372_v57 = vadd.f32 %v6733_v35, %v2336_v52 }
 0x293   : > { %2948 = vst.msk [vmem:[#allocation2 + $0x1c8] sm:$0xff] %vm231_vm0, %v2878_v32  ;;  %3184 = vmatmul.f32.gmra.mxu0 %v2977_v22  ;;  %3621 = vmatmul.f32.gmra.mxu1 %v2977_v22  ;;  %v4850_v32 = vld [vmem:[%s7577_s3 + $0x200] sm:$0xff] }
 0x294   : > { %4772 = vmatmul.msk.f32.gmra.mxu2 %vm231_vm0, %v6956_v44  ;;  %v2404_v14 = vmax.f32 %v2372_v57, 0.0  ;;  %4918 = vmatpush.msrb.mxu3 %v4850_v32 }
 0x295   : > { %v2204_v17 = vpop.f32.mrf.mxu3  ;;  %4197 = vmatpush.msra.mxu2 %v4850_v32 }
 0x296   : > { %v2205_v33 = vadd.f32 %v2204_v17, %v2091_v62  ;;  %2688 = vrot.lane.b32.xlu2 %v2404_v14, %s5064_s12  ;;  %v2436_v25 = vsel %vm227_vm6, %v2404_v14, 0.0  ;;  %v2879_v53 = vrot.slane %v2404_v14, 1  ;;  %v2244_v17 = vld [vmem:[#allocation3 + $0xf8] sm:$0xff] }
 0x297   : > { %v6967_v9 = vpop.f32.mrf.mxu2  ;;  %v2526_v20 = vrot.slane %v2436_v25, 7 }
 0x298   : > { %v2274_v21 = vadd.f32 %v2242_v6, %v2205_v33  ;;  %v2880_v46 = vsel %vm739_vm3, %v2877_v56, %v2879_v53  ;;  %v2661_v5 = vpop.permute.xlu0 %2660 }
 0x299   : > { %2949 = vst.msk [vmem:[#allocation2 + $0x1d8] sm:$0xff] %vm231_vm0, %v2880_v46  ;;  %v2337_v28 = vld [vmem:[#allocation3 + $0xe0] sm:$0xff]  ;;  %v2527_v51 = vsel %vm379_vm7, %v2524_v7, %v2526_v20  ;;  %v2097_v41 = vpop.f32.mrf.mxu1 }
 0x29a   : > { %2306 = vst.msk [vmem:[#allocation3 + $0xe8] sm:$0xff] %vm231_vm0, %v2274_v21  ;;  %v6976_v16 = vld [vmem:[#allocation2 + $0x1c8] sm:$0xff]  ;;  %4816 = vmatmul.msk.f32.gmra.mxu3 %vm231_vm0, %v6750_v55  ;;  %v2373_v49 = vadd.f32 %v6733_v35, %v2337_v28 }
 0x29b   : > { %2743 = vst.msk [vmem:[#allocation2 + $0x100] sm:$0xff] %vm638_vm8, %v2661_v5  ;;  %3187 = vmatmul.f32.gmra.mxu0 %v2979_v3  ;;  %3624 = vmatmul.f32.gmra.mxu1 %v2979_v3 }
 0x29c   : > { %4773 = vmatmul.msk.f32.gmra.mxu2 %vm231_vm0, %v6976_v16  ;;  %v2405_v37 = vmax.f32 %v2373_v49, 0.0  ;;  %2596 = vst.msk [vmem:[#allocation2 + $0x1e0] sm:$0xff] %vm231_vm0, %v2527_v51  ;;  %v3798_v49 = vld [vmem:[#allocation3] sm:$0xff] }
 0x29d   : > { %v2207_v31 = vpop.f32.mrf.mxu3 }
 0x29e   : > { %v2208_v55 = vadd.f32 %v2207_v31, %v2094_v36  ;;  %2690 = vrot.lane.b32.xlu0 %v2405_v37, %s5064_s12  ;;  %v2528_v8 = vrot.slane %v2405_v37, 7  ;;  %v2790_v61 = vsel %vm228_vm2, %v2405_v37, 0.0 }
 0x29f   : > { %v6988_v26 = vpop.f32.mrf.mxu2  ;;  %v2881_v23 = vrot.slane %v2790_v61, 1  ;;  %v2663_v11 = vpop.permute.xlu1 %2662 }
 0x2a0   : > { %v2275_v1 = vadd.f32 %v2243_v2, %v2208_v55  ;;  %v3152_v29 = vpop.f32.mrf.mxu0  ;;  %2744 = vst.msk [vmem:[#allocation2 + $0x110] sm:$0xff] %vm638_vm8, %v2663_v11  ;;  %v6999_v40 = vld [vmem:[#allocation2 + $0x1d8] sm:$0xff]  ;;  %v2985_v11 = vld [vmem:[#allocation2 + $0x120] sm:$0xff] }
 0x2a1   : > { %v2882_v45 = vsel %vm739_vm3, %v2879_v53, %v2881_v23  ;;  %v3266_v7 = vadd.f32 %v6800_v4, %v3152_v29  ;;  %v2338_v62 = vld [vmem:[#allocation3 + $0xe8] sm:$0xff]  ;;  %v2529_v4 = vsel %vm379_vm7, %v2526_v20, %v2528_v8  ;;  %v3589_v51 = vpop.f32.mrf.mxu1 }
 0x2a2   : > { %2307 = vst.msk [vmem:[#allocation3 + $0xf0] sm:$0xff] %vm231_vm0, %v2275_v1  ;;  %v2981_v56 = vld [vmem:[#allocation2 + $0x100] sm:$0xff]  ;;  %4817 = vmatmul.msk.f32.gmra.mxu3 %vm231_vm0, %v6771_v34  ;;  %v2374_v10 = vadd.f32 %v6733_v35, %v2338_v62 }
 0x2a3   : > { %2950 = vst.msk [vmem:[#allocation2 + $0x1e8] sm:$0xff] %vm231_vm0, %v2882_v45  ;;  %3190 = vmatmul.f32.gmra.mxu0 %v2981_v56  ;;  %3627 = vmatmul.f32.gmra.mxu1 %v2981_v56 }
 0x2a4   : > { %3357 = vst.msk [vmem:[#allocation3 + $0x10] sm:$0xff] %vm231_vm0, %v3266_v7  ;;  %4774 = vmatmul.msk.f32.gmra.mxu2 %vm231_vm0, %v6999_v40  ;;  %v2406_v34 = vmax.f32 %v2374_v10, 0.0 }
 0x2a5   : > { %v2210_v52 = vpop.f32.mrf.mxu3  ;;  %2597 = vst.msk [vmem:[#allocation2 + $0x1f0] sm:$0xff] %vm231_vm0, %v2529_v4 }
 0x2a6   : > { %v2211_v42 = vadd.f32 %v2210_v52, %v2097_v41  ;;  %2692 = vrot.lane.b32.xlu1 %v2406_v34, %s5064_s12  ;;  %v2438_v57 = vsel %vm227_vm6, %v2406_v34, 0.0  ;;  %v2883_v14 = vrot.slane %v2406_v34, 1  ;;  %v4838_v34 = vld [vmem:[%s7577_s3 + $0x1a0] sm:$0xff] }
 0x2a7   : > { %v7017_v22 = vpop.f32.mrf.mxu2  ;;  %v2530_v33 = vrot.slane %v2438_v57, 7  ;;  %v2983_v20 = vld [vmem:[#allocation2 + $0x110] sm:$0xff]  ;;  %4080 = vmatpush.msra.mxu0 %v4838_v34  ;;  %4906 = vmatpush.msrb.mxu1 %v4838_v34 }
 0x2a8   : > { %v2276_v25 = vadd.f32 %v2244_v17, %v2211_v42  ;;  %v2884_v53 = vsel %vm739_vm3, %v2881_v23, %v2883_v14  ;;  %v2671_v6 = vpop.permute.xlu2 %2670 }
 0x2a9   : > { %2951 = vst.msk [vmem:[#allocation2 + $0x1f8] sm:$0xff] %vm231_vm0, %v2884_v53  ;;  %v2339_v21 = vld [vmem:[#allocation3 + $0xf0] sm:$0xff]  ;;  %v2531_v46 = vsel %vm379_vm7, %v2528_v8, %v2530_v33 }
 0x2aa   : > { %2308 = vst.msk [vmem:[#allocation3 + $0xf8] sm:$0xff] %vm231_vm0, %v2276_v25  ;;  %v7026_v5 = vld [vmem:[#allocation2 + $0x1e8] sm:$0xff]  ;;  %4818 = vmatmul.msk.f32.gmra.mxu3 %vm231_vm0, %v6790_v39  ;;  %v2375_v36 = vadd.f32 %v6733_v35, %v2339_v21 }
 0x2ab   : > { %2748 = vst.msk [vmem:[#allocation2 + $0x150] sm:$0xff] %vm638_vm8, %v2671_v6  ;;  %3193 = vmatmul.f32.gmra.mxu0 %v2983_v20  ;;  %3630 = vmatmul.f32.gmra.mxu1 %v2983_v20  ;;  %v3895_v6 = vld [vmem:[#allocation2 + $0x58] sm:$0xff] }
 0x2ac   : > { %4775 = vmatmul.msk.f32.gmra.mxu2 %vm231_vm0, %v7026_v5  ;;  %v2407_v28 = vmax.f32 %v2375_v36, 0.0  ;;  %2598 = vst.msk [vmem:[#allocation2 + $0x200] sm:$0xff] %vm231_vm0, %v2531_v46 }
 0x2ad   : > { %v3702_v3 = vpop.f32.mrf.mxu3 }
 0x2ae   : > { %v3703_v37 = vadd.f32 %v3702_v3, %v3589_v51  ;;  %2694 = vrot.lane.b32.xlu2 %v2407_v28, %s5064_s12  ;;  %v2532_v31 = vrot.slane %v2407_v28, 7  ;;  %v2792_v55 = vsel %vm228_vm2, %v2407_v28, 0.0  ;;  %v3800_v51 = vld [vmem:[#allocation3 + $0x10] sm:$0xff] }
 0x2af   : > { %v7038_v39 = vpop.f32.mrf.mxu2  ;;  %v2885_v8 = vrot.slane %v2792_v55, 1  ;;  %v2667_v43 = vpop.permute.xlu0 %2666 }
 0x2b0   : > { %v3830_v61 = vadd.f32 %v3798_v49, %v3703_v37  ;;  %2746 = vst.msk [vmem:[#allocation2 + $0x130] sm:$0xff] %vm638_vm8, %v2667_v43  ;;  %v7045_v23 = vld [vmem:[#allocation2 + $0x1f8] sm:$0xff]  ;;  %v2533_v29 = vsel %vm379_vm7, %v2530_v33, %v2532_v31 }
 0x2b1   : > { %v2886_v2 = vsel %vm739_vm3, %v2883_v14, %v2885_v8  ;;  %v2340_v1 = vld [vmem:[#allocation3 + $0xf8] sm:$0xff]  ;;  %2599 = vst.msk [vmem:[#allocation2 + $0x210] sm:$0xff] %vm231_vm0, %v2533_v29  ;;  %v3799_v33 = vld [vmem:[#allocation3 + $0x8] sm:$0xff] }
 0x2b2   : > { %3862 = vst.msk [vmem:[#allocation3] sm:$0xff] %vm231_vm0, %v3830_v61  ;;  %4819 = vmatmul.msk.f32.gmra.mxu3 %vm231_vm0, %v6810_v13  ;;  %v2376_v27 = vadd.f32 %v6733_v35, %v2340_v1  ;;  %v4837_v37 = vld [vmem:[%s7577_s3 + $0x198] sm:$0xff] }
 0x2b3   : > { %2952 = vst.msk [vmem:[#allocation2 + $0x208] sm:$0xff] %vm231_vm0, %v2886_v2  ;;  %3196 = vmatmul.f32.gmra.mxu0 %v2985_v11  ;;  %3633 = vmatmul.f32.gmra.mxu1 %v2985_v11  ;;  %v3899_v29 = vld [vmem:[#allocation2 + $0x78] sm:$0xff] }
 0x2b4   : > { %4776 = vmatmul.msk.f32.gmra.mxu2 %vm231_vm0, %v7045_v23  ;;  %v2408_v45 = vmax.f32 %v2376_v27, 0.0  ;;  %4081 = vmatpush.msra.mxu0 %v4837_v37 }
 0x2b5   : > { %v3705_v7 = vpop.f32.mrf.mxu3  ;;  %4907 = vmatpush.msrb.mxu1 %v4837_v37 }
 0x2b6   : > { %2696 = vrot.lane.b32.xlu0 %v2408_v45, %s5064_s12  ;;  %v2440_v62 = vsel %vm227_vm6, %v2408_v45, 0.0  ;;  %v2887_v19 = vrot.slane %v2408_v45, 1  ;;  %s4894_s12 = sshll.u32 %s5118_s22, 8  ;;  %s4524_s22 = scalar_lea.sflag [#allocation5], %s215_s25 }
 0x2b7   : > { %v7059_v13 = vpop.f32.mrf.mxu2  ;;  %v2534_v35 = vrot.slane %v2440_v62, 7  ;;  %v2987_v4 = vld [vmem:[#allocation2 + $0x130] sm:$0xff]  ;;  %s4535_s10 = scalar_lea.hbm %s7579_s5, %s4894_s12 }
 0x2b8   : > { %v2888_v56 = vsel %vm739_vm3, %v2885_v8, %v2887_v19  ;;  %2954 = vst.msk [vmem:[#allocation2 + $0x228] sm:$0x7f] %vm868_vm9, %v2887_v19  ;;  %v2669_v10 = vpop.permute.xlu1 %2668  ;;  %s4538_s14 = sshll.u32 %s4535_s10, 4  ;;  %s4539_s14 = int_to_ptr.hbm [resolvable:$true] %s4538_s14 }
 0x2b9   : > { %v2535_v41 = vsel %vm379_vm7, %v2532_v31, %v2534_v35  ;;  %2953 = vst.msk [vmem:[#allocation2 + $0x218] sm:$0xff] %vm231_vm0, %v2888_v56  ;;  %s5013_s15 = sshra.s32 %s4539_s14, 4  ;;  %s5014_s15 = int_to_ptr.hbm [resolvable:$true] %s5013_s15 }
 0x2ba   : > { %v7065_v32 = vld [vmem:[#allocation2 + $0x208] sm:$0xff]  ;;  %4820 = vmatmul.msk.f32.gmra.mxu3 %vm231_vm0, %v6829_v15  ;;  %2747 = vst.msk [vmem:[#allocation2 + $0x140] sm:$0xff] %vm638_vm8, %v2669_v10  ;;  %s5015_s16 = scalar_lea.hbm %s5014_s15, 256  ;;  %p5020_p0 = scmp.lt.s32.totalorder %s5014_s15, %s7579_s5 }
 0x2bb   : > { %3199 = vmatmul.f32.gmra.mxu0 %v2987_v4  ;;  %3636 = vmatmul.f32.gmra.mxu1 %v2987_v4  ;;  %2600 = vst.msk [vmem:[#allocation2 + $0x220] sm:$0xff] %vm231_vm0, %v2535_v41  ;;  %v3901_v10 = vld [vmem:[#allocation2 + $0x88] sm:$0xff]  ;;  %v4836_v4 = vld [vmem:[%s7577_s3 + $0x190] sm:$0xff]  ;;  %p5016_p11 = scmp.ne.s32.totalorder %s5014_s15, %s5015_s16  ;;  %p5021_p1 = scmp.lt.s32.totalorder %s5019_s26, %s5015_s16 }
 0x2bc   : > { %4777 = vmatmul.msk.f32.gmra.mxu2 %vm231_vm0, %v7065_v32  ;;  %4082 = vmatpush.msra.mxu0 %v4836_v4 }
 0x2bd   : > { %v3708_v12 = vpop.f32.mrf.mxu3  ;;  %4908 = vmatpush.msrb.mxu1 %v4836_v4  ;;  %p5017_p12 = pnand %p5016_p11, %p5135_p5  ;;  %p5022_p2 = por %p5021_p1, %p5020_p0 }
 0x2bf   : > { %v7076_v57 = vpop.f32.mrf.mxu2  ;;  %p5018_p13 = pneg %p5017_p12 }
 0x2c0   : > { %v3155_v52 = vpop.f32.mrf.mxu0  ;;  %v3592_v42 = vpop.f32.mrf.mxu1 }
 0x2c1   : > { %v3269_v15 = vadd.f32 %v6822_v18, %v3155_v52  ;;  %v3706_v14 = vadd.f32 %v3705_v7, %v3592_v42  ;;  %v2677_v17 = vpop.permute.xlu2 %2676  ;;  %v2989_v25 = vld [vmem:[#allocation2 + $0x140] sm:$0xff]  ;;  %p5023_p3 = pnand %p5022_p2, %p5018_p13 }
 0x2c2   : > { %2751 = vst.msk [vmem:[#allocation2 + $0x180] sm:$0xff] %vm638_vm8, %v2677_v17  ;;  %4821 = vmatmul.msk.f32.gmra.mxu3 %vm231_vm0, %v6852_v59  ;;  %v2991_v59 = vld [vmem:[#allocation2 + $0x150] sm:$0xff] }
 0x2c3   : > { %3358 = vst.msk [vmem:[#allocation3 + $0x18] sm:$0xff] %vm231_vm0, %v3269_v15  ;;  %v3831_v53 = vadd.f32 %v3799_v33, %v3706_v14  ;;  %3202 = vmatmul.f32.gmra.mxu0 %v2989_v25  ;;  %3639 = vmatmul.f32.gmra.mxu1 %v2989_v25  ;;  %v3903_v33 = vld [vmem:[#allocation2 + $0x98] sm:$0xff] }
 0x2c4   : > { %4858 = vmatmul.msk.f32.vlgmr.msra.gmra.mxu2 %vm231_vm0, %v3895_v6 }
 0x2c5   : > { %3863 = vst.msk [vmem:[#allocation3 + $0x8] sm:$0xff] %vm231_vm0, %v3831_v53  ;;  %v3711_v18 = vpop.f32.mrf.mxu3 }
 0x2c7   : > { %v7089_v3 = vpop.f32.mrf.mxu2 }
 0x2c8   : > { %v3158_v20 = vpop.f32.mrf.mxu0  ;;  %v3595_v21 = vpop.f32.mrf.mxu1 }
 0x2c9   : > { %v3272_v46 = vadd.f32 %v6843_v24, %v3158_v20  ;;  %v3709_v36 = vadd.f32 %v3708_v12, %v3595_v21  ;;  %v2673_v28 = vpop.permute.xlu0 %2672  ;;  %v2997_v14 = vld [vmem:[#allocation2 + $0x180] sm:$0xff] }
 0x2ca   : > { %2749 = vst.msk [vmem:[#allocation2 + $0x160] sm:$0xff] %vm638_vm8, %v2673_v28  ;;  %4822 = vmatmul.msk.f32.gmra.mxu3 %vm231_vm0, %v6871_v54  ;;  %v3801_v2 = vld [vmem:[#allocation3 + $0x18] sm:$0xff] }
 0x2cb   : > { %3359 = vst.msk [vmem:[#allocation3 + $0x20] sm:$0xff] %vm231_vm0, %v3272_v46  ;;  %v3832_v49 = vadd.f32 %v3800_v51, %v3709_v36  ;;  %3205 = vmatmul.f32.gmra.mxu0 %v2991_v59  ;;  %3642 = vmatmul.f32.gmra.mxu1 %v2991_v59  ;;  %v3905_v28 = vld [vmem:[#allocation2 + $0xa8] sm:$0xff] }
 0x2cc   : > { %4859 = vmatmul.msk.f32.gmra.mxu2 %vm231_vm0, %v3897_v38  ;;  %v4835_v51 = vld [vmem:[%s7577_s3 + $0x188] sm:$0xff] }
 0x2cd   : > { %3864 = vst.msk [vmem:[#allocation3 + $0x10] sm:$0xff] %vm231_vm0, %v3832_v49  ;;  %v3714_v24 = vpop.f32.mrf.mxu3  ;;  %4083 = vmatpush.msra.mxu0 %v4835_v51  ;;  %4909 = vmatpush.msrb.mxu1 %v4835_v51 }
 0x2cf   : > { %v2675_v61 = vpop.permute.xlu1 %2674  ;;  %v7103_v11 = vpop.f32.mrf.mxu2 }
 0x2d0   : > { %v3161_v54 = vpop.f32.mrf.mxu0  ;;  %v3598_v31 = vpop.f32.mrf.mxu1  ;;  %2750 = vst.msk [vmem:[#allocation2 + $0x170] sm:$0xff] %vm638_vm8, %v2675_v61 }
 0x2d1   : > { %v3275_v55 = vadd.f32 %v6864_v48, %v3161_v54  ;;  %v3712_v8 = vadd.f32 %v3711_v18, %v3598_v31  ;;  %v2993_v43 = vld [vmem:[#allocation2 + $0x160] sm:$0xff] }
 0x2d2   : > { %4823 = vmatmul.msk.f32.gmra.mxu3 %vm231_vm0, %v6892_v60  ;;  %v3802_v35 = vld [vmem:[#allocation3 + $0x20] sm:$0xff] }
 0x2d3   : > { %3360 = vst.msk [vmem:[#allocation3 + $0x28] sm:$0xff] %vm231_vm0, %v3275_v55  ;;  %v3833_v1 = vadd.f32 %v3801_v2, %v3712_v8  ;;  %3208 = vmatmul.f32.gmra.mxu0 %v2993_v43  ;;  %3645 = vmatmul.f32.gmra.mxu1 %v2993_v43 }
 0x2d4   : > { %4860 = vmatmul.msk.f32.gmra.mxu2 %vm231_vm0, %v3899_v29 }
 0x2d5   : > { %3865 = vst.msk [vmem:[#allocation3 + $0x18] sm:$0xff] %vm231_vm0, %v3833_v1  ;;  %v3717_v48 = vpop.f32.mrf.mxu3 }
 0x2d7   : > { %v2683_v19 = vpop.permute.xlu2 %2682  ;;  %v2995_v60 = vld [vmem:[#allocation2 + $0x170] sm:$0xff]  ;;  %v7116_v41 = vpop.f32.mrf.mxu2 }
 0x2d8   : > { %v3164_v27 = vpop.f32.mrf.mxu0  ;;  %v3601_v45 = vpop.f32.mrf.mxu1  ;;  %2754 = vst.msk [vmem:[#allocation2 + $0x1b0] sm:$0xff] %vm638_vm8, %v2683_v19 }
 0x2d9   : > { %v3278_v7 = vadd.f32 %v6884_v30, %v3164_v27  ;;  %v3715_v62 = vadd.f32 %v3714_v24, %v3601_v45  ;;  %v3909_v45 = vld [vmem:[#allocation2 + $0xc8] sm:$0xff] }
 0x2da   : > { %4824 = vmatmul.msk.f32.gmra.mxu3 %vm231_vm0, %v6914_v58  ;;  %v3803_v15 = vld [vmem:[#allocation3 + $0x28] sm:$0xff] }
 0x2db   : > { %3361 = vst.msk [vmem:[#allocation3 + $0x30] sm:$0xff] %vm231_vm0, %v3278_v7  ;;  %v3834_v56 = vadd.f32 %v3802_v35, %v3715_v62  ;;  %3211 = vmatmul.f32.gmra.mxu0 %v2995_v60  ;;  %3648 = vmatmul.f32.gmra.mxu1 %v2995_v60  ;;  %v4834_v62 = vld [vmem:[%s7577_s3 + $0x180] sm:$0xff] }
 0x2dc   : > { %4861 = vmatmul.msk.f32.gmra.mxu2 %vm231_vm0, %v3901_v10  ;;  %4084 = vmatpush.msra.mxu0 %v4834_v62 }
 0x2dd   : > { %3866 = vst.msk [vmem:[#allocation3 + $0x20] sm:$0xff] %vm231_vm0, %v3834_v56  ;;  %v3720_v30 = vpop.f32.mrf.mxu3  ;;  %4910 = vmatpush.msrb.mxu1 %v4834_v62 }
 0x2df   : > { %v2679_v42 = vpop.permute.xlu0 %2678  ;;  %v7125_v6 = vpop.f32.mrf.mxu2 }
 0x2e0   : > { %v3167_v58 = vpop.f32.mrf.mxu0  ;;  %v3604_v12 = vpop.f32.mrf.mxu1  ;;  %2752 = vst.msk [vmem:[#allocation2 + $0x190] sm:$0xff] %vm638_vm8, %v2679_v42 }
 0x2e1   : > { %v3281_v34 = vadd.f32 %v6907_v50, %v3167_v58  ;;  %v3718_v52 = vadd.f32 %v3717_v48, %v3604_v12  ;;  %v7156_v48 = vld [vmem:[#allocation2 + $0x1b0] sm:$0xff]  ;;  %v3911_v58 = vld [vmem:[#allocation2 + $0xd8] sm:$0xff] }
 0x2e2   : > { %4825 = vmatmul.msk.f32.gmra.mxu3 %vm231_vm0, %v6937_v63  ;;  %v3804_v46 = vld [vmem:[#allocation3 + $0x30] sm:$0xff] }
 0x2e3   : > { %3362 = vst.msk [vmem:[#allocation3 + $0x38] sm:$0xff] %vm231_vm0, %v3281_v34  ;;  %v3835_v17 = vadd.f32 %v3803_v15, %v3718_v52  ;;  %3214 = vmatmul.f32.gmra.mxu0 %v2997_v14  ;;  %3651 = vmatmul.f32.gmra.mxu1 %v2997_v14 }
 0x2e4   : > { %4862 = vmatmul.msk.f32.gmra.mxu2 %vm231_vm0, %v3903_v33 }
 0x2e5   : > { %3867 = vst.msk [vmem:[#allocation3 + $0x28] sm:$0xff] %vm231_vm0, %v3835_v17  ;;  %v3723_v50 = vpop.f32.mrf.mxu3 }
 0x2e7   : > { %v7128_v63 = vld [vmem:[#allocation2 + $0x190] sm:$0xff]  ;;  %v7147_v31 = vpop.f32.mrf.mxu2 }
 0x2e8   : > { %v3170_v25 = vpop.f32.mrf.mxu0  ;;  %v3607_v53 = vpop.f32.mrf.mxu1 }
 0x2e9   : > { %v3284_v18 = vadd.f32 %v6928_v0, %v3170_v25  ;;  %v3721_v20 = vadd.f32 %v3720_v30, %v3607_v53  ;;  %v2681_v21 = vpop.permute.xlu1 %2680 }
 0x2ea   : > { %2753 = vst.msk [vmem:[#allocation2 + $0x1a0] sm:$0xff] %vm638_vm8, %v2681_v21  ;;  %4826 = vmatmul.msk.f32.gmra.mxu3 %vm231_vm0, %v6956_v44  ;;  %v3805_v54 = vld [vmem:[#allocation3 + $0x38] sm:$0xff] }
 0x2eb   : > { %3363 = vst.msk [vmem:[#allocation3 + $0x40] sm:$0xff] %vm231_vm0, %v3284_v18  ;;  %v3836_v36 = vadd.f32 %v3804_v46, %v3721_v20  ;;  %3217 = vmatmul.f32.gmra.mxu0 %v7128_v63  ;;  %3654 = vmatmul.f32.gmra.mxu1 %v7128_v63 }
 0x2ec   : > { %4863 = vmatmul.msk.f32.gmra.mxu2 %vm231_vm0, %v3905_v28 }
 0x2ed   : > { %3868 = vst.msk [vmem:[#allocation3 + $0x30] sm:$0xff] %vm231_vm0, %v3836_v36  ;;  %v3726_v0 = vpop.f32.mrf.mxu3 }
 0x2f0   : > { %v3173_v44 = vpop.f32.mrf.mxu0  ;;  %v3610_v59 = vpop.f32.mrf.mxu1 }
 0x2f1   : > { %v3287_v49 = vadd.f32 %v6949_v47, %v3173_v44  ;;  %v3724_v38 = vadd.f32 %v3723_v50, %v3610_v59  ;;  %v2689_v24 = vpop.permute.xlu2 %2688  ;;  %v7142_v37 = vld [vmem:[#allocation2 + $0x1a0] sm:$0xff]  ;;  %v3907_v47 = vld [vmem:[#allocation2 + $0xb8] sm:$0xff]  ;;  %v3913_v50 = vld [vmem:[#allocation2 + $0xe8] sm:$0xff] }
 0x2f2   : > { %2757 = vst.msk [vmem:[#allocation2 + $0x1e0] sm:$0xff] %vm638_vm8, %v2689_v24  ;;  %4827 = vmatmul.msk.f32.gmra.mxu3 %vm231_vm0, %v6976_v16  ;;  %v3806_v29 = vld [vmem:[#allocation3 + $0x40] sm:$0xff]  ;;  %v7210_v24 = vld [vmem:[#allocation2 + $0x218] sm:$0xff] }
 0x2f3   : > { %3364 = vst.msk [vmem:[#allocation3 + $0x48] sm:$0xff] %vm231_vm0, %v3287_v49  ;;  %v3837_v55 = vadd.f32 %v3805_v54, %v3724_v38  ;;  %3220 = vmatmul.f32.gmra.mxu0 %v7142_v37  ;;  %3657 = vmatmul.f32.gmra.mxu1 %v7142_v37 }
 0x2f4   : > { %4864 = vmatmul.msk.f32.gmra.mxu2 %vm231_vm0, %v3907_v47 }
 0x2f5   : > { %3869 = vst.msk [vmem:[#allocation3 + $0x38] sm:$0xff] %vm231_vm0, %v3837_v55  ;;  %v3729_v8 = vpop.f32.mrf.mxu3 }
 0x2f8   : > { %v3176_v61 = vpop.f32.mrf.mxu0  ;;  %v3613_v43 = vpop.f32.mrf.mxu1 }
 0x2f9   : > { %v3290_v2 = vadd.f32 %v6967_v9, %v3176_v61  ;;  %v3727_v16 = vadd.f32 %v3726_v0, %v3613_v43  ;;  %v2685_v1 = vpop.permute.xlu0 %2684  ;;  %v7164_v9 = vpop.f32.mrf.mxu2  ;;  %v7198_v36 = vld [vmem:[#allocation2 + $0x1e0] sm:$0xff]  ;;  %v3915_v0 = vld [vmem:[#allocation2 + $0xf8] sm:$0xff] }
 0x2fa   : > { %2755 = vst.msk [vmem:[#allocation2 + $0x1c0] sm:$0xff] %vm638_vm8, %v2685_v1  ;;  %4828 = vmatmul.msk.f32.gmra.mxu3 %vm231_vm0, %v6999_v40  ;;  %v3807_v30 = vld [vmem:[#allocation3 + $0x48] sm:$0xff] }
 0x2fb   : > { %3365 = vst.msk [vmem:[#allocation3 + $0x50] sm:$0xff] %vm231_vm0, %v3290_v2  ;;  %v3838_v27 = vadd.f32 %v3806_v29, %v3727_v16  ;;  %3223 = vmatmul.f32.gmra.mxu0 %v7156_v48  ;;  %3660 = vmatmul.f32.gmra.mxu1 %v7156_v48  ;;  %v7225_v29 = vld [vmem:[#allocation2 + $0x228] sm:$0xff] }
 0x2fc   : > { %4865 = vmatmul.msk.f32.gmra.mxu2 %vm231_vm0, %v3909_v45 }
 0x2fd   : > { %3870 = vst.msk [vmem:[#allocation3 + $0x40] sm:$0xff] %vm231_vm0, %v3838_v27  ;;  %v3732_v7 = vpop.f32.mrf.mxu3 }
 0x2ff   : > { %v2687_v56 = vpop.permute.xlu1 %2686 }
 0x300   : > { %v3179_v40 = vpop.f32.mrf.mxu0  ;;  %v3616_v19 = vpop.f32.mrf.mxu1  ;;  %2756 = vst.msk [vmem:[#allocation2 + $0x1d0] sm:$0xff] %vm638_vm8, %v2687_v56 }
 0x301   : > { %v3293_v60 = vadd.f32 %v6988_v26, %v3179_v40  ;;  %v3730_v35 = vadd.f32 %v3729_v8, %v3616_v19  ;;  %v7171_v10 = vld [vmem:[#allocation2 + $0x1c0] sm:$0xff]  ;;  %v7181_v12 = vpop.f32.mrf.mxu2 }
 0x302   : > { %4829 = vmatmul.msk.f32.gmra.mxu3 %vm231_vm0, %v7026_v5  ;;  %v3808_v17 = vld [vmem:[#allocation3 + $0x50] sm:$0xff] }
 0x303   : > { %3366 = vst.msk [vmem:[#allocation3 + $0x58] sm:$0xff] %vm231_vm0, %v3293_v60  ;;  %v3839_v4 = vadd.f32 %v3807_v30, %v3730_v35  ;;  %3226 = vmatmul.f32.gmra.mxu0 %v7171_v10  ;;  %3663 = vmatmul.f32.gmra.mxu1 %v7171_v10 }
 0x304   : > { %4866 = vmatmul.msk.f32.gmra.mxu2 %vm231_vm0, %v3911_v58  ;;  %v3894_v58 = vld [vmem:[#allocation2 + $0x50] sm:$0xff] }
 0x305   : > { %3871 = vst.msk [vmem:[#allocation3 + $0x48] sm:$0xff] %vm231_vm0, %v3839_v4  ;;  %v3735_v26 = vpop.f32.mrf.mxu3 }
 0x307   : > { %v7184_v14 = vld [vmem:[#allocation2 + $0x1d0] sm:$0xff] }
 0x308   : > { %v3182_v34 = vpop.f32.mrf.mxu0  ;;  %v3619_v52 = vpop.f32.mrf.mxu1 }
 0x309   : > { %v3296_v42 = vadd.f32 %v7017_v22, %v3182_v34  ;;  %v3733_v5 = vadd.f32 %v3732_v7, %v3619_v52  ;;  %v2695_v15 = vpop.permute.xlu2 %2694  ;;  %v7194_v18 = vpop.f32.mrf.mxu2  ;;  %v3919_v7 = vld [vmem:[#allocation2 + $0x118] sm:$0xff]  ;;  %v3921_v52 = vld [vmem:[#allocation2 + $0x128] sm:$0xff] }
 0x30a   : > { %2760 = vst.msk [vmem:[#allocation2 + $0x210] sm:$0xff] %vm638_vm8, %v2695_v15  ;;  %4830 = vmatmul.msk.f32.gmra.mxu3 %vm231_vm0, %v7045_v23  ;;  %v3809_v46 = vld [vmem:[#allocation3 + $0x58] sm:$0xff] }
 0x30b   : > { %3367 = vst.msk [vmem:[#allocation3 + $0x60] sm:$0xff] %vm231_vm0, %v3296_v42  ;;  %v3840_v33 = vadd.f32 %v3808_v17, %v3733_v5  ;;  %3229 = vmatmul.f32.gmra.mxu0 %v7184_v14  ;;  %3666 = vmatmul.f32.gmra.mxu1 %v7184_v14 }
 0x30c   : > { %4867 = vmatmul.msk.f32.gmra.mxu2 %vm231_vm0, %v3913_v50 }
 0x30d   : > { %3872 = vst.msk [vmem:[#allocation3 + $0x50] sm:$0xff] %vm231_vm0, %v3840_v33  ;;  %v3738_v22 = vpop.f32.mrf.mxu3 }
 0x310   : > { %v3185_v25 = vpop.f32.mrf.mxu0  ;;  %v3622_v53 = vpop.f32.mrf.mxu1 }
 0x311   : > { %v3299_v20 = vadd.f32 %v7038_v39, %v3185_v25  ;;  %v3736_v23 = vadd.f32 %v3735_v26, %v3622_v53  ;;  %v2691_v21 = vpop.permute.xlu0 %2690  ;;  %v7215_v55 = vpop.f32.mrf.mxu2  ;;  %v7238_v4 = vld [vmem:[#allocation2 + $0x210] sm:$0xff]  ;;  %v7240_v26 = vld [vmem:[#allocation2] sm:$0xff] }
 0x312   : > { %2758 = vst.msk [vmem:[#allocation2 + $0x1f0] sm:$0xff] %vm638_vm8, %v2691_v21  ;;  %4831 = vmatmul.msk.f32.gmra.mxu3 %vm231_vm0, %v7065_v32  ;;  %v3810_v54 = vld [vmem:[#allocation3 + $0x60] sm:$0xff]  ;;  %v3896_v25 = vld [vmem:[#allocation2 + $0x60] sm:$0xff] }
 0x313   : > { %3368 = vst.msk [vmem:[#allocation3 + $0x68] sm:$0xff] %vm231_vm0, %v3299_v20  ;;  %v3841_v28 = vadd.f32 %v3809_v46, %v3736_v23  ;;  %3232 = vmatmul.f32.gmra.mxu0 %v7198_v36  ;;  %3669 = vmatmul.f32.gmra.mxu1 %v7198_v36  ;;  %v3923_v20 = vld [vmem:[#allocation2 + $0x138] sm:$0xff] }
 0x314   : > { %4868 = vmatmul.msk.f32.gmra.mxu2 %vm231_vm0, %v3915_v0 }
 0x315   : > { %3873 = vst.msk [vmem:[#allocation3 + $0x58] sm:$0xff] %vm231_vm0, %v3841_v28  ;;  %v3741_v39 = vpop.f32.mrf.mxu3 }
 0x318   : > { %v3188_v51 = vpop.f32.mrf.mxu0  ;;  %v3625_v44 = vpop.f32.mrf.mxu1 }
 0x319   : > { %v3302_v59 = vadd.f32 %v7059_v13, %v3188_v51  ;;  %v3739_v49 = vadd.f32 %v3738_v22, %v3625_v44  ;;  %v2693_v38 = vpop.permute.xlu1 %2692  ;;  %v7208_v32 = vld [vmem:[#allocation2 + $0x1f0] sm:$0xff]  ;;  %v3917_v13 = vld [vmem:[#allocation2 + $0x108] sm:$0xff] }
 0x31a   : > { %2759 = vst.msk [vmem:[#allocation2 + $0x200] sm:$0xff] %vm638_vm8, %v2693_v38  ;;  %4832 = vmatmul.msk.f32.gmra.mxu3 %vm231_vm0, %v7210_v24  ;;  %v3811_v27 = vld [vmem:[#allocation3 + $0x68] sm:$0xff]  ;;  %v3898_v51 = vld [vmem:[#allocation2 + $0x70] sm:$0xff] }
 0x31b   : > { %3369 = vst.msk [vmem:[#allocation3 + $0x70] sm:$0xff] %vm231_vm0, %v3302_v59  ;;  %v3842_v47 = vadd.f32 %v3810_v54, %v3739_v49  ;;  %3235 = vmatmul.f32.gmra.mxu0 %v7208_v32  ;;  %3672 = vmatmul.f32.gmra.mxu1 %v7208_v32  ;;  %v3925_v59 = vld [vmem:[#allocation2 + $0x148] sm:$0xff] }
 0x31c   : > { %4869 = vmatmul.msk.f32.gmra.mxu2 %vm231_vm0, %v3917_v13 }
 0x31d   : > { %3874 = vst.msk [vmem:[#allocation3 + $0x60] sm:$0xff] %vm231_vm0, %v3842_v47  ;;  %v3744_v8 = vpop.f32.mrf.mxu3 }
 0x320   : > { %v3191_v61 = vpop.f32.mrf.mxu0  ;;  %v3628_v43 = vpop.f32.mrf.mxu1 }
 0x321   : > { %v3305_v2 = vadd.f32 %v7076_v57, %v3191_v61  ;;  %v3742_v16 = vadd.f32 %v3741_v39, %v3628_v43  ;;  %v7223_v1 = vld [vmem:[#allocation2 + $0x200] sm:$0xff]  ;;  %v7233_v57 = vpop.f32.mrf.mxu2 }
 0x322   : > { %4833 = vmatmul.msk.f32.gmra.mxu3 %vm231_vm0, %v7225_v29  ;;  %v3812_v30 = vld [vmem:[#allocation3 + $0x70] sm:$0xff] }
 0x323   : > { %3370 = vst.msk [vmem:[#allocation3 + $0x78] sm:$0xff] %vm231_vm0, %v3305_v2  ;;  %v3843_v45 = vadd.f32 %v3811_v27, %v3742_v16  ;;  %3238 = vmatmul.f32.gmra.mxu0 %v7223_v1  ;;  %3675 = vmatmul.f32.gmra.mxu1 %v7223_v1  ;;  %v3927_v2 = vld [vmem:[#allocation2 + $0x158] sm:$0xff] }
 0x324   : > { %4870 = vmatmul.msk.f32.gmra.mxu2 %vm231_vm0, %v3919_v7 }
 0x325   : > { %3875 = vst.msk [vmem:[#allocation3 + $0x68] sm:$0xff] %vm231_vm0, %v3843_v45  ;;  %v3747_v62 = vpop.f32.mrf.mxu3 }
 0x328   : > { %v3194_v40 = vpop.f32.mrf.mxu0  ;;  %v3631_v19 = vpop.f32.mrf.mxu1 }
 0x329   : > { %v3308_v60 = vadd.f32 %v7089_v3, %v3194_v40  ;;  %v3745_v35 = vadd.f32 %v3744_v8, %v3631_v19  ;;  %v2697_v56 = vpop.permute.xlu0 %2696  ;;  %v7247_v42 = vpop.f32.mrf.mxu2  ;;  %v3900_v8 = vld [vmem:[#allocation2 + $0x80] sm:$0xff]  ;;  %v3902_v40 = vld [vmem:[#allocation2 + $0x90] sm:$0xff] }
 0x32a   : > { %2761 = vst.msk [vmem:[#allocation2 + $0x220] sm:$0xff] %vm638_vm8, %v2697_v56  ;;  %4291 = vmatmul.f32.vlgmr.msrb.gmra.mxu3 %v7240_v26  ;;  %v3813_v22 = vld [vmem:[#allocation3 + $0x78] sm:$0xff] }
 0x32b   : > { %3371 = vst.msk [vmem:[#allocation3 + $0x80] sm:$0xff] %vm231_vm0, %v3308_v60  ;;  %v3844_v34 = vadd.f32 %v3812_v30, %v3745_v35  ;;  %3678 = vmatmul.f32.gmra.mxu1 %v7238_v4  ;;  %4085 = vmatmul.f32.vlgmr.msra.gmra.mxu0 %v3894_v58  ;;  %v3929_v60 = vld [vmem:[#allocation2 + $0x168] sm:$0xff] }
 0x32c   : > { %4871 = vmatmul.msk.f32.gmra.mxu2 %vm231_vm0, %v3921_v52 }
 0x32d   : > { %3876 = vst.msk [vmem:[#allocation3 + $0x70] sm:$0xff] %vm231_vm0, %v3844_v34  ;;  %v3750_v3 = vpop.f32.mrf.mxu3 }
 0x330   : > { %v3197_v5 = vpop.f32.mrf.mxu0  ;;  %v3634_v15 = vpop.f32.mrf.mxu1 }
 0x331   : > { %v3311_v17 = vadd.f32 %v7103_v11, %v3197_v5  ;;  %v3748_v33 = vadd.f32 %v3747_v62, %v3634_v15  ;;  %v7250_v50 = vld [vmem:[#allocation2 + $0x220] sm:$0xff]  ;;  %v7256_v11 = vpop.f32.mrf.mxu2  ;;  %v3931_v15 = vld [vmem:[#allocation2 + $0x178] sm:$0xff] }
 0x332   : > { %v3814_v39 = vld [vmem:[#allocation3 + $0x80] sm:$0xff] }
 0x333   : > { %3372 = vst.msk [vmem:[#allocation3 + $0x88] sm:$0xff] %vm231_vm0, %v3311_v17  ;;  %v3845_v53 = vadd.f32 %v3813_v22, %v3748_v33  ;;  %3681 = vmatmul.f32.gmra.mxu1 %v7250_v50  ;;  %4088 = vmatmul.f32.gmra.mxu0 %v3896_v25 }
 0x334   : > { %4872 = vmatmul.msk.f32.gmra.mxu2 %vm231_vm0, %v3923_v20 }
 0x335   : > { %3877 = vst.msk [vmem:[#allocation3 + $0x78] sm:$0xff] %vm231_vm0, %v3845_v53  ;;  %v3753_v23 = vpop.f32.mrf.mxu3 }
 0x338   : > { %v3200_v21 = vpop.f32.mrf.mxu0  ;;  %v3637_v46 = vpop.f32.mrf.mxu1 }
 0x339   : > { %v3314_v28 = vadd.f32 %v7116_v41, %v3200_v21  ;;  %v3751_v0 = vadd.f32 %v3750_v3, %v3637_v46  ;;  %v7264_v61 = vpop.f32.mrf.mxu2  ;;  %v3904_v3 = vld [vmem:[#allocation2 + $0xa0] sm:$0xff]  ;;  %v3933_v46 = vld [vmem:[#allocation2 + $0x188] sm:$0xff] }
 0x33a   : > { %v3815_v13 = vld [vmem:[#allocation3 + $0x88] sm:$0xff] }
 0x33b   : > { %3373 = vst.msk [vmem:[#allocation3 + $0x90] sm:$0xff] %vm231_vm0, %v3314_v28  ;;  %v3846_v44 = vadd.f32 %v3814_v39, %v3751_v0  ;;  %4091 = vmatmul.f32.gmra.mxu0 %v3898_v51  ;;  %4178 = vmatmul.f32.vlgmr.msrb.gmra.mxu1 %v7240_v26 }
 0x33c   : > { %4873 = vmatmul.msk.f32.gmra.mxu2 %vm231_vm0, %v3925_v59 }
 0x33d   : > { %3878 = vst.msk [vmem:[#allocation3 + $0x80] sm:$0xff] %vm231_vm0, %v3846_v44  ;;  %v3756_v49 = vpop.f32.mrf.mxu3 }
 0x340   : > { %v3203_v38 = vpop.f32.mrf.mxu0  ;;  %v3640_v54 = vpop.f32.mrf.mxu1 }
 0x341   : > { %v3317_v47 = vadd.f32 %v7125_v6, %v3203_v38  ;;  %v3754_v41 = vadd.f32 %v3753_v23, %v3640_v54  ;;  %v7272_v35 = vpop.f32.mrf.mxu2  ;;  %v3906_v23 = vld [vmem:[#allocation2 + $0xb0] sm:$0xff]  ;;  %v3935_v54 = vld [vmem:[#allocation2 + $0x198] sm:$0xff] }
 0x342   : > { %v3816_v62 = vld [vmem:[#allocation3 + $0x90] sm:$0xff] }
 0x343   : > { %3374 = vst.msk [vmem:[#allocation3 + $0x98] sm:$0xff] %vm231_vm0, %v3317_v47  ;;  %v3847_v43 = vadd.f32 %v3815_v13, %v3754_v41  ;;  %4094 = vmatmul.f32.gmra.mxu0 %v3900_v8 }
 0x344   : > { %4874 = vmatmul.msk.f32.gmra.mxu2 %vm231_vm0, %v3927_v2 }
 0x345   : > { %3879 = vst.msk [vmem:[#allocation3 + $0x88] sm:$0xff] %vm231_vm0, %v3847_v43  ;;  %v3759_v16 = vpop.f32.mrf.mxu3 }
 0x348   : > { %v3206_v27 = vpop.f32.mrf.mxu0  ;;  %v3643_v45 = vpop.f32.mrf.mxu1 }
 0x349   : > { %v3320_v7 = vadd.f32 %v7147_v31, %v3206_v27  ;;  %v3757_v6 = vadd.f32 %v3756_v49, %v3643_v45  ;;  %v7279_v33 = vpop.f32.mrf.mxu2  ;;  %v3908_v49 = vld [vmem:[#allocation2 + $0xc0] sm:$0xff]  ;;  %v3937_v45 = vld [vmem:[#allocation2 + $0x1a8] sm:$0xff] }
 0x34a   : > { %v3817_v52 = vld [vmem:[#allocation3 + $0x98] sm:$0xff] }
 0x34b   : > { %3375 = vst.msk [vmem:[#allocation3 + $0xa0] sm:$0xff] %vm231_vm0, %v3320_v7  ;;  %v3848_v19 = vadd.f32 %v3816_v62, %v3757_v6  ;;  %4097 = vmatmul.f32.gmra.mxu0 %v3902_v40 }
 0x34c   : > { %4875 = vmatmul.msk.f32.gmra.mxu2 %vm231_vm0, %v3929_v60  ;;  %v3912_v60 = vld [vmem:[#allocation2 + $0xe0] sm:$0xff] }
 0x34d   : > { %3880 = vst.msk [vmem:[#allocation3 + $0x90] sm:$0xff] %vm231_vm0, %v3848_v19  ;;  %v3762_v56 = vpop.f32.mrf.mxu3 }
 0x350   : > { %v3209_v30 = vpop.f32.mrf.mxu0  ;;  %v3646_v58 = vpop.f32.mrf.mxu1 }
 0x351   : > { %v3323_v34 = vadd.f32 %v7164_v9, %v3209_v30  ;;  %v3760_v31 = vadd.f32 %v3759_v16, %v3646_v58  ;;  %v7285_v51 = vpop.f32.mrf.mxu2  ;;  %v3939_v30 = vld [vmem:[#allocation2 + $0x1b8] sm:$0xff] }
 0x352   : > { %v3818_v20 = vld [vmem:[#allocation3 + $0xa0] sm:$0xff] }
 0x353   : > { %3376 = vst.msk [vmem:[#allocation3 + $0xa8] sm:$0xff] %vm231_vm0, %v3323_v34  ;;  %v3849_v5 = vadd.f32 %v3817_v52, %v3760_v31  ;;  %4100 = vmatmul.f32.gmra.mxu0 %v3904_v3 }
 0x354   : > { %4876 = vmatmul.msk.f32.gmra.mxu2 %vm231_vm0, %v3931_v15  ;;  %v3914_v15 = vld [vmem:[#allocation2 + $0xf0] sm:$0xff] }
 0x355   : > { %3881 = vst.msk [vmem:[#allocation3 + $0x98] sm:$0xff] %vm231_vm0, %v3849_v5  ;;  %v3765_v17 = vpop.f32.mrf.mxu3 }
 0x358   : > { %v3212_v22 = vpop.f32.mrf.mxu0  ;;  %v3649_v25 = vpop.f32.mrf.mxu1 }
 0x359   : > { %v3326_v53 = vadd.f32 %v7181_v12, %v3212_v22  ;;  %v3763_v9 = vadd.f32 %v3762_v56, %v3649_v25  ;;  %v7292_v16 = vpop.f32.mrf.mxu2  ;;  %v3941_v22 = vld [vmem:[#allocation2 + $0x1c8] sm:$0xff] }
 0x35a   : > { %v3819_v59 = vld [vmem:[#allocation3 + $0xa8] sm:$0xff] }
 0x35b   : > { %3377 = vst.msk [vmem:[#allocation3 + $0xb0] sm:$0xff] %vm231_vm0, %v3326_v53  ;;  %v3850_v21 = vadd.f32 %v3818_v20, %v3763_v9  ;;  %4103 = vmatmul.f32.gmra.mxu0 %v3906_v23 }
 0x35c   : > { %4877 = vmatmul.msk.f32.gmra.mxu2 %vm231_vm0, %v3933_v46  ;;  %v3916_v46 = vld [vmem:[#allocation2 + $0x100] sm:$0xff] }
 0x35d   : > { %3882 = vst.msk [vmem:[#allocation3 + $0xa0] sm:$0xff] %vm231_vm0, %v3850_v21  ;;  %v3768_v28 = vpop.f32.mrf.mxu3 }
 0x360   : > { %v3215_v0 = vpop.f32.mrf.mxu0  ;;  %v3652_v39 = vpop.f32.mrf.mxu1 }
 0x361   : > { %v3329_v44 = vadd.f32 %v7194_v18, %v3215_v0  ;;  %v3766_v12 = vadd.f32 %v3765_v17, %v3652_v39  ;;  %v3910_v18 = vld [vmem:[#allocation2 + $0xd0] sm:$0xff]  ;;  %v7300_v58 = vpop.f32.mrf.mxu2  ;;  %v3943_v0 = vld [vmem:[#allocation2 + $0x1d8] sm:$0xff] }
 0x362   : > { %v3820_v2 = vld [vmem:[#allocation3 + $0xb0] sm:$0xff] }
 0x363   : > { %3378 = vst.msk [vmem:[#allocation3 + $0xb8] sm:$0xff] %vm231_vm0, %v3329_v44  ;;  %v3851_v38 = vadd.f32 %v3819_v59, %v3766_v12  ;;  %4106 = vmatmul.f32.gmra.mxu0 %v3908_v49 }
 0x364   : > { %4878 = vmatmul.msk.f32.gmra.mxu2 %vm231_vm0, %v3935_v54  ;;  %v3918_v54 = vld [vmem:[#allocation2 + $0x110] sm:$0xff] }
 0x365   : > { %3883 = vst.msk [vmem:[#allocation3 + $0xa8] sm:$0xff] %vm231_vm0, %v3851_v38  ;;  %v3771_v47 = vpop.f32.mrf.mxu3 }
 0x368   : > { %v3218_v41 = vpop.f32.mrf.mxu0  ;;  %v3655_v13 = vpop.f32.mrf.mxu1 }
 0x369   : > { %v3332_v8 = vadd.f32 %v7215_v55, %v3218_v41  ;;  %v3769_v43 = vadd.f32 %v3768_v28, %v3655_v13  ;;  %v7307_v53 = vpop.f32.mrf.mxu2  ;;  %v3945_v41 = vld [vmem:[#allocation2 + $0x1e8] sm:$0xff] }
 0x36a   : > { %v3821_v19 = vld [vmem:[#allocation3 + $0xb8] sm:$0xff] }
 0x36b   : > { %3379 = vst.msk [vmem:[#allocation3 + $0xc0] sm:$0xff] %vm231_vm0, %v3332_v8  ;;  %v3852_v27 = vadd.f32 %v3820_v2, %v3769_v43  ;;  %4109 = vmatmul.f32.gmra.mxu0 %v3910_v18 }
 0x36c   : > { %4879 = vmatmul.msk.f32.gmra.mxu2 %vm231_vm0, %v3937_v45 }
 0x36d   : > { %3884 = vst.msk [vmem:[#allocation3 + $0xb0] sm:$0xff] %vm231_vm0, %v3852_v27  ;;  %v3774_v7 = vpop.f32.mrf.mxu3 }
 0x370   : > { %v3221_v6 = vpop.f32.mrf.mxu0  ;;  %v3658_v62 = vpop.f32.mrf.mxu1 }
 0x371   : > { %v3335_v40 = vadd.f32 %v7233_v57, %v3221_v6  ;;  %v3772_v55 = vadd.f32 %v3771_v47, %v3658_v62  ;;  %v7313_v59 = vpop.f32.mrf.mxu2  ;;  %v3947_v6 = vld [vmem:[#allocation2 + $0x1f8] sm:$0xff] }
 0x372   : > { %v3822_v5 = vld [vmem:[#allocation3 + $0xc0] sm:$0xff] }
 0x373   : > { %3380 = vst.msk [vmem:[#allocation3 + $0xc8] sm:$0xff] %vm231_vm0, %v3335_v40  ;;  %v3853_v56 = vadd.f32 %v3821_v19, %v3772_v55  ;;  %4112 = vmatmul.f32.gmra.mxu0 %v3912_v60 }
 0x374   : > { %4880 = vmatmul.msk.f32.gmra.mxu2 %vm231_vm0, %v3939_v30 }
 0x375   : > { %3885 = vst.msk [vmem:[#allocation3 + $0xb8] sm:$0xff] %vm231_vm0, %v3853_v56  ;;  %v3777_v34 = vpop.f32.mrf.mxu3  ;;  %v3922_v56 = vld [vmem:[#allocation2 + $0x130] sm:$0xff] }
 0x378   : > { %v3224_v31 = vpop.f32.mrf.mxu0  ;;  %v3661_v52 = vpop.f32.mrf.mxu1 }
 0x379   : > { %v3338_v3 = vadd.f32 %v7247_v42, %v3224_v31  ;;  %v3775_v57 = vadd.f32 %v3774_v7, %v3661_v52  ;;  %v7320_v45 = vpop.f32.mrf.mxu2 }
 0x37a   : > { %v3823_v21 = vld [vmem:[#allocation3 + $0xc8] sm:$0xff] }
 0x37b   : > { %3381 = vst.msk [vmem:[#allocation3 + $0xd0] sm:$0xff] %vm231_vm0, %v3338_v3  ;;  %v3854_v17 = vadd.f32 %v3822_v5, %v3775_v57  ;;  %4115 = vmatmul.f32.gmra.mxu0 %v3914_v15  ;;  %v3924_v15 = vld [vmem:[#allocation2 + $0x140] sm:$0xff] }
 0x37c   : > { %4881 = vmatmul.msk.f32.gmra.mxu2 %vm231_vm0, %v3941_v22 }
 0x37d   : > { %3886 = vst.msk [vmem:[#allocation3 + $0xc0] sm:$0xff] %vm231_vm0, %v3854_v17  ;;  %v3780_v25 = vpop.f32.mrf.mxu3 }
 0x380   : > { %v3227_v9 = vpop.f32.mrf.mxu0  ;;  %v3664_v20 = vpop.f32.mrf.mxu1 }
 0x381   : > { %v3341_v23 = vadd.f32 %v7256_v11, %v3227_v9  ;;  %v3778_v42 = vadd.f32 %v3777_v34, %v3664_v20  ;;  %v3949_v34 = vld [vmem:[#allocation2 + $0x208] sm:$0xff]  ;;  %v7328_v31 = vpop.f32.mrf.mxu2 }
 0x382   : > { %v3824_v38 = vld [vmem:[#allocation3 + $0xd0] sm:$0xff] }
 0x383   : > { %3382 = vst.msk [vmem:[#allocation3 + $0xd8] sm:$0xff] %vm231_vm0, %v3341_v23  ;;  %v3855_v28 = vadd.f32 %v3823_v21, %v3778_v42  ;;  %4118 = vmatmul.f32.gmra.mxu0 %v3916_v46  ;;  %v4295_v21 = vld [vmem:[#allocation3] sm:$0xff] }
 0x384   : > { %4882 = vmatmul.msk.f32.gmra.mxu2 %vm231_vm0, %v3943_v0  ;;  %v3926_v46 = vld [vmem:[#allocation2 + $0x150] sm:$0xff] }
 0x385   : > { %3887 = vst.msk [vmem:[#allocation3 + $0xc8] sm:$0xff] %vm231_vm0, %v3855_v28  ;;  %v3783_v39 = vpop.f32.mrf.mxu3 }
 0x388   : > { %v3230_v44 = vpop.f32.mrf.mxu0  ;;  %v3667_v12 = vpop.f32.mrf.mxu1 }
 0x389   : > { %v3344_v49 = vadd.f32 %v7264_v61, %v3230_v44  ;;  %v3781_v11 = vadd.f32 %v3780_v25, %v3667_v12  ;;  %v3920_v61 = vld [vmem:[#allocation2 + $0x120] sm:$0xff]  ;;  %v7336_v25 = vpop.f32.mrf.mxu2 }
 0x38a   : > { %v3825_v27 = vld [vmem:[#allocation3 + $0xd8] sm:$0xff] }
 0x38b   : > { %3383 = vst.msk [vmem:[#allocation3 + $0xe0] sm:$0xff] %vm231_vm0, %v3344_v49  ;;  %v3856_v47 = vadd.f32 %v3824_v38, %v3781_v11  ;;  %4121 = vmatmul.f32.gmra.mxu0 %v3918_v54  ;;  %v4296_v49 = vld [vmem:[#allocation3 + $0x8] sm:$0xff]  ;;  %v3928_v54 = vld [vmem:[#allocation2 + $0x160] sm:$0xff] }
 0x38c   : > { %4883 = vmatmul.msk.f32.gmra.mxu2 %vm231_vm0, %v3945_v41 }
 0x38d   : > { %3888 = vst.msk [vmem:[#allocation3 + $0xd0] sm:$0xff] %vm231_vm0, %v3856_v47  ;;  %v3786_v13 = vpop.f32.mrf.mxu3 }
 0x390   : > { %v3233_v8 = vpop.f32.mrf.mxu0  ;;  %v3670_v43 = vpop.f32.mrf.mxu1 }
 0x391   : > { %v3347_v2 = vadd.f32 %v7272_v35, %v3233_v8  ;;  %v3784_v18 = vadd.f32 %v3783_v39, %v3670_v43  ;;  %v7345_v11 = vpop.f32.mrf.mxu2  ;;  %v4967_v43 = vld [vmem:[%s5183_s13] sm:$0xff] }
 0x392   : > { %v3826_v60 = vld [vmem:[#allocation3 + $0xe0] sm:$0xff] }
 0x393   : > { %3384 = vst.msk [vmem:[#allocation3 + $0xe8] sm:$0xff] %vm231_vm0, %v3347_v2  ;;  %v3857_v7 = vadd.f32 %v3825_v27, %v3784_v18  ;;  %4124 = vmatmul.f32.gmra.mxu0 %v3920_v61 }
 0x394   : > { %4884 = vmatmul.msk.f32.gmra.mxu2 %vm231_vm0, %v3947_v6  ;;  %v4297_v6 = vld [vmem:[#allocation3 + $0x10] sm:$0xff] }
 0x395   : > { %3889 = vst.msk [vmem:[#allocation3 + $0xd8] sm:$0xff] %vm231_vm0, %v3857_v7  ;;  %v3789_v35 = vpop.f32.mrf.mxu3 }
 0x398   : > { %v3236_v62 = vpop.f32.mrf.mxu0  ;;  %v3673_v40 = vpop.f32.mrf.mxu1 }
 0x399   : > { %v3350_v55 = vadd.f32 %v7279_v33, %v3236_v62  ;;  %v3787_v19 = vadd.f32 %v3786_v13, %v3673_v40  ;;  %v3930_v62 = vld [vmem:[#allocation2 + $0x170] sm:$0xff] }
 0x39a   : > { %v3827_v5 = vld [vmem:[#allocation3 + $0xe8] sm:$0xff] }
 0x39b   : > { %3385 = vst.msk [vmem:[#allocation3 + $0xf0] sm:$0xff] %vm231_vm0, %v3350_v55  ;;  %v3858_v30 = vadd.f32 %v3826_v60, %v3787_v19  ;;  %4127 = vmatmul.f32.gmra.mxu0 %v3922_v56  ;;  %v7364_v55 = vpop.f32.mrf.mxu2  ;;  %v4968_v56 = vld [vmem:[%s5183_s13 + $0x8] sm:$0xff] }
 0x39c   : > { %4885 = vmatmul.msk.f32.gmra.mxu2 %vm231_vm0, %v3949_v34 }
 0x39d   : > { %3890 = vst.msk [vmem:[#allocation3 + $0xe0] sm:$0xff] %vm231_vm0, %v3858_v30  ;;  %v3792_v22 = vpop.f32.mrf.mxu3 }
 0x3a0   : > { %v3239_v52 = vpop.f32.mrf.mxu0  ;;  %v3676_v3 = vpop.f32.mrf.mxu1 }
 0x3a1   : > { %v3353_v57 = vadd.f32 %v7285_v51, %v3239_v52  ;;  %v3790_v33 = vadd.f32 %v3789_v35, %v3676_v3  ;;  %v4298_v3 = vld [vmem:[#allocation3 + $0x18] sm:$0xff] }
 0x3a2   : > { %v3828_v42 = vld [vmem:[#allocation3 + $0xf0] sm:$0xff] }
 0x3a3   : > { %3386 = vst.msk [vmem:[#allocation3 + $0xf8] sm:$0xff] %vm231_vm0, %v3353_v57  ;;  %v3859_v17 = vadd.f32 %v3827_v5, %v3790_v33  ;;  %4130 = vmatmul.f32.gmra.mxu0 %v3924_v15  ;;  %v3932_v57 = vld [vmem:[#allocation2 + $0x180] sm:$0xff] }
 0x3a4   : > { %4886 = vmatmul.msk.f32.gmra.mxu2 %vm231_vm0, %v7210_v24 }
 0x3a5   : > { %3891 = vst.msk [vmem:[#allocation3 + $0xe8] sm:$0xff] %vm231_vm0, %v3859_v17  ;;  %v3795_v24 = vpop.f32.mrf.mxu3  ;;  %v7375_v17 = vpop.f32.mrf.mxu2 }
 0x3a8   : > { %v3679_v9 = vpop.f32.mrf.mxu1  ;;  %v4086_v20 = vpop.f32.mrf.mxu0 }
 0x3a9   : > { %v3793_v23 = vadd.f32 %v3792_v22, %v3679_v9  ;;  %v4200_v51 = vadd.f32 %v7292_v16, %v4086_v20  ;;  %v4969_v9 = vld [vmem:[%s5183_s13 + $0x10] sm:$0xff] }
 0x3aa   : > { %v3829_v38 = vld [vmem:[#allocation3 + $0xf8] sm:$0xff] }
 0x3ab   : > { %v3860_v28 = vadd.f32 %v3828_v42, %v3793_v23  ;;  %v4327_v0 = vadd.f32 %v4295_v21, %v4200_v51  ;;  %4133 = vmatmul.f32.gmra.mxu0 %v3926_v46  ;;  %v4970_v51 = vld [vmem:[%s5183_s13 + $0xf8] sm:$0xff]  ;;  %v4299_v46 = vld [vmem:[#allocation3 + $0x20] sm:$0xff] }
 0x3ac   : > { %4887 = vmatmul.msk.f32.gmra.mxu2 %vm231_vm0, %v7225_v29  ;;  %v7350_v29 = vld [vmem:[%s7578_s4] ss:$0 sm:$0xff] }
 0x3ad   : > { %3892 = vst.msk [vmem:[#allocation3 + $0xf0] sm:$0xff] %vm231_vm0, %v3860_v28  ;;  %v4292_v8 = vpop.f32.mrf.mxu3 }
 0x3ae   : > { %4359 = vst.msk [vmem:[#allocation3] sm:$0xff] %vm231_vm0, %v4327_v0 }
 0x3b0   : > { %v3682_v39 = vpop.f32.mrf.mxu1  ;;  %v4089_v44 = vpop.f32.mrf.mxu0 }
 0x3b1   : > { %v3796_v12 = vadd.f32 %v3795_v24, %v3682_v39  ;;  %v4203_v16 = vadd.f32 %v7300_v58, %v4089_v44  ;;  %v4971_v39 = vld [vmem:[%s5183_s13 + $0x18] sm:$0xff] }
 0x3b3   : > { %v3861_v47 = vadd.f32 %v3829_v38, %v3796_v12  ;;  %v4328_v41 = vadd.f32 %v4296_v49, %v4203_v16  ;;  %4136 = vmatmul.f32.gmra.mxu0 %v3928_v54  ;;  %v4229_v12 = vpop.f32.mrf.mxu2  ;;  %v4300_v49 = vld [vmem:[#allocation3 + $0x28] sm:$0xff] }
 0x3b4   : > { %4288 = vmatmul.f32.gmra.mxu2 %v7240_v26 }
 0x3b5   : > { %v4391_v13 = vld [vmem:[#allocation3] sm:$0xff]  ;;  %3893 = vst.msk [vmem:[#allocation3 + $0xf8] sm:$0xff] %vm231_vm0, %v3861_v47  ;;  %v4972_v47 = vld [vmem:[%s5183_s13 + $0x20] sm:$0xff] }
 0x3b6   : > { %v4427_v58 = vadd.f32 %v7350_v29, %v4391_v13  ;;  %4360 = vst.msk [vmem:[#allocation3 + $0x8] sm:$0xff] %vm231_vm0, %v4328_v41 }
 0x3b8   : > { %v4459_v2 = vadd.f32 %v4967_v43, %v4427_v58  ;;  %v4092_v18 = vpop.f32.mrf.mxu0  ;;  %v4179_v27 = vpop.f32.mrf.mxu1 }
 0x3b9   : > { %v4206_v61 = vadd.f32 %v7307_v53, %v4092_v18  ;;  %v4293_v7 = vadd.f32 %v4292_v8, %v4179_v27  ;;  %v4973_v18 = vld [vmem:[%s5183_s13 + $0x28] sm:$0xff] }
 0x3ba   : > { %4491 = vst.msk [vmem:[%s7360_s7] sm:$0xff] %vm231_vm0, %v4459_v2 }
 0x3bb   : > { %v4329_v40 = vadd.f32 %v4297_v6, %v4206_v61  ;;  %4139 = vmatmul.f32.gmra.mxu0 %v3930_v62  ;;  %v4232_v8 = vpop.f32.mrf.mxu2 }
 0x3bc   : > { %v4326_v19 = vld [vmem:[#allocation3 + $0xf8] sm:$0xff] }
 0x3bd   : > { %v4392_v35 = vld [vmem:[#allocation3 + $0x8] sm:$0xff]  ;;  %4361 = vst.msk [vmem:[#allocation3 + $0x10] sm:$0xff] %vm231_vm0, %v4329_v40  ;;  %v4358_v60 = vadd.f32 %v4326_v19, %v4293_v7  ;;  %v4974_v19 = vld [vmem:[%s5183_s13 + $0x30] sm:$0xff] }
 0x3be   : > { %v4428_v53 = vadd.f32 %v7350_v29, %v4392_v35 }
 0x3bf   : > { %4390 = vst.msk [vmem:[#allocation3 + $0xf8] sm:$0xff] %vm231_vm0, %v4358_v60 }
 0x3c0   : > { %v4460_v30 = vadd.f32 %v4968_v56, %v4428_v53  ;;  %v4095_v34 = vpop.f32.mrf.mxu0 }
 0x3c1   : > { %v4209_v52 = vadd.f32 %v7313_v59, %v4095_v34 }
 0x3c2   : > { %4492 = vst.msk [vmem:[%s7360_s7 + $0x8] sm:$0xff] %vm231_vm0, %v4460_v30 }
 0x3c3   : > { %v4330_v33 = vadd.f32 %v4298_v3, %v4209_v52  ;;  %4142 = vmatmul.f32.gmra.mxu0 %v3932_v57  ;;  %v4235_v62 = vpop.f32.mrf.mxu2  ;;  %v4975_v52 = vld [vmem:[%s5183_s13 + $0x38] sm:$0xff] }
 0x3c4   : > { %v4393_v5 = vld [vmem:[#allocation3 + $0x10] sm:$0xff] }
 0x3c5   : > { %v4429_v15 = vadd.f32 %v7350_v29, %v4393_v5  ;;  %4362 = vst.msk [vmem:[#allocation3 + $0x18] sm:$0xff] %vm231_vm0, %v4330_v33 }
 0x3c6   : > { %v4422_v22 = vld [vmem:[#allocation3 + $0xf8] sm:$0xff] }
 0x3c7   : > { %v4461_v20 = vadd.f32 %v4969_v9, %v4429_v15  ;;  %v4458_v59 = vadd.f32 %v7350_v29, %v4422_v22  ;;  %v4976_v22 = vld [vmem:[%s5183_s13 + $0x40] sm:$0xff] }
 0x3c8   : > { %v4098_v23 = vpop.f32.mrf.mxu0 }
 0x3c9   : > { %4493 = vst.msk [vmem:[%s7360_s7 + $0x10] sm:$0xff] %vm231_vm0, %v4461_v20  ;;  %v4490_v42 = vadd.f32 %v4970_v51, %v4458_v59  ;;  %v4212_v21 = vadd.f32 %v7320_v45, %v4098_v23  ;;  %v4305_v51 = vld [vmem:[#allocation3 + $0x50] sm:$0xff] }
 0x3cb   : > { %4522 = vst.msk [vmem:[%s7360_s7 + $0xf8] sm:$0xff] %vm231_vm0, %v4490_v42  ;;  %v4331_v28 = vadd.f32 %v4299_v46, %v4212_v21  ;;  %4145 = vmatmul.f32.gmra.mxu0 %v7128_v63  ;;  %v4238_v34 = vpop.f32.mrf.mxu2  ;;  %v4977_v21 = vld [vmem:[%s5183_s13 + $0x48] sm:$0xff] }
 0x3cc   : > { %v4394_v0 = vld [vmem:[#allocation3 + $0x18] sm:$0xff] }
 0x3cd   : > { %v4430_v24 = vadd.f32 %v7350_v29, %v4394_v0  ;;  %4363 = vst.msk [vmem:[#allocation3 + $0x20] sm:$0xff] %vm231_vm0, %v4331_v28 }
 0x3cf   : > { %v4462_v44 = vadd.f32 %v4971_v39, %v4430_v24  ;;  %v4306_v39 = vld [vmem:[#allocation3 + $0x58] sm:$0xff] }
 0x3d0   : > { %v4101_v16 = vpop.f32.mrf.mxu0 }
 0x3d1   : > { %4494 = vst.msk [vmem:[%s7360_s7 + $0x18] sm:$0xff] %vm231_vm0, %v4462_v44  ;;  %v4215_v45 = vadd.f32 %v7328_v31, %v4101_v16  ;;  %v4301_v31 = vld [vmem:[#allocation3 + $0x30] sm:$0xff]  ;;  %v4978_v16 = vld [vmem:[%s5183_s13 + $0x50] sm:$0xff] }
 0x3d3   : > { %v4332_v38 = vadd.f32 %v4300_v49, %v4215_v45  ;;  %4148 = vmatmul.f32.gmra.mxu0 %v7142_v37  ;;  %v4241_v20 = vpop.f32.mrf.mxu2 }
 0x3d4   : > { %v4395_v63 = vld [vmem:[#allocation3 + $0x20] sm:$0xff] }
 0x3d5   : > { %v4431_v54 = vadd.f32 %v7350_v29, %v4395_v63  ;;  %4364 = vst.msk [vmem:[#allocation3 + $0x28] sm:$0xff] %vm231_vm0, %v4332_v38  ;;  %v4307_v63 = vld [vmem:[#allocation3 + $0x60] sm:$0xff] }
 0x3d7   : > { %v4463_v41 = vadd.f32 %v4972_v47, %v4431_v54 }
 0x3d8   : > { %v4104_v13 = vpop.f32.mrf.mxu0 }
 0x3d9   : > { %4495 = vst.msk [vmem:[%s7360_s7 + $0x20] sm:$0xff] %vm231_vm0, %v4463_v41  ;;  %v4218_v58 = vadd.f32 %v7336_v25, %v4104_v13  ;;  %v4302_v25 = vld [vmem:[#allocation3 + $0x38] sm:$0xff]  ;;  %v4979_v13 = vld [vmem:[%s5183_s13 + $0x58] sm:$0xff] }
 0x3db   : > { %v4333_v43 = vadd.f32 %v4301_v31, %v4218_v58  ;;  %4151 = vmatmul.f32.gmra.mxu0 %v7156_v48  ;;  %v4244_v24 = vpop.f32.mrf.mxu2 }
 0x3dc   : > { %v4396_v37 = vld [vmem:[#allocation3 + $0x28] sm:$0xff] }
 0x3dd   : > { %v4432_v2 = vadd.f32 %v7350_v29, %v4396_v37  ;;  %4365 = vst.msk [vmem:[#allocation3 + $0x30] sm:$0xff] %vm231_vm0, %v4333_v43  ;;  %v4308_v43 = vld [vmem:[#allocation3 + $0x68] sm:$0xff] }
 0x3df   : > { %v4464_v27 = vadd.f32 %v4973_v18, %v4432_v2 }
 0x3e0   : > { %v4107_v61 = vpop.f32.mrf.mxu0 }
 0x3e1   : > { %4496 = vst.msk [vmem:[%s7360_s7 + $0x28] sm:$0xff] %vm231_vm0, %v4464_v27  ;;  %v4221_v7 = vadd.f32 %v7345_v11, %v4107_v61  ;;  %v4303_v11 = vld [vmem:[#allocation3 + $0x40] sm:$0xff]  ;;  %v4980_v27 = vld [vmem:[%s5183_s13 + $0x60] sm:$0xff] }
 0x3e3   : > { %v4334_v6 = vadd.f32 %v4302_v25, %v4221_v7  ;;  %4154 = vmatmul.f32.gmra.mxu0 %v7171_v10  ;;  %v4247_v47 = vpop.f32.mrf.mxu2 }
 0x3e4   : > { %v4397_v48 = vld [vmem:[#allocation3 + $0x30] sm:$0xff] }
 0x3e5   : > { %v4433_v40 = vadd.f32 %v7350_v29, %v4397_v48  ;;  %4366 = vst.msk [vmem:[#allocation3 + $0x38] sm:$0xff] %vm231_vm0, %v4334_v6  ;;  %v4309_v6 = vld [vmem:[#allocation3 + $0x70] sm:$0xff] }
 0x3e7   : > { %v4465_v35 = vadd.f32 %v4974_v19, %v4433_v40  ;;  %v4981_v40 = vld [vmem:[%s5183_s13 + $0x68] sm:$0xff] }
 0x3e8   : > { %v4110_v60 = vpop.f32.mrf.mxu0 }
 0x3e9   : > { %4497 = vst.msk [vmem:[%s7360_s7 + $0x30] sm:$0xff] %vm231_vm0, %v4465_v35  ;;  %v4224_v53 = vadd.f32 %v7364_v55, %v4110_v60  ;;  %v4304_v55 = vld [vmem:[#allocation3 + $0x48] sm:$0xff] }
 0x3eb   : > { %v4335_v56 = vadd.f32 %v4303_v11, %v4224_v53  ;;  %4157 = vmatmul.f32.gmra.mxu0 %v7184_v14  ;;  %v4250_v18 = vpop.f32.mrf.mxu2  ;;  %v4310_v11 = vld [vmem:[#allocation3 + $0x78] sm:$0xff] }
 0x3ec   : > { %v4398_v10 = vld [vmem:[#allocation3 + $0x38] sm:$0xff] }
 0x3ed   : > { %v4434_v30 = vadd.f32 %v7350_v29, %v4398_v10  ;;  %4367 = vst.msk [vmem:[#allocation3 + $0x40] sm:$0xff] %vm231_vm0, %v4335_v56 }
 0x3ef   : > { %v4466_v3 = vadd.f32 %v4975_v52, %v4434_v30 }
 0x3f0   : > { %v4113_v57 = vpop.f32.mrf.mxu0 }
 0x3f1   : > { %4498 = vst.msk [vmem:[%s7360_s7 + $0x38] sm:$0xff] %vm231_vm0, %v4466_v3  ;;  %v4227_v33 = vadd.f32 %v7375_v17, %v4113_v57 }
 0x3f3   : > { %v4336_v5 = vadd.f32 %v4304_v55, %v4227_v33  ;;  %4160 = vmatmul.f32.gmra.mxu0 %v7198_v36  ;;  %v4253_v35 = vpop.f32.mrf.mxu2  ;;  %v4311_v33 = vld [vmem:[#allocation3 + $0x80] sm:$0xff] }
 0x3f4   : > { %v4399_v14 = vld [vmem:[#allocation3 + $0x40] sm:$0xff] }
 0x3f5   : > { %v4435_v15 = vadd.f32 %v7350_v29, %v4399_v14  ;;  %4368 = vst.msk [vmem:[#allocation3 + $0x48] sm:$0xff] %vm231_vm0, %v4336_v5 }
 0x3f7   : > { %v4467_v9 = vadd.f32 %v4976_v22, %v4435_v15  ;;  %v4983_v15 = vld [vmem:[%s5183_s13 + $0x78] sm:$0xff] }
 0x3f8   : > { %v4116_v59 = vpop.f32.mrf.mxu0 }
 0x3f9   : > { %4499 = vst.msk [vmem:[%s7360_s7 + $0x40] sm:$0xff] %vm231_vm0, %v4467_v9  ;;  %v4230_v23 = vadd.f32 %v4229_v12, %v4116_v59  ;;  %v4312_v59 = vld [vmem:[#allocation3 + $0x88] sm:$0xff] }
 0x3fb   : > { %v4337_v17 = vadd.f32 %v4305_v51, %v4230_v23  ;;  %4163 = vmatmul.f32.gmra.mxu0 %v7208_v32  ;;  %v4256_v57 = vpop.f32.mrf.mxu2 }
 0x3fc   : > { %v4400_v36 = vld [vmem:[#allocation3 + $0x48] sm:$0xff] }
 0x3fd   : > { %v4436_v42 = vadd.f32 %v7350_v29, %v4400_v36  ;;  %4369 = vst.msk [vmem:[#allocation3 + $0x50] sm:$0xff] %vm231_vm0, %v4337_v17 }
 0x3ff   : > { %v4468_v46 = vadd.f32 %v4977_v21, %v4436_v42  ;;  %v4984_v42 = vld [vmem:[%s5183_s13 + $0x80] sm:$0xff] }
 0x400   : > { %v4119_v28 = vpop.f32.mrf.mxu0 }
 0x401   : > { %4500 = vst.msk [vmem:[%s7360_s7 + $0x48] sm:$0xff] %vm231_vm0, %v4468_v46  ;;  %v4233_v0 = vadd.f32 %v4232_v8, %v4119_v28 }
 0x403   : > { %v4338_v44 = vadd.f32 %v4306_v39, %v4233_v0  ;;  %4166 = vmatmul.f32.gmra.mxu0 %v7223_v1  ;;  %v4259_v51 = vpop.f32.mrf.mxu2  ;;  %v4313_v0 = vld [vmem:[#allocation3 + $0x90] sm:$0xff] }
 0x404   : > { %v4401_v32 = vld [vmem:[#allocation3 + $0x50] sm:$0xff] }
 0x405   : > { %v4437_v12 = vadd.f32 %v7350_v29, %v4401_v32  ;;  %4370 = vst.msk [vmem:[#allocation3 + $0x58] sm:$0xff] %vm231_vm0, %v4338_v44 }
 0x407   : > { %v4469_v45 = vadd.f32 %v4978_v16, %v4437_v12  ;;  %v4985_v12 = vld [vmem:[%s5183_s13 + $0x88] sm:$0xff] }
 0x408   : > { %v4122_v49 = vpop.f32.mrf.mxu0 }
 0x409   : > { %4501 = vst.msk [vmem:[%s7360_s7 + $0x50] sm:$0xff] %vm231_vm0, %v4469_v45  ;;  %v4236_v38 = vadd.f32 %v4235_v62, %v4122_v49 }
 0x40b   : > { %v4339_v54 = vadd.f32 %v4307_v63, %v4236_v38  ;;  %4169 = vmatmul.f32.gmra.mxu0 %v7238_v4  ;;  %v4262_v32 = vpop.f32.mrf.mxu2  ;;  %v4314_v38 = vld [vmem:[#allocation3 + $0x98] sm:$0xff] }
 0x40c   : > { %v4402_v1 = vld [vmem:[#allocation3 + $0x58] sm:$0xff] }
 0x40d   : > { %v4438_v41 = vadd.f32 %v7350_v29, %v4402_v1  ;;  %4371 = vst.msk [vmem:[#allocation3 + $0x60] sm:$0xff] %vm231_vm0, %v4339_v54  ;;  %v4986_v1 = vld [vmem:[%s5183_s13 + $0x90] sm:$0xff] }
 0x40f   : > { %v4470_v58 = vadd.f32 %v4979_v13, %v4438_v41 }
 0x410   : > { %v4125_v8 = vpop.f32.mrf.mxu0 }
 0x411   : > { %4502 = vst.msk [vmem:[%s7360_s7 + $0x58] sm:$0xff] %vm231_vm0, %v4470_v58  ;;  %v4239_v31 = vadd.f32 %v4238_v34, %v4125_v8 }
 0x413   : > { %v4340_v37 = vadd.f32 %v4308_v43, %v4239_v31  ;;  %4172 = vmatmul.f32.gmra.mxu0 %v7250_v50  ;;  %v4265_v13 = vpop.f32.mrf.mxu2  ;;  %v4315_v31 = vld [vmem:[#allocation3 + $0xa0] sm:$0xff] }
 0x414   : > { %v4403_v4 = vld [vmem:[#allocation3 + $0x60] sm:$0xff] }
 0x415   : > { %v4439_v2 = vadd.f32 %v7350_v29, %v4403_v4  ;;  %4372 = vst.msk [vmem:[#allocation3 + $0x68] sm:$0xff] %vm231_vm0, %v4340_v37 }
 0x417   : > { %v4471_v61 = vadd.f32 %v4980_v27, %v4439_v2  ;;  %v4987_v2 = vld [vmem:[%s5183_s13 + $0x98] sm:$0xff] }
 0x418   : > { %v4128_v7 = vpop.f32.mrf.mxu0 }
 0x419   : > { %4503 = vst.msk [vmem:[%s7360_s7 + $0x60] sm:$0xff] %vm231_vm0, %v4471_v61  ;;  %v4242_v25 = vadd.f32 %v4241_v20, %v4128_v7 }
 0x41b   : > { %v4341_v62 = vadd.f32 %v4309_v6, %v4242_v25  ;;  %4175 = vmatmul.f32.gmra.mxu0 %v7240_v26  ;;  %v4982_v26 = vld [vmem:[%s5183_s13 + $0x70] sm:$0xff]  ;;  %v4268_v7 = vpop.f32.mrf.mxu2  ;;  %v4316_v25 = vld [vmem:[#allocation3 + $0xa8] sm:$0xff] }
 0x41c   : > { %v4404_v50 = vld [vmem:[#allocation3 + $0x68] sm:$0xff] }
 0x41d   : > { %v4440_v48 = vadd.f32 %v7350_v29, %v4404_v50  ;;  %4373 = vst.msk [vmem:[#allocation3 + $0x70] sm:$0xff] %vm231_vm0, %v4341_v62 }
 0x41f   : > { %v4472_v19 = vadd.f32 %v4981_v40, %v4440_v48  ;;  %v4988_v48 = vld [vmem:[%s5183_s13 + $0xa0] sm:$0xff] }
 0x420   : > { %v4131_v60 = vpop.f32.mrf.mxu0 }
 0x421   : > { %4504 = vst.msk [vmem:[%s7360_s7 + $0x68] sm:$0xff] %vm231_vm0, %v4472_v19  ;;  %v4245_v53 = vadd.f32 %v4244_v24, %v4131_v60  ;;  %v4317_v60 = vld [vmem:[#allocation3 + $0xb0] sm:$0xff] }
 0x423   : > { %v4342_v56 = vadd.f32 %v4310_v11, %v4245_v53  ;;  %v4271_v11 = vpop.f32.mrf.mxu2 }
 0x424   : > { %v4405_v10 = vld [vmem:[#allocation3 + $0x70] sm:$0xff] }
 0x425   : > { %v4441_v30 = vadd.f32 %v7350_v29, %v4405_v10  ;;  %4374 = vst.msk [vmem:[#allocation3 + $0x78] sm:$0xff] %vm231_vm0, %v4342_v56 }
 0x427   : > { %v4473_v34 = vadd.f32 %v4982_v26, %v4441_v30  ;;  %v4989_v30 = vld [vmem:[%s5183_s13 + $0xa8] sm:$0xff] }
 0x428   : > { %v4134_v52 = vpop.f32.mrf.mxu0 }
 0x429   : > { %4505 = vst.msk [vmem:[%s7360_s7 + $0x70] sm:$0xff] %vm231_vm0, %v4473_v34  ;;  %v4248_v3 = vadd.f32 %v4247_v47, %v4134_v52 }
 0x42b   : > { %v4343_v55 = vadd.f32 %v4311_v33, %v4248_v3  ;;  %v4318_v3 = vld [vmem:[#allocation3 + $0xb8] sm:$0xff] }
 0x42c   : > { %v4406_v5 = vld [vmem:[#allocation3 + $0x78] sm:$0xff] }
 0x42d   : > { %v4442_v14 = vadd.f32 %v7350_v29, %v4406_v5  ;;  %4375 = vst.msk [vmem:[#allocation3 + $0x80] sm:$0xff] %vm231_vm0, %v4343_v55  ;;  %v4274_v5 = vpop.f32.mrf.mxu2 }
 0x42f   : > { %v4474_v22 = vadd.f32 %v4983_v15, %v4442_v14  ;;  %v4990_v14 = vld [vmem:[%s5183_s13 + $0xb0] sm:$0xff] }
 0x430   : > { %v4137_v9 = vpop.f32.mrf.mxu0 }
 0x431   : > { %4506 = vst.msk [vmem:[%s7360_s7 + $0x78] sm:$0xff] %vm231_vm0, %v4474_v22  ;;  %v4251_v20 = vadd.f32 %v4250_v18, %v4137_v9 }
 0x433   : > { %v4344_v23 = vadd.f32 %v4312_v59, %v4251_v20  ;;  %v4319_v20 = vld [vmem:[#allocation3 + $0xc0] sm:$0xff] }
 0x434   : > { %v4407_v17 = vld [vmem:[#allocation3 + $0x80] sm:$0xff] }
 0x435   : > { %v4443_v36 = vadd.f32 %v7350_v29, %v4407_v17  ;;  %4376 = vst.msk [vmem:[#allocation3 + $0x88] sm:$0xff] %vm231_vm0, %v4344_v23  ;;  %v4991_v17 = vld [vmem:[%s5183_s13 + $0xb8] sm:$0xff] }
 0x437   : > { %v4475_v21 = vadd.f32 %v4984_v42, %v4443_v36  ;;  %v4277_v42 = vpop.f32.mrf.mxu2 }
 0x438   : > { %v4140_v46 = vpop.f32.mrf.mxu0 }
 0x439   : > { %4507 = vst.msk [vmem:[%s7360_s7 + $0x80] sm:$0xff] %vm231_vm0, %v4475_v21  ;;  %v4254_v28 = vadd.f32 %v4253_v35, %v4140_v46 }
 0x43b   : > { %v4345_v24 = vadd.f32 %v4313_v0, %v4254_v28  ;;  %v4320_v28 = vld [vmem:[#allocation3 + $0xc8] sm:$0xff] }
 0x43c   : > { %v4408_v39 = vld [vmem:[#allocation3 + $0x88] sm:$0xff] }
 0x43d   : > { %v4444_v44 = vadd.f32 %v7350_v29, %v4408_v39  ;;  %4377 = vst.msk [vmem:[#allocation3 + $0x90] sm:$0xff] %vm231_vm0, %v4345_v24 }
 0x43f   : > { %v4476_v16 = vadd.f32 %v4985_v12, %v4444_v44  ;;  %v4992_v44 = vld [vmem:[%s5183_s13 + $0xc0] sm:$0xff] }
 0x440   : > { %v4143_v45 = vpop.f32.mrf.mxu0 }
 0x441   : > { %4508 = vst.msk [vmem:[%s7360_s7 + $0x88] sm:$0xff] %vm231_vm0, %v4476_v16  ;;  %v4257_v49 = vadd.f32 %v4256_v57, %v4143_v45  ;;  %v4280_v45 = vpop.f32.mrf.mxu2 }
 0x443   : > { %v4346_v63 = vadd.f32 %v4314_v38, %v4257_v49  ;;  %v4321_v49 = vld [vmem:[#allocation3 + $0xd0] sm:$0xff] }
 0x444   : > { %v4409_v54 = vld [vmem:[#allocation3 + $0x90] sm:$0xff] }
 0x445   : > { %v4445_v47 = vadd.f32 %v7350_v29, %v4409_v54  ;;  %4378 = vst.msk [vmem:[#allocation3 + $0x98] sm:$0xff] %vm231_vm0, %v4346_v63 }
 0x447   : > { %v4477_v41 = vadd.f32 %v4986_v1, %v4445_v47  ;;  %v4993_v47 = vld [vmem:[%s5183_s13 + $0xc8] sm:$0xff] }
 0x448   : > { %v4146_v58 = vpop.f32.mrf.mxu0 }
 0x449   : > { %4509 = vst.msk [vmem:[%s7360_s7 + $0x90] sm:$0xff] %vm231_vm0, %v4477_v41  ;;  %v4260_v8 = vadd.f32 %v4259_v51, %v4146_v58  ;;  %v4322_v58 = vld [vmem:[#allocation3 + $0xd8] sm:$0xff] }
 0x44b   : > { %v4347_v43 = vadd.f32 %v4315_v31, %v4260_v8  ;;  %v4283_v31 = vpop.f32.mrf.mxu2 }
 0x44c   : > { %v4410_v37 = vld [vmem:[#allocation3 + $0x98] sm:$0xff] }
 0x44d   : > { %v4446_v4 = vadd.f32 %v7350_v29, %v4410_v37  ;;  %4379 = vst.msk [vmem:[#allocation3 + $0xa0] sm:$0xff] %vm231_vm0, %v4347_v43 }
 0x44f   : > { %v4478_v18 = vadd.f32 %v4987_v2, %v4446_v4  ;;  %v4994_v4 = vld [vmem:[%s5183_s13 + $0xd0] sm:$0xff] }
 0x450   : > { %v4149_v27 = vpop.f32.mrf.mxu0 }
 0x451   : > { %4510 = vst.msk [vmem:[%s7360_s7 + $0x98] sm:$0xff] %vm231_vm0, %v4478_v18  ;;  %v4263_v61 = vadd.f32 %v4262_v32, %v4149_v27 }
 0x453   : > { %v4348_v6 = vadd.f32 %v4316_v25, %v4263_v61  ;;  %v4323_v61 = vld [vmem:[#allocation3 + $0xe0] sm:$0xff] }
 0x454   : > { %v4411_v62 = vld [vmem:[#allocation3 + $0xa0] sm:$0xff] }
 0x455   : > { %v4447_v50 = vadd.f32 %v7350_v29, %v4411_v62  ;;  %4380 = vst.msk [vmem:[#allocation3 + $0xa8] sm:$0xff] %vm231_vm0, %v4348_v6  ;;  %v4286_v62 = vpop.f32.mrf.mxu2 }
 0x457   : > { %v4479_v40 = vadd.f32 %v4988_v48, %v4447_v50  ;;  %v4995_v50 = vld [vmem:[%s5183_s13 + $0xd8] sm:$0xff] }
 0x458   : > { %v4152_v19 = vpop.f32.mrf.mxu0 }
 0x459   : > { %4511 = vst.msk [vmem:[%s7360_s7 + $0xa0] sm:$0xff] %vm231_vm0, %v4479_v40  ;;  %v4266_v35 = vadd.f32 %v4265_v13, %v4152_v19 }
 0x45b   : > { %v4349_v53 = vadd.f32 %v4317_v60, %v4266_v35  ;;  %v4324_v35 = vld [vmem:[#allocation3 + $0xe8] sm:$0xff] }
 0x45c   : > { %v4412_v56 = vld [vmem:[#allocation3 + $0xa8] sm:$0xff] }
 0x45d   : > { %v4448_v10 = vadd.f32 %v7350_v29, %v4412_v56  ;;  %4381 = vst.msk [vmem:[#allocation3 + $0xb0] sm:$0xff] %vm231_vm0, %v4349_v53  ;;  %v4289_v56 = vpop.f32.mrf.mxu2 }
 0x45f   : > { %v4480_v26 = vadd.f32 %v4989_v30, %v4448_v10  ;;  %v4996_v10 = vld [vmem:[%s5183_s13 + $0xe0] sm:$0xff] }
 0x460   : > { %v4155_v34 = vpop.f32.mrf.mxu0 }
 0x461   : > { %4512 = vst.msk [vmem:[%s7360_s7 + $0xa8] sm:$0xff] %vm231_vm0, %v4480_v26  ;;  %v4269_v52 = vadd.f32 %v4268_v7, %v4155_v34 }
 0x463   : > { %v4350_v57 = vadd.f32 %v4318_v3, %v4269_v52  ;;  %v4325_v52 = vld [vmem:[#allocation3 + $0xf0] sm:$0xff] }
 0x464   : > { %v4413_v33 = vld [vmem:[#allocation3 + $0xb0] sm:$0xff] }
 0x465   : > { %v4449_v55 = vadd.f32 %v7350_v29, %v4413_v33  ;;  %4382 = vst.msk [vmem:[#allocation3 + $0xb8] sm:$0xff] %vm231_vm0, %v4350_v57 }
 0x467   : > { %v4481_v15 = vadd.f32 %v4990_v14, %v4449_v55  ;;  %v4997_v55 = vld [vmem:[%s5183_s13 + $0xe8] sm:$0xff] }
 0x468   : > { %v4158_v22 = vpop.f32.mrf.mxu0 }
 0x469   : > { %4513 = vst.msk [vmem:[%s7360_s7 + $0xb0] sm:$0xff] %vm231_vm0, %v4481_v15  ;;  %v4272_v9 = vadd.f32 %v4271_v11, %v4158_v22  ;;  %v4998_v22 = vld [vmem:[%s5183_s13 + $0xf0] sm:$0xff] }
 0x46b   : > { %v4351_v59 = vadd.f32 %v4319_v20, %v4272_v9 }
 0x46c   : > { %v4414_v23 = vld [vmem:[#allocation3 + $0xb8] sm:$0xff] }
 0x46d   : > { %v4450_v51 = vadd.f32 %v7350_v29, %v4414_v23  ;;  %4383 = vst.msk [vmem:[#allocation3 + $0xc0] sm:$0xff] %vm231_vm0, %v4351_v59 }
 0x46f   : > { %v4482_v36 = vadd.f32 %v4991_v17, %v4450_v51 }
 0x470   : > { %v4161_v21 = vpop.f32.mrf.mxu0 }
 0x471   : > { %4514 = vst.msk [vmem:[%s7360_s7 + $0xb8] sm:$0xff] %vm231_vm0, %v4482_v36  ;;  %v4275_v46 = vadd.f32 %v4274_v5, %v4161_v21 }
 0x473   : > { %v4352_v0 = vadd.f32 %v4320_v28, %v4275_v46 }
 0x474   : > { %v4415_v24 = vld [vmem:[#allocation3 + $0xc0] sm:$0xff] }
 0x475   : > { %v4451_v39 = vadd.f32 %v7350_v29, %v4415_v24  ;;  %4384 = vst.msk [vmem:[#allocation3 + $0xc8] sm:$0xff] %vm231_vm0, %v4352_v0 }
 0x477   : > { %v4483_v32 = vadd.f32 %v4992_v44, %v4451_v39 }
 0x478   : > { %v4164_v12 = vpop.f32.mrf.mxu0 }
 0x479   : > { %4515 = vst.msk [vmem:[%s7360_s7 + $0xc0] sm:$0xff] %vm231_vm0, %v4483_v32  ;;  %v4278_v16 = vadd.f32 %v4277_v42, %v4164_v12 }
 0x47b   : > { %v4353_v38 = vadd.f32 %v4321_v49, %v4278_v16 }
 0x47c   : > { %v4416_v63 = vld [vmem:[#allocation3 + $0xc8] sm:$0xff] }
 0x47d   : > { %v4452_v54 = vadd.f32 %v7350_v29, %v4416_v63  ;;  %4385 = vst.msk [vmem:[#allocation3 + $0xd0] sm:$0xff] %vm231_vm0, %v4353_v38 }
 0x47f   : > { %v4484_v1 = vadd.f32 %v4993_v47, %v4452_v54 }
 0x480   : > { %v4167_v41 = vpop.f32.mrf.mxu0 }
 0x481   : > { %4516 = vst.msk [vmem:[%s7360_s7 + $0xc8] sm:$0xff] %vm231_vm0, %v4484_v1  ;;  %v4281_v13 = vadd.f32 %v4280_v45, %v4167_v41 }
 0x483   : > { %v4354_v8 = vadd.f32 %v4322_v58, %v4281_v13 }
 0x484   : > { %v4417_v43 = vld [vmem:[#allocation3 + $0xd0] sm:$0xff] }
 0x485   : > { %v4453_v37 = vadd.f32 %v7350_v29, %v4417_v43  ;;  %4386 = vst.msk [vmem:[#allocation3 + $0xd8] sm:$0xff] %vm231_vm0, %v4354_v8 }
 0x487   : > { %v4485_v2 = vadd.f32 %v4994_v4, %v4453_v37 }
 0x488   : > { %v4170_v18 = vpop.f32.mrf.mxu0 }
 0x489   : > { %4517 = vst.msk [vmem:[%s7360_s7 + $0xd0] sm:$0xff] %vm231_vm0, %v4485_v2  ;;  %v4284_v27 = vadd.f32 %v4283_v31, %v4170_v18 }
 0x48b   : > { %v4355_v7 = vadd.f32 %v4323_v61, %v4284_v27 }
 0x48c   : > { %v4418_v25 = vld [vmem:[#allocation3 + $0xd8] sm:$0xff] }
 0x48d   : > { %v4454_v6 = vadd.f32 %v7350_v29, %v4418_v25  ;;  %4387 = vst.msk [vmem:[#allocation3 + $0xe0] sm:$0xff] %vm231_vm0, %v4355_v7 }
 0x48f   : > { %v4486_v48 = vadd.f32 %v4995_v50, %v4454_v6 }
 0x490   : > { %v4173_v40 = vpop.f32.mrf.mxu0 }
 0x491   : > { %4518 = vst.msk [vmem:[%s7360_s7 + $0xd8] sm:$0xff] %vm231_vm0, %v4486_v48  ;;  %v4287_v19 = vadd.f32 %v4286_v62, %v4173_v40 }
 0x493   : > { %v4356_v60 = vadd.f32 %v4324_v35, %v4287_v19 }
 0x494   : > { %v4419_v53 = vld [vmem:[#allocation3 + $0xe0] sm:$0xff] }
 0x495   : > { %v4455_v11 = vadd.f32 %v7350_v29, %v4419_v53  ;;  %4388 = vst.msk [vmem:[#allocation3 + $0xe8] sm:$0xff] %vm231_vm0, %v4356_v60 }
 0x497   : > { %v4487_v30 = vadd.f32 %v4996_v10, %v4455_v11 }
 0x498   : > { %v4176_v26 = vpop.f32.mrf.mxu0 }
 0x499   : > { %4519 = vst.msk [vmem:[%s7360_s7 + $0xe0] sm:$0xff] %vm231_vm0, %v4487_v30  ;;  %v4290_v34 = vadd.f32 %v4289_v56, %v4176_v26 }
 0x49b   : > { %v4357_v3 = vadd.f32 %v4325_v52, %v4290_v34 }
 0x49c   : > { %v4420_v57 = vld [vmem:[#allocation3 + $0xe8] sm:$0xff] }
 0x49d   : > { %v4456_v33 = vadd.f32 %v7350_v29, %v4420_v57  ;;  %4389 = vst.msk [vmem:[#allocation3 + $0xf0] sm:$0xff] %vm231_vm0, %v4357_v3 }
 0x49f   : > { %v4488_v5 = vadd.f32 %v4997_v55, %v4456_v33 }
 0x4a1   : > { %4520 = vst.msk [vmem:[%s7360_s7 + $0xe8] sm:$0xff] %vm231_vm0, %v4488_v5 }
 0x4a4   : > { %v4421_v14 = vld [vmem:[#allocation3 + $0xf0] sm:$0xff] }
 0x4a5   : > { %v4457_v15 = vadd.f32 %v7350_v29, %v4421_v14 }
 0x4a7   : > { %v4489_v9 = vadd.f32 %v4998_v22, %v4457_v15 }
 0x4a9   : > { %4521 = vst.msk [vmem:[%s7360_s7 + $0xf0] sm:$0xff] %vm231_vm0, %v4489_v9 }
 0x4aa   : > { %5026 = shalt.err (!%p5023_p3)
}
 0x4ab   : > { %s5065_s13 = smov 128   ;;  %s5066_s25 = smov 8  }
 0x4ac   : > { %4919 = dma.vmem_to_hbm [thread:$0]  (%p5135_p5), %s4537_s11, 4096, %s4539_s14, %s4524_s22, %s5065_s13, %s5065_s13, %s5066_s25  }
 0x4ad PF: > { %p4925_p4 = scmp.ge.s32.totalorder %s5061_s21, 2  ;;  %s4553_s7 = sand.u32 1, %s5049_s18  }
 0x4ae   : > { %s4554_s12 = scalar_lea.sflag [#allocation5], %s4553_s7 }
 0x4af   : > { %p4922_p7 = pnand %p4925_p4, %p5139_p6 }
 0x4b1   : > { %p4923_p8 = pneg %p4922_p7 }
 0x4b3   : > { %5044 = dma.done.wait (%p4923_p8), %s4554_s12, 4096  }
 0x4b4   : > { %5046 = vsyncadd (%p4923_p8), %s4554_s12, 4294963200  ;;  %p15_p9 = scmp.ge.s32.totalorder %s5122_s24, 4   ;;  %s7596_s18 = smov %s5053_s19 }
 0x4b5   : > { %s7597_s19 = smov %s5057_s20  ;;  %s7598_s20 = smov %s5133_s27 }
 0x4b6   : > { %s7599_s21 = smov %s5122_s24  ;;  %17 = sbr.rel (!%p15_p9) target bundleno = 3 (0x3), region = 79 }
 0x4bb   :  { %4560 = vsyncpa [#allocation5], 1 }
 0x4bc   :  { %4562 = vsyncpa [#allocation5 + $0x1], 1 }

</bundles_post_ra>
